<compile_context>
chip_gen: v5e
topology: v5e:2x2
jax: 0.10.0
libtpu: 0.0.40
codegen_flags: <defaults>
</compile_context>

<pallas_src>
import numpy as np
import jax
import jax.numpy as jnp
from jax.experimental import pallas as pl
from jax.experimental.pallas import tpu as pltpu

_BN_EPS = 1e-5
_VMEM = pl.BlockSpec(memory_space=pltpu.MemorySpace.VMEM)


# ---------------------------------------------------------------------------
# Fused forward builder
# ---------------------------------------------------------------------------
def build_forward(n, h, w):
    """Build forward(x_nchw, kernel_params) for a fixed (batch, H, W)."""
    assert h % 2 == 0 and w % 2 == 0 and h >= 12 and w >= 12
    c0, c1, c2, n_cls = 3, 6, 16, 10

    hc1, wc1 = h - 2, w - 2                  # conv1 output spatial
    nv1 = hc1 * wc1 * n                      # conv1 rows (compact, all valid)
    stride1 = wc1 * n                        # flat rows per conv1 image row
    hp1, wp1 = hc1 // 2, wc1 // 2            # pool1 output spatial
    np1 = hp1 * wp1 * n
    wn1 = wp1 * n                            # flat rows per pool1 image row
    hc2, wc2 = hp1 - 2, wp1 - 2              # conv2 output spatial
    l2 = np1 - 2 * wn1 - 2 * n               # conv2 rows (shifted-window layout)
    nv2 = hc2 * wc2 * n                      # valid conv2 rows
    hp2, wp2 = hc2 // 2, wc2 // 2            # pool2 output spatial
    assert c2 * hp2 * wp2 == 64              # LazyLinear(128) inferred 64 feats

    # pool1: number of maxed rows the compaction gather can address
    g1 = 2 * (hp1 - 1) * stride1 + 2 * (wp1 - 1) * n + n
    assert g1 + stride1 + n == nv1           # pool1 shifted windows in bounds
    assert 2 * wn1 + 2 * n + l2 == np1       # conv2 shifted windows in bounds
    assert (2 * hp2 - 1) * wn1 + (2 * wp2 - 1) * n + n <= l2

    # --- tiny shape-derived constant tables (replace the old 142 KB selector)
    r_ = np.arange(np1)
    oh_ = r_ // (wp1 * n)
    ow_ = (r_ % (wp1 * n)) // n
    b_ = r_ % n
    tgt1 = jnp.asarray((2 * oh_ * stride1 + 2 * ow_ * n + b_)
                       .reshape(np1, 1).astype(np.int32))
    r2_ = np.arange(l2)
    msk2_np = np.where((r2_ % wn1) < wc2 * n, 1.0 / nv2, 0.0)
    assert int(np.count_nonzero(msk2_np)) == nv2
    msk2 = jnp.asarray(msk2_np.reshape(1, l2).astype(np.float32))

    def kernel(x_ref, w1_ref, w2_ref, fw1_ref, fw2_ref, pk_ref, tgt_ref,
               msk2_ref, o_ref, y1_ref, p1_ref, y2_ref):
        pk = pk_ref[...]                                   # (8, 128) packed params

        def bn_affine(y, inv_count, gamma, beta):
            # One merged MXU reduction: dot(mask/count, [y | y*y]) -> mean, E[y^2]
            cc = y.shape[-1]
            stats = jnp.dot(inv_count, jnp.concatenate([y, y * y], axis=-1),
                            preferred_element_type=jnp.float32)
            mean, msq = stats[:, :cc], stats[:, cc:]
            var = jnp.maximum(msq - mean * mean, 0.0)      # biased variance
            scale = gamma * jax.lax.rsqrt(var + _BN_EPS)
            return y * scale + (beta - mean * scale)

        # ---- block 1: Conv2d(3,6,3) as ONE K=27 matmul + ReLU + BatchNorm ----
        y1 = jnp.maximum(
            jnp.dot(x_ref[...], w1_ref[...],
                    preferred_element_type=jnp.float32) + pk[0:1, :c1], 0.0)
        inv1 = jnp.full((1, nv1), 1.0 / nv1, dtype=jnp.float32)
        y1_ref[...] = bn_affine(y1, inv1, pk[1:2, :c1], pk[2:3, :c1])

        # ---- MaxPool2d(2,2) #1: max of 4 shifted windows, then ONE gather ----
        m1 = None
        for dy in range(2):
            for dx in range(2):
                off = dy * stride1 + dx * n
                v = y1_ref[off:off + g1, :]
                m1 = v if m1 is None else jnp.maximum(m1, v)
        col = jax.lax.broadcasted_iota(jnp.int32, (np1, g1), 1)
        sel1 = jnp.where(col == tgt_ref[...], 1.0, 0.0)    # one-hot, built in-VMEM
        p1_ref[...] = jnp.dot(sel1, m1, preferred_element_type=jnp.float32)

        # ---- block 2: Conv2d(6,16,3) as ONE K=54 matmul + ReLU + BatchNorm ---
        cols2 = jnp.concatenate(
            [p1_ref[ky * wn1 + kx * n: ky * wn1 + kx * n + l2, :]
             for ky in range(3) for kx in range(3)], axis=-1)       # (l2, 54)
        y2 = jnp.maximum(
            jnp.dot(cols2, w2_ref[...],
                    preferred_element_type=jnp.float32) + pk[3:4, :c2], 0.0)
        y2_ref[...] = bn_affine(y2, msk2_ref[...], pk[4:5, :c2], pk[5:6, :c2])

        # ---- MaxPool2d(2,2) #2 + Flatten: pure slicing + lane concat ---------
        blocks = []
        for oh2 in range(hp2):
            for ow2 in range(wp2):
                blk = None
                for dy in range(2):
                    for dx in range(2):
                        s = (2 * oh2 + dy) * wn1 + (2 * ow2 + dx) * n
                        v = y2_ref[s:s + n, :]
                        blk = v if blk is None else jnp.maximum(blk, v)
                blocks.append(blk)
        p2 = jnp.concatenate(blocks, axis=-1)                        # (n, 64)

        # ---- head: Linear(64,128) + ReLU + Linear(128,10) + Softmax ----------
        hid = jnp.maximum(
            jnp.dot(p2, fw1_ref[...],
                    preferred_element_type=jnp.float32) + pk[6:7, :], 0.0)
        logits = jnp.dot(hid, fw2_ref[...],
                         preferred_element_type=jnp.float32) + pk[7:8, :n_cls]
        z = logits - jnp.max(logits, axis=-1, keepdims=True)
        e = jnp.exp(z)
        o_ref[...] = e / jnp.sum(e, axis=-1, keepdims=True)   # exact normalize

    fused_call = pl.pallas_call(
        kernel,
        out_shape=jax.ShapeDtypeStruct((n, n_cls), jnp.float32),
        in_specs=[_VMEM] * 8,
        out_specs=_VMEM,
        scratch_shapes=[
            pltpu.VMEM((nv1, c1), jnp.float32),   # conv1+BN out (windowed reads)
            pltpu.VMEM((np1, c1), jnp.float32),   # pool1 out    (windowed reads)
            pltpu.VMEM((l2, c2), jnp.float32),    # conv2+BN out (windowed reads)
        ],
    )

    def forward(x_nchw, kp):
        # NCHW -> (H, W, N, C), then im2col (valid rows only, lane order (k, ci))
        # done once in the wrapper with plain XLA ops (~42 KB).
        xh = jnp.transpose(x_nchw, (2, 3, 0, 1))
        cols = jnp.concatenate(
            [xh[ky:ky + hc1, kx:kx + wc1] for ky in range(3) for kx in range(3)],
            axis=-1)                                  # (hc1, wc1, n, 9*c0)
        x_im2col = cols.reshape(nv1, 9 * c0)
        return fused_call(x_im2col, kp["w1"], kp["w2"], kp["fw1"], kp["fw2"],
                          kp["packed"], tgt1, msk2)

    return forward


# ---------------------------------------------------------------------------
# Parameters (synthetic, in native PyTorch layouts) + one-time layout prep
# ---------------------------------------------------------------------------
def init_params(key):
    """Synthetic parameters in PyTorch layouts (Conv: OIHW, Linear: (out,in))."""
    ks = jax.random.split(key, 10)
    return {
        "conv1_w": 0.1 * jax.random.normal(ks[0], (6, 3, 3, 3), jnp.float32),
        "conv1_b": 0.01 * jax.random.normal(ks[1], (6,), jnp.float32),
        "bn1_g": 1.0 + 0.1 * jax.random.normal(ks[2], (6,), jnp.float32),
        "bn1_b": 0.1 * jax.random.normal(ks[3], (6,), jnp.float32),
        "conv2_w": 0.1 * jax.random.normal(ks[4], (16, 6, 3, 3), jnp.float32),
        "conv2_b": 0.01 * jax.random.normal(ks[5], (16,), jnp.float32),
        "bn2_g": 1.0 + 0.1 * jax.random.normal(ks[6], (16,), jnp.float32),
        "bn2_b": 0.1 * jax.random.normal(ks[7], (16,), jnp.float32),
        "fc1_w": 0.1 * jax.random.normal(ks[8], (128, 64), jnp.float32),
        "fc1_b": jnp.zeros((128,), jnp.float32),
        "fc2_w": 0.1 * jax.random.normal(ks[9], (10, 128), jnp.float32),
        "fc2_b": jnp.zeros((10,), jnp.float32),
    }


def prepare_params(p, hp2=2, wp2=2):
    """One-time conversion of PyTorch-layout params to fused-kernel layouts."""
    def conv_w(wt):   # (Cout,Cin,3,3) -> (9*Cin, Cout), K order = (ky, kx, ci)
        co, ci = wt.shape[0], wt.shape[1]
        return jnp.transpose(wt, (2, 3, 1, 0)).reshape(9 * ci, co)

    # fc1 (128,64): in-features in PyTorch (C=16,H=hp2,W=wp2) flatten order ->
    # regroup so lane order matches the kernel's (spatial-block, channel) concat.
    fw1 = jnp.transpose(p["fc1_w"].T.reshape(16, hp2, wp2, 128),
                        (1, 2, 0, 3)).reshape(hp2 * wp2 * 16, 128)

    packed = jnp.zeros((8, 128), jnp.float32)
    packed = packed.at[0, :6].set(p["conv1_b"])
    packed = packed.at[1, :6].set(p["bn1_g"])
    packed = packed.at[2, :6].set(p["bn1_b"])
    packed = packed.at[3, :16].set(p["conv2_b"])
    packed = packed.at[4, :16].set(p["bn2_g"])
    packed = packed.at[5, :16].set(p["bn2_b"])
    packed = packed.at[6, :].set(p["fc1_b"])
    packed = packed.at[7, :10].set(p["fc2_b"])

    return {"w1": conv_w(p["conv1_w"]), "w2": conv_w(p["conv2_w"]),
            "fw1": fw1, "fw2": p["fc2_w"].T, "packed": packed}


# ---------------------------------------------------------------------------
# Pure-JAX reference (training-mode BN, highest matmul precision)
# ---------------------------------------------------------------------------
def reference_forward(x, p):
    prec = jax.lax.Precision.HIGHEST

    def conv(t, wt, b):
        y = jax.lax.conv_general_dilated(
            t, wt, window_strides=(1, 1), padding="VALID",
            dimension_numbers=("NCHW", "OIHW", "NCHW"), precision=prec)
        return y + b.reshape(1, -1, 1, 1)

    def bn(t, g, b):
        mu = jnp.mean(t, axis=(0, 2, 3), keepdims=True)
        var = jnp.mean((t - mu) ** 2, axis=(0, 2, 3), keepdims=True)
        return (g.reshape(1, -1, 1, 1) * (t - mu) * jax.lax.rsqrt(var + _BN_EPS)
                + b.reshape(1, -1, 1, 1))

    def pool(t):
        nb, c, hh, ww = t.shape
        t = t[:, :, :hh // 2 * 2, :ww // 2 * 2].reshape(nb, c, hh // 2, 2, ww // 2, 2)
        return t.max(axis=(3, 5))

    y = pool(bn(jax.nn.relu(conv(x, p["conv1_w"], p["conv1_b"])), p["bn1_g"], p["bn1_b"]))
    y = pool(bn(jax.nn.relu(conv(y, p["conv2_w"], p["conv2_b"])), p["bn2_g"], p["bn2_b"]))
    flat = y.reshape(y.shape[0], -1)
    hid = jax.nn.relu(jnp.dot(flat, p["fc1_w"].T, precision=prec) + p["fc1_b"])
    logits = jnp.dot(hid, p["fc2_w"].T, precision=prec) + p["fc2_b"]
    return jax.nn.softmax(logits, axis=-1)


if __name__ == "__main__":
    key = jax.random.PRNGKey(0)
    k_x, k_p = jax.random.split(key)
    x = jax.random.normal(k_x, (2, 3, 16, 16), jnp.float32)   # NCHW, like PyTorch

    params = init_params(k_p)
    kparams = prepare_params(params)                          # one-time layout prep

    forward = jax.jit(build_forward(x.shape[0], x.shape[2], x.shape[3]))
    out = jax.block_until_ready(forward(x, kparams))

    assert out.shape == (x.shape[0], 10)
    out_np = np.asarray(out)
    assert np.allclose(out_np.sum(axis=-1), 1.0, atol=1e-4)   # softmax rows sum to 1
    ref = np.asarray(jax.jit(reference_forward)(x, params))
    assert np.allclose(out_np, ref, atol=5e-3), float(np.abs(out_np - ref).max())
    print("KERNEL_OK")
</pallas_src>

<mosaic_0001>
module attributes {stable_mosaic.version = 11 : i64} {
  func.func @kernel(%arg0: memref<392x27xf32, #tpu.memory_space<vmem>>, %arg1: memref<27x6xf32, #tpu.memory_space<vmem>>, %arg2: memref<54x16xf32, #tpu.memory_space<vmem>>, %arg3: memref<64x128xf32, #tpu.memory_space<vmem>>, %arg4: memref<128x10xf32, #tpu.memory_space<vmem>>, %arg5: memref<8x128xf32, #tpu.memory_space<vmem>>, %arg6: memref<98x1xi32, #tpu.memory_space<vmem>>, %arg7: memref<1x66xf32, #tpu.memory_space<vmem>>, %arg8: memref<2x10xf32, #tpu.memory_space<vmem>>, %arg9: memref<392x6xf32, #tpu.memory_space<vmem>>, %arg10: memref<98x6xf32, #tpu.memory_space<vmem>>, %arg11: memref<66x16xf32, #tpu.memory_space<vmem>>) attributes {dimension_semantics = [], scalar_prefetch = 0 : i64, scratch_operands = 3 : i64, tpu.core_type = #tpu.core_type<tc>} {
    %c0 = arith.constant 0 : index
    %c0_0 = arith.constant 0 : index
    %0 = vector.load %arg5[%c0, %c0_0] : memref<8x128xf32, #tpu.memory_space<vmem>>, vector<8x128xf32>
    %c0_1 = arith.constant 0 : index
    %c0_2 = arith.constant 0 : index
    %1 = vector.load %arg0[%c0_1, %c0_2] : memref<392x27xf32, #tpu.memory_space<vmem>>, vector<392x27xf32>
    %c0_3 = arith.constant 0 : index
    %c0_4 = arith.constant 0 : index
    %2 = vector.load %arg1[%c0_3, %c0_4] : memref<27x6xf32, #tpu.memory_space<vmem>>, vector<27x6xf32>
    %cst = arith.constant dense<0.000000e+00> : vector<392x6xf32>
    %3 = tpu.matmul %1, %2, %cst {dimension_numbers = #tpu.dot_dimension_numbers<[1], [0], [0], [1], [0, 0, 1, 1], [], []>} : vector<392x27xf32>, vector<27x6xf32>, vector<392x6xf32> -> vector<392x6xf32>
    %4 = vector.extract_strided_slice %0 {offsets = [0, 0], sizes = [1, 6], strides = [1, 1]} : vector<8x128xf32> to vector<1x6xf32>
    %5 = vector.broadcast %4 : vector<1x6xf32> to vector<392x6xf32>
    %6 = arith.addf %3, %5 : vector<392x6xf32>
    %cst_5 = arith.constant 0.000000e+00 : f32
    %7 = vector.broadcast %cst_5 : f32 to vector<392x6xf32>
    %8 = arith.maximumf %6, %7 : vector<392x6xf32>
    %cst_6 = arith.constant 0.00255102036 : f32
    %9 = vector.broadcast %cst_6 : f32 to vector<1x392xf32>
    %10 = vector.extract_strided_slice %0 {offsets = [1, 0], sizes = [1, 6], strides = [1, 1]} : vector<8x128xf32> to vector<1x6xf32>
    %11 = vector.extract_strided_slice %0 {offsets = [2, 0], sizes = [1, 6], strides = [1, 1]} : vector<8x128xf32> to vector<1x6xf32>
    %12 = arith.mulf %8, %8 : vector<392x6xf32>
    %13 = tpu.concatenate %8, %12 in 1 : vector<392x6xf32>, vector<392x6xf32> -> vector<392x12xf32>
    %cst_7 = arith.constant dense<0.000000e+00> : vector<1x12xf32>
    %14 = tpu.matmul %9, %13, %cst_7 {dimension_numbers = #tpu.dot_dimension_numbers<[1], [0], [0], [1], [0, 0, 1, 1], [], []>} : vector<1x392xf32>, vector<392x12xf32>, vector<1x12xf32> -> vector<1x12xf32>
    %15 = vector.extract_strided_slice %14 {offsets = [0, 0], sizes = [1, 6], strides = [1, 1]} : vector<1x12xf32> to vector<1x6xf32>
    %16 = vector.extract_strided_slice %14 {offsets = [0, 6], sizes = [1, 6], strides = [1, 1]} : vector<1x12xf32> to vector<1x6xf32>
    %17 = arith.mulf %15, %15 : vector<1x6xf32>
    %18 = arith.subf %16, %17 : vector<1x6xf32>
    %cst_8 = arith.constant 0.000000e+00 : f32
    %19 = vector.broadcast %cst_8 : f32 to vector<1x6xf32>
    %20 = arith.maximumf %18, %19 : vector<1x6xf32>
    %cst_9 = arith.constant 9.99999974E-6 : f32
    %21 = vector.broadcast %cst_9 : f32 to vector<1x6xf32>
    %22 = arith.addf %20, %21 : vector<1x6xf32>
    %23 = math.rsqrt %22 : vector<1x6xf32>
    %24 = arith.mulf %10, %23 : vector<1x6xf32>
    %25 = vector.broadcast %24 : vector<1x6xf32> to vector<392x6xf32>
    %26 = arith.mulf %8, %25 : vector<392x6xf32>
    %27 = arith.mulf %15, %24 : vector<1x6xf32>
    %28 = arith.subf %11, %27 : vector<1x6xf32>
    %29 = vector.broadcast %28 : vector<1x6xf32> to vector<392x6xf32>
    %30 = arith.addf %26, %29 : vector<392x6xf32>
    %c0_10 = arith.constant 0 : index
    %c0_11 = arith.constant 0 : index
    %31 = vector.load %arg9[%c0_10, %c0_11] : memref<392x6xf32, #tpu.memory_space<vmem>>, vector<392x6xf32>
    tpu.vector_store %arg9[%c0_10, %c0_11], %30 {strides = array<i32>} : memref<392x6xf32, #tpu.memory_space<vmem>>, vector<392x6xf32>,
    %c0_12 = arith.constant 0 : index
    %c0_13 = arith.constant 0 : index
    %32 = vector.load %arg9[%c0_12, %c0_13] : memref<392x6xf32, #tpu.memory_space<vmem>>, vector<362x6xf32>
    %c2 = arith.constant 2 : index
    %c0_14 = arith.constant 0 : index
    %33 = vector.load %arg9[%c2, %c0_14] : memref<392x6xf32, #tpu.memory_space<vmem>>, vector<362x6xf32>
    %34 = arith.maximumf %32, %33 : vector<362x6xf32>
    %c28 = arith.constant 28 : index
    %c0_15 = arith.constant 0 : index
    %35 = vector.load %arg9[%c28, %c0_15] : memref<392x6xf32, #tpu.memory_space<vmem>>, vector<362x6xf32>
    %36 = arith.maximumf %34, %35 : vector<362x6xf32>
    %c30 = arith.constant 30 : index
    %c0_16 = arith.constant 0 : index
    %37 = vector.load %arg9[%c30, %c0_16] : memref<392x6xf32, #tpu.memory_space<vmem>>, vector<362x6xf32>
    %38 = arith.maximumf %36, %37 : vector<362x6xf32>
    %39 = tpu.iota {dimensions = array<i32: 1>} : vector<98x362xi32>
    %c0_17 = arith.constant 0 : index
    %c0_18 = arith.constant 0 : index
    %40 = vector.load %arg6[%c0_17, %c0_18] : memref<98x1xi32, #tpu.memory_space<vmem>>, vector<98x1xi32>
    %41 = vector.broadcast %40 : vector<98x1xi32> to vector<98x362xi32>
    %42 = arith.cmpi eq, %39, %41 : vector<98x362xi32>
    %cst_19 = arith.constant 1.000000e+00 : f32
    %cst_20 = arith.constant 0.000000e+00 : f32
    %43 = vector.broadcast %cst_19 : f32 to vector<98x362xf32>
    %44 = vector.broadcast %cst_20 : f32 to vector<98x362xf32>
    %45 = arith.select %42, %43, %44 : vector<98x362xi1>, vector<98x362xf32>
    %cst_21 = arith.constant dense<0.000000e+00> : vector<98x6xf32>
    %46 = tpu.matmul %45, %38, %cst_21 {dimension_numbers = #tpu.dot_dimension_numbers<[1], [0], [0], [1], [0, 0, 1, 1], [], []>} : vector<98x362xf32>, vector<362x6xf32>, vector<98x6xf32> -> vector<98x6xf32>
    %c0_22 = arith.constant 0 : index
    %c0_23 = arith.constant 0 : index
    %47 = vector.load %arg10[%c0_22, %c0_23] : memref<98x6xf32, #tpu.memory_space<vmem>>, vector<98x6xf32>
    tpu.vector_store %arg10[%c0_22, %c0_23], %46 {strides = array<i32>} : memref<98x6xf32, #tpu.memory_space<vmem>>, vector<98x6xf32>,
    %c0_24 = arith.constant 0 : index
    %c0_25 = arith.constant 0 : index
    %48 = vector.load %arg10[%c0_24, %c0_25] : memref<98x6xf32, #tpu.memory_space<vmem>>, vector<66x6xf32>
    %c2_26 = arith.constant 2 : index
    %c0_27 = arith.constant 0 : index
    %49 = vector.load %arg10[%c2_26, %c0_27] : memref<98x6xf32, #tpu.memory_space<vmem>>, vector<66x6xf32>
    %c4 = arith.constant 4 : index
    %c0_28 = arith.constant 0 : index
    %50 = vector.load %arg10[%c4, %c0_28] : memref<98x6xf32, #tpu.memory_space<vmem>>, vector<66x6xf32>
    %c14 = arith.constant 14 : index
    %c0_29 = arith.constant 0 : index
    %51 = vector.load %arg10[%c14, %c0_29] : memref<98x6xf32, #tpu.memory_space<vmem>>, vector<66x6xf32>
    %c16 = arith.constant 16 : index
    %c0_30 = arith.constant 0 : index
    %52 = vector.load %arg10[%c16, %c0_30] : memref<98x6xf32, #tpu.memory_space<vmem>>, vector<66x6xf32>
    %c18 = arith.constant 18 : index
    %c0_31 = arith.constant 0 : index
    %53 = vector.load %arg10[%c18, %c0_31] : memref<98x6xf32, #tpu.memory_space<vmem>>, vector<66x6xf32>
    %c28_32 = arith.constant 28 : index
    %c0_33 = arith.constant 0 : index
    %54 = vector.load %arg10[%c28_32, %c0_33] : memref<98x6xf32, #tpu.memory_space<vmem>>, vector<66x6xf32>
    %c30_34 = arith.constant 30 : index
    %c0_35 = arith.constant 0 : index
    %55 = vector.load %arg10[%c30_34, %c0_35] : memref<98x6xf32, #tpu.memory_space<vmem>>, vector<66x6xf32>
    %c32 = arith.constant 32 : index
    %c0_36 = arith.constant 0 : index
    %56 = vector.load %arg10[%c32, %c0_36] : memref<98x6xf32, #tpu.memory_space<vmem>>, vector<66x6xf32>
    %57 = tpu.concatenate %48, %49, %50, %51, %52, %53, %54, %55, %56 in 1 : vector<66x6xf32>, vector<66x6xf32>, vector<66x6xf32>, vector<66x6xf32>, vector<66x6xf32>, vector<66x6xf32>, vector<66x6xf32>, vector<66x6xf32>, vector<66x6xf32> -> vector<66x54xf32>
    %c0_37 = arith.constant 0 : index
    %c0_38 = arith.constant 0 : index
    %58 = vector.load %arg2[%c0_37, %c0_38] : memref<54x16xf32, #tpu.memory_space<vmem>>, vector<54x16xf32>
    %cst_39 = arith.constant dense<0.000000e+00> : vector<66x16xf32>
    %59 = tpu.matmul %57, %58, %cst_39 {dimension_numbers = #tpu.dot_dimension_numbers<[1], [0], [0], [1], [0, 0, 1, 1], [], []>} : vector<66x54xf32>, vector<54x16xf32>, vector<66x16xf32> -> vector<66x16xf32>
    %60 = vector.extract_strided_slice %0 {offsets = [3, 0], sizes = [1, 16], strides = [1, 1]} : vector<8x128xf32> to vector<1x16xf32>
    %61 = vector.broadcast %60 : vector<1x16xf32> to vector<66x16xf32>
    %62 = arith.addf %59, %61 : vector<66x16xf32>
    %cst_40 = arith.constant 0.000000e+00 : f32
    %63 = vector.broadcast %cst_40 : f32 to vector<66x16xf32>
    %64 = arith.maximumf %62, %63 : vector<66x16xf32>
    %c0_41 = arith.constant 0 : index
    %c0_42 = arith.constant 0 : index
    %65 = vector.load %arg7[%c0_41, %c0_42] : memref<1x66xf32, #tpu.memory_space<vmem>>, vector<1x66xf32>
    %66 = vector.extract_strided_slice %0 {offsets = [4, 0], sizes = [1, 16], strides = [1, 1]} : vector<8x128xf32> to vector<1x16xf32>
    %67 = vector.extract_strided_slice %0 {offsets = [5, 0], sizes = [1, 16], strides = [1, 1]} : vector<8x128xf32> to vector<1x16xf32>
    %68 = arith.mulf %64, %64 : vector<66x16xf32>
    %69 = tpu.concatenate %64, %68 in 1 : vector<66x16xf32>, vector<66x16xf32> -> vector<66x32xf32>
    %cst_43 = arith.constant dense<0.000000e+00> : vector<1x32xf32>
    %70 = tpu.matmul %65, %69, %cst_43 {dimension_numbers = #tpu.dot_dimension_numbers<[1], [0], [0], [1], [0, 0, 1, 1], [], []>} : vector<1x66xf32>, vector<66x32xf32>, vector<1x32xf32> -> vector<1x32xf32>
    %71 = vector.extract_strided_slice %70 {offsets = [0, 0], sizes = [1, 16], strides = [1, 1]} : vector<1x32xf32> to vector<1x16xf32>
    %72 = vector.extract_strided_slice %70 {offsets = [0, 16], sizes = [1, 16], strides = [1, 1]} : vector<1x32xf32> to vector<1x16xf32>
    %73 = arith.mulf %71, %71 : vector<1x16xf32>
    %74 = arith.subf %72, %73 : vector<1x16xf32>
    %cst_44 = arith.constant 0.000000e+00 : f32
    %75 = vector.broadcast %cst_44 : f32 to vector<1x16xf32>
    %76 = arith.maximumf %74, %75 : vector<1x16xf32>
    %cst_45 = arith.constant 9.99999974E-6 : f32
    %77 = vector.broadcast %cst_45 : f32 to vector<1x16xf32>
    %78 = arith.addf %76, %77 : vector<1x16xf32>
    %79 = math.rsqrt %78 : vector<1x16xf32>
    %80 = arith.mulf %66, %79 : vector<1x16xf32>
    %81 = vector.broadcast %80 : vector<1x16xf32> to vector<66x16xf32>
    %82 = arith.mulf %64, %81 : vector<66x16xf32>
    %83 = arith.mulf %71, %80 : vector<1x16xf32>
    %84 = arith.subf %67, %83 : vector<1x16xf32>
    %85 = vector.broadcast %84 : vector<1x16xf32> to vector<66x16xf32>
    %86 = arith.addf %82, %85 : vector<66x16xf32>
    %c0_46 = arith.constant 0 : index
    %c0_47 = arith.constant 0 : index
    %87 = vector.load %arg11[%c0_46, %c0_47] : memref<66x16xf32, #tpu.memory_space<vmem>>, vector<66x16xf32>
    tpu.vector_store %arg11[%c0_46, %c0_47], %86 {strides = array<i32>} : memref<66x16xf32, #tpu.memory_space<vmem>>, vector<66x16xf32>,
    %c0_48 = arith.constant 0 : index
    %c0_49 = arith.constant 0 : index
    %88 = vector.load %arg11[%c0_48, %c0_49] : memref<66x16xf32, #tpu.memory_space<vmem>>, vector<2x16xf32>
    %c2_50 = arith.constant 2 : index
    %c0_51 = arith.constant 0 : index
    %89 = vector.load %arg11[%c2_50, %c0_51] : memref<66x16xf32, #tpu.memory_space<vmem>>, vector<2x16xf32>
    %90 = arith.maximumf %88, %89 : vector<2x16xf32>
    %c14_52 = arith.constant 14 : index
    %c0_53 = arith.constant 0 : index
    %91 = vector.load %arg11[%c14_52, %c0_53] : memref<66x16xf32, #tpu.memory_space<vmem>>, vector<2x16xf32>
    %92 = arith.maximumf %90, %91 : vector<2x16xf32>
    %c16_54 = arith.constant 16 : index
    %c0_55 = arith.constant 0 : index
    %93 = vector.load %arg11[%c16_54, %c0_55] : memref<66x16xf32, #tpu.memory_space<vmem>>, vector<2x16xf32>
    %94 = arith.maximumf %92, %93 : vector<2x16xf32>
    %c4_56 = arith.constant 4 : index
    %c0_57 = arith.constant 0 : index
    %95 = vector.load %arg11[%c4_56, %c0_57] : memref<66x16xf32, #tpu.memory_space<vmem>>, vector<2x16xf32>
    %c6 = arith.constant 6 : index
    %c0_58 = arith.constant 0 : index
    %96 = vector.load %arg11[%c6, %c0_58] : memref<66x16xf32, #tpu.memory_space<vmem>>, vector<2x16xf32>
    %97 = arith.maximumf %95, %96 : vector<2x16xf32>
    %c18_59 = arith.constant 18 : index
    %c0_60 = arith.constant 0 : index
    %98 = vector.load %arg11[%c18_59, %c0_60] : memref<66x16xf32, #tpu.memory_space<vmem>>, vector<2x16xf32>
    %99 = arith.maximumf %97, %98 : vector<2x16xf32>
    %c20 = arith.constant 20 : index
    %c0_61 = arith.constant 0 : index
    %100 = vector.load %arg11[%c20, %c0_61] : memref<66x16xf32, #tpu.memory_space<vmem>>, vector<2x16xf32>
    %101 = arith.maximumf %99, %100 : vector<2x16xf32>
    %c28_62 = arith.constant 28 : index
    %c0_63 = arith.constant 0 : index
    %102 = vector.load %arg11[%c28_62, %c0_63] : memref<66x16xf32, #tpu.memory_space<vmem>>, vector<2x16xf32>
    %c30_64 = arith.constant 30 : index
    %c0_65 = arith.constant 0 : index
    %103 = vector.load %arg11[%c30_64, %c0_65] : memref<66x16xf32, #tpu.memory_space<vmem>>, vector<2x16xf32>
    %104 = arith.maximumf %102, %103 : vector<2x16xf32>
    %c42 = arith.constant 42 : index
    %c0_66 = arith.constant 0 : index
    %105 = vector.load %arg11[%c42, %c0_66] : memref<66x16xf32, #tpu.memory_space<vmem>>, vector<2x16xf32>
    %106 = arith.maximumf %104, %105 : vector<2x16xf32>
    %c44 = arith.constant 44 : index
    %c0_67 = arith.constant 0 : index
    %107 = vector.load %arg11[%c44, %c0_67] : memref<66x16xf32, #tpu.memory_space<vmem>>, vector<2x16xf32>
    %108 = arith.maximumf %106, %107 : vector<2x16xf32>
    %c32_68 = arith.constant 32 : index
    %c0_69 = arith.constant 0 : index
    %109 = vector.load %arg11[%c32_68, %c0_69] : memref<66x16xf32, #tpu.memory_space<vmem>>, vector<2x16xf32>
    %c34 = arith.constant 34 : index
    %c0_70 = arith.constant 0 : index
    %110 = vector.load %arg11[%c34, %c0_70] : memref<66x16xf32, #tpu.memory_space<vmem>>, vector<2x16xf32>
    %111 = arith.maximumf %109, %110 : vector<2x16xf32>
    %c46 = arith.constant 46 : index
    %c0_71 = arith.constant 0 : index
    %112 = vector.load %arg11[%c46, %c0_71] : memref<66x16xf32, #tpu.memory_space<vmem>>, vector<2x16xf32>
    %113 = arith.maximumf %111, %112 : vector<2x16xf32>
    %c48 = arith.constant 48 : index
    %c0_72 = arith.constant 0 : index
    %114 = vector.load %arg11[%c48, %c0_72] : memref<66x16xf32, #tpu.memory_space<vmem>>, vector<2x16xf32>
    %115 = arith.maximumf %113, %114 : vector<2x16xf32>
    %116 = tpu.concatenate %94, %101, %108, %115 in 1 : vector<2x16xf32>, vector<2x16xf32>, vector<2x16xf32>, vector<2x16xf32> -> vector<2x64xf32>
    %c0_73 = arith.constant 0 : index
    %c0_74 = arith.constant 0 : index
    %117 = vector.load %arg3[%c0_73, %c0_74] : memref<64x128xf32, #tpu.memory_space<vmem>>, vector<64x128xf32>
    %cst_75 = arith.constant dense<0.000000e+00> : vector<2x128xf32>
    %118 = tpu.matmul %116, %117, %cst_75 {dimension_numbers = #tpu.dot_dimension_numbers<[1], [0], [0], [1], [0, 0, 1, 1], [], []>} : vector<2x64xf32>, vector<64x128xf32>, vector<2x128xf32> -> vector<2x128xf32>
    %119 = vector.extract_strided_slice %0 {offsets = [6, 0], sizes = [1, 128], strides = [1, 1]} : vector<8x128xf32> to vector<1x128xf32>
    %120 = vector.broadcast %119 : vector<1x128xf32> to vector<2x128xf32>
    %121 = arith.addf %118, %120 : vector<2x128xf32>
    %cst_76 = arith.constant 0.000000e+00 : f32
    %122 = vector.broadcast %cst_76 : f32 to vector<2x128xf32>
    %123 = arith.maximumf %121, %122 : vector<2x128xf32>
    %c0_77 = arith.constant 0 : index
    %c0_78 = arith.constant 0 : index
    %124 = vector.load %arg4[%c0_77, %c0_78] : memref<128x10xf32, #tpu.memory_space<vmem>>, vector<128x10xf32>
    %cst_79 = arith.constant dense<0.000000e+00> : vector<2x10xf32>
    %125 = tpu.matmul %123, %124, %cst_79 {dimension_numbers = #tpu.dot_dimension_numbers<[1], [0], [0], [1], [0, 0, 1, 1], [], []>} : vector<2x128xf32>, vector<128x10xf32>, vector<2x10xf32> -> vector<2x10xf32>
    %126 = vector.extract_strided_slice %0 {offsets = [7, 0], sizes = [1, 10], strides = [1, 1]} : vector<8x128xf32> to vector<1x10xf32>
    %127 = vector.broadcast %126 : vector<1x10xf32> to vector<2x10xf32>
    %128 = arith.addf %125, %127 : vector<2x10xf32>
    %cst_80 = arith.constant dense<0xFF800000> : vector<2xf32>
    %129 = vector.multi_reduction <maximumf>, %128, %cst_80 [1] : vector<2x10xf32> to vector<2xf32>
    %130 = vector.shape_cast %129 : vector<2xf32> to vector<2x1xf32>
    %131 = vector.broadcast %130 : vector<2x1xf32> to vector<2x10xf32>
    %132 = arith.subf %128, %131 : vector<2x10xf32>
    %133 = math.exp %132 : vector<2x10xf32>
    %cst_81 = arith.constant dense<0.000000e+00> : vector<2xf32>
    %134 = vector.multi_reduction <add>, %133, %cst_81 [1] : vector<2x10xf32> to vector<2xf32>
    %135 = vector.shape_cast %134 : vector<2xf32> to vector<2x1xf32>
    %136 = vector.broadcast %135 : vector<2x1xf32> to vector<2x10xf32>
    %137 = arith.divf %133, %136 : vector<2x10xf32>
    %c0_82 = arith.constant 0 : index
    %c0_83 = arith.constant 0 : index
    %138 = vector.load %arg8[%c0_82, %c0_83] : memref<2x10xf32, #tpu.memory_space<vmem>>, vector<2x10xf32>
    tpu.vector_store %arg8[%c0_82, %c0_83], %137 {strides = array<i32>} : memref<2x10xf32, #tpu.memory_space<vmem>>, vector<2x10xf32>,
    return
  }
}

</mosaic_0001>

<bundles_post_ra>
// kernel: forward.1
= control target key start
LH: loop header
LB: loop body
LE: loop exit
PB: predicated region body
PF: predicated region fallthrough
CT: control target
= control target key end

     0   :  { %vm233_vm0 = vcmask 1042432   ;;  %s4334_s0 = inlined_call_operand.vmem [shape: f32[392,27], index: 0, kind: input, shape index: {}]   ;;  %s4335_s1 = inlined_call_operand.vmem [shape: f32[27,6], index: 1, kind: input, shape index: {}]   ;;  %s4336_s2 = inlined_call_operand.vmem [shape: f32[54,16], index: 2, kind: input, shape index: {}]   ;;  %s4337_s3 = inlined_call_operand.vmem [shape: f32[64,128], index: 3, kind: input, shape index: {}]   ;;  %s4338_s4 = inlined_call_operand.vmem [shape: f32[128,10], index: 4, kind: input, shape index: {}]   ;;  %s4339_s5 = inlined_call_operand.vmem [shape: f32[8,128], index: 5, kind: input, shape index: {}]   ;;  %s4340_s6 = inlined_call_operand.vmem [shape: s32[98,1], index: 6, kind: input, shape index: {}]   ;;  %s4341_s7 = inlined_call_operand.vmem [shape: f32[1,66], index: 7, kind: input, shape index: {}]   ;;  %s4342_s8 = inlined_call_operand.hbm [shape: f32[2,10], index: 8, kind: output, shape index: {}]  }
   0x1   :  { %v83_v0 = vld [vmem:[%s4335_s1 + $0x18] sm:$0x7]  ;;  %v82_v1 = vld [vmem:[%s4335_s1 + $0x10] sm:$0xff]  ;;  %v81_v2 = vld [vmem:[%s4335_s1 + $0x8] sm:$0xff] }
   0x2   :  { %2483 = vmatpush.msk.msra.mxu0 %vm233_vm0, %v83_v0  ;;  %2587 = vmatpush.msk.msra.mxu1 %vm233_vm0, %v83_v0  ;;  %v80_v3 = vld [vmem:[%s4335_s1] sm:$0xff] }
   0x3   :  { %2588 = vmatpush.msk.msra.mxu3 %vm233_vm0, %v83_v0 }
   0x4   :  { %250 = vmatpush.msra.mxu0 %v82_v1  ;;  %2589 = vmatpush.msra.mxu1 %v82_v1 }
   0x5   :  { %2590 = vmatpush.msra.mxu3 %v82_v1 }
   0x6   :  { %13 = vsyncpa [#allocation6], 0  ;;  %251 = vmatpush.msra.mxu0 %v81_v2  ;;  %2591 = vmatpush.msra.mxu1 %v81_v2  ;;  %v31_v4 = vld [vmem:[%s4334_s0] sm:$0xff]  ;;  %vm85_vm1 = vcmask 220160   ;;  %v62_v5 = vld [vmem:[%s4334_s0 + $0xf8] sm:$0xff]  ;;  %s2790_s15 = smov 6  }
   0x7   :  { %2592 = vmatpush.msra.mxu3 %v81_v2  ;;  %v32_v6 = vld [vmem:[%s4334_s0 + $0x8] sm:$0xff]  ;;  %v63_v7 = vld [vmem:[%s4334_s0 + $0x100] sm:$0xff]  ;;  %v33_v8 = vld [vmem:[%s4334_s0 + $0x10] sm:$0xff]  ;;  %vm695_vm2 = vcmask 48128   ;;  %vm745_vm3 = vcmask 64512   ;;  %s2793_s1 = smov 122  }
   0x8   :  { %252 = vmatpush.msra.mxu0 %v80_v3  ;;  %2593 = vmatpush.msra.mxu1 %v80_v3  ;;  %v64_v9 = vld [vmem:[%s4334_s0 + $0x108] sm:$0xff]  ;;  %v34_v10 = vld [vmem:[%s4334_s0 + $0x18] sm:$0xff]  ;;  %v65_v11 = vld [vmem:[%s4334_s0 + $0x110] sm:$0xff]  ;;  %vm1506_vm7 = vcmask 1041408   ;;  %vm1466_vm9 = vcmask 867328   ;;  %s2797_s24 = smov 18  }
   0x9   :  { %2484 = vmatmul.msk.f32.vlgmr.msra.gmra.mxu0 %vm85_vm1, %v31_v4  ;;  %2515 = vmatmul.msk.f32.vlgmr.msra.gmra.mxu1 %vm85_vm1, %v62_v5  ;;  %v35_v12 = vld [vmem:[%s4334_s0 + $0x20] sm:$0xff]  ;;  %v66_v13 = vld [vmem:[%s4334_s0 + $0x118] sm:$0xff]  ;;  %v36_v14 = vld [vmem:[%s4334_s0 + $0x28] sm:$0xff]  ;;  %s2798_s25 = smov 24   ;;  %s2799_s26 = smov 30  }
   0xa   :  { %2594 = vmatpush.msra.mxu3 %v80_v3  ;;  %v67_v15 = vld [vmem:[%s4334_s0 + $0x120] sm:$0xff]  ;;  %v74_v16 = vld [vmem:[%s4334_s0 + $0x158] sm:$0xff]  ;;  %v37_v17 = vld [vmem:[%s4334_s0 + $0x30] sm:$0xff]  ;;  %s2800_s27 = smov 42   ;;  %s2801_s28 = smov 36  }
   0xb   :  { %2527 = vmatmul.msk.f32.vlgmr.msra.gmra.mxu3 %vm85_vm1, %v74_v16  ;;  %v68_v18 = vld [vmem:[%s4334_s0 + $0x128] sm:$0xff]  ;;  %v75_v19 = vld [vmem:[%s4334_s0 + $0x160] sm:$0xff]  ;;  %v38_v20 = vld [vmem:[%s4334_s0 + $0x38] sm:$0xff]  ;;  %s2802_s29 = smov 48   ;;  %s2803_s21 = smov 16  }
   0xc   :  { %v69_v21 = vld [vmem:[%s4334_s0 + $0x130] sm:$0xff]  ;;  %v76_v22 = vld [vmem:[%s4334_s0 + $0x168] sm:$0xff]  ;;  %v39_v23 = vld [vmem:[%s4334_s0 + $0x40] sm:$0xff]  ;;  %s2805_s23 = smov 32  }
   0xd   :  { %v70_v24 = vld [vmem:[%s4334_s0 + $0x138] sm:$0xff]  ;;  %v77_v25 = vld [vmem:[%s4334_s0 + $0x170] sm:$0xff]  ;;  %v40_v26 = vld [vmem:[%s4334_s0 + $0x48] sm:$0xff] }
   0xe   :  { %v71_v27 = vld [vmem:[%s4334_s0 + $0x140] sm:$0xff]  ;;  %v41_v28 = vld [vmem:[%s4334_s0 + $0x50] sm:$0xff]  ;;  %v72_v29 = vld [vmem:[%s4334_s0 + $0x148] sm:$0xff] }
   0xf   :  { %v42_v30 = vld [vmem:[%s4334_s0 + $0x58] sm:$0xff]  ;;  %v73_v31 = vld [vmem:[%s4334_s0 + $0x150] sm:$0xff]  ;;  %v43_v32 = vld [vmem:[%s4334_s0 + $0x60] sm:$0xff] }
  0x10   :  { %v44_v33 = vld [vmem:[%s4334_s0 + $0x68] sm:$0xff]  ;;  %v45_v34 = vld [vmem:[%s4334_s0 + $0x70] sm:$0xff]  ;;  %v46_v35 = vld [vmem:[%s4334_s0 + $0x78] sm:$0xff] }
  0x11   :  { %2485 = vmatmul.msk.f32.gmra.mxu0 %vm85_vm1, %v32_v6  ;;  %2516 = vmatmul.msk.f32.gmra.mxu1 %vm85_vm1, %v63_v7  ;;  %v47_v38 = vld [vmem:[%s4334_s0 + $0x80] sm:$0xff]  ;;  %v48_v41 = vld [vmem:[%s4334_s0 + $0x88] sm:$0xff]  ;;  %v49_v44 = vld [vmem:[%s4334_s0 + $0x90] sm:$0xff] }
  0x12   :  { %v50_v47 = vld [vmem:[%s4334_s0 + $0x98] sm:$0xff]  ;;  %v51_v50 = vld [vmem:[%s4334_s0 + $0xa0] sm:$0xff]  ;;  %v52_v53 = vld [vmem:[%s4334_s0 + $0xa8] sm:$0xff] }
  0x13   :  { %2528 = vmatmul.msk.f32.gmra.mxu3 %vm85_vm1, %v75_v19  ;;  %v53_v56 = vld [vmem:[%s4334_s0 + $0xb0] sm:$0xff]  ;;  %v54_v59 = vld [vmem:[%s4334_s0 + $0xb8] sm:$0xff]  ;;  %v55_v62 = vld [vmem:[%s4334_s0 + $0xc0] sm:$0xff] }
  0x14   :  { %v56_v2 = vld [vmem:[%s4334_s0 + $0xc8] sm:$0xff]  ;;  %v78_v3 = vld [vmem:[%s4334_s0 + $0x178] sm:$0xff]  ;;  %v3079_v5 = vld [vmem:[%s4339_s5] sm:$0xff] }
  0x15   :  { %4362 = vst [vmem:[#allocation8_spill] sm:$0xff] %v3079_v5 }
  0x19   :  { %2486 = vmatmul.msk.f32.gmra.mxu0 %vm85_vm1, %v33_v8  ;;  %2517 = vmatmul.msk.f32.gmra.mxu1 %vm85_vm1, %v64_v9  ;;  %v57_v8 = vld [vmem:[%s4334_s0 + $0xd0] sm:$0xff]  ;;  %v3089_v9 = vperm.slane %v3079_v5, 0 }
  0x1b   :  { %2529 = vmatmul.msk.f32.gmra.mxu3 %vm85_vm1, %v76_v22 }
  0x21   :  { %2487 = vmatmul.msk.f32.gmra.mxu0 %vm85_vm1, %v34_v10  ;;  %2518 = vmatmul.msk.f32.gmra.mxu1 %vm85_vm1, %v65_v11 }
  0x23   :  { %2530 = vmatmul.msk.f32.gmra.mxu3 %vm85_vm1, %v77_v25  ;;  %v59_v25 = vld [vmem:[%s4334_s0 + $0xe0] sm:$0xff] }
  0x29   :  { %2488 = vmatmul.msk.f32.gmra.mxu0 %vm85_vm1, %v35_v12  ;;  %2519 = vmatmul.msk.f32.gmra.mxu1 %vm85_vm1, %v66_v13 }
  0x2b   :  { %2531 = vmatmul.msk.f32.gmra.mxu3 %vm85_vm1, %v78_v3 }
  0x31   :  { %2489 = vmatmul.msk.f32.gmra.mxu0 %vm85_vm1, %v36_v14  ;;  %2520 = vmatmul.msk.f32.gmra.mxu1 %vm85_vm1, %v67_v15  ;;  %v58_v15 = vld [vmem:[%s4334_s0 + $0xd8] sm:$0xff] }
  0x39   :  { %2490 = vmatmul.msk.f32.gmra.mxu0 %vm85_vm1, %v37_v17  ;;  %2521 = vmatmul.msk.f32.gmra.mxu1 %vm85_vm1, %v68_v18 }
  0x41   :  { %2491 = vmatmul.msk.f32.gmra.mxu0 %vm85_vm1, %v38_v20  ;;  %2522 = vmatmul.msk.f32.gmra.mxu1 %vm85_vm1, %v69_v21 }
  0x49   :  { %2492 = vmatmul.msk.f32.gmra.mxu0 %vm85_vm1, %v39_v23  ;;  %2523 = vmatmul.msk.f32.gmra.mxu1 %vm85_vm1, %v70_v24 }
  0x51   :  { %2493 = vmatmul.msk.f32.gmra.mxu0 %vm85_vm1, %v40_v26  ;;  %2524 = vmatmul.msk.f32.gmra.mxu1 %vm85_vm1, %v71_v27 }
  0x59   :  { %2494 = vmatmul.msk.f32.gmra.mxu0 %vm85_vm1, %v41_v28  ;;  %2525 = vmatmul.msk.f32.gmra.mxu1 %vm85_vm1, %v72_v29 }
  0x61   :  { %2495 = vmatmul.msk.f32.gmra.mxu0 %vm85_vm1, %v42_v30  ;;  %2526 = vmatmul.msk.f32.gmra.mxu1 %vm85_vm1, %v73_v31 }
  0x69   :  { %2496 = vmatmul.msk.f32.gmra.mxu0 %vm85_vm1, %v43_v32 }
  0x71   :  { %2497 = vmatmul.msk.f32.gmra.mxu0 %vm85_vm1, %v44_v33 }
  0x79   :  { %2498 = vmatmul.msk.f32.gmra.mxu0 %vm85_vm1, %v45_v34  ;;  %v60_v34 = vld [vmem:[%s4334_s0 + $0xe8] sm:$0xff] }
  0x81   :  { %2499 = vmatmul.msk.f32.gmra.mxu0 %vm85_vm1, %v46_v35 }
  0x86   :  { %v2992_v36 = vpop.f32.mrf.mxu0  ;;  %v2994_v37 = vpop.f32.mrf.mxu1 }
  0x89   :  { %2500 = vmatmul.msk.f32.gmra.mxu0 %vm85_vm1, %v47_v38 }
  0x8e   :  { %v3000_v39 = vpop.f32.mrf.mxu0  ;;  %v3002_v40 = vpop.f32.mrf.mxu1 }
  0x8f   :  { %v3063_v63 = vpop.f32.mrf.mxu3 }
  0x91   :  { %2501 = vmatmul.msk.f32.gmra.mxu0 %vm85_vm1, %v48_v41 }
  0x96   :  { %v3008_v42 = vpop.f32.mrf.mxu0  ;;  %v3010_v43 = vpop.f32.mrf.mxu1 }
  0x97   :  { %v386_v4 = vpop.f32.mrf.mxu3 }
  0x98   :  { %v387_v10 = vadd.f32 %v386_v4, %v3089_v9 }
  0x99   :  { %2502 = vmatmul.msk.f32.gmra.mxu0 %vm85_vm1, %v49_v44 }
  0x9a   :  { %v3095_v12 = vmax.f32 %v387_v10, 0.0 }
  0x9c   :  { %v494_v19 = vmul.f32 %v3095_v12, %v3095_v12 }
  0x9e   :  { %v3016_v45 = vpop.f32.mrf.mxu0  ;;  %v3018_v46 = vpop.f32.mrf.mxu1 }
  0x9f   :  { %v3093_v11 = vpop.f32.mrf.mxu3 }
  0xa1   :  { %2503 = vmatmul.msk.f32.gmra.mxu0 %vm85_vm1, %v50_v47 }
  0xa6   :  { %v3024_v48 = vpop.f32.mrf.mxu0  ;;  %v3026_v49 = vpop.f32.mrf.mxu1 }
  0xa7   :  { %v392_v26 = vpop.f32.mrf.mxu3 }
  0xa8   :  { %v393_v29 = vadd.f32 %v392_v26, %v3089_v9 }
  0xa9   :  { %2504 = vmatmul.msk.f32.gmra.mxu0 %vm85_vm1, %v51_v50 }
  0xaa   :  { %v3126_v31 = vmax.f32 %v393_v29, 0.0 }
  0xac   :  { %v496_v41 = vmul.f32 %v3126_v31, %v3126_v31 }
  0xae   :  { %v3032_v51 = vpop.f32.mrf.mxu0  ;;  %v3034_v52 = vpop.f32.mrf.mxu1 }
  0xb1   :  { %2505 = vmatmul.msk.f32.gmra.mxu0 %vm85_vm1, %v52_v53  ;;  %v61_v53 = vld [vmem:[%s4334_s0 + $0xf0] sm:$0xff] }
  0xb6   :  { %v3040_v54 = vpop.f32.mrf.mxu0  ;;  %v3042_v55 = vpop.f32.mrf.mxu1 }
  0xb9   :  { %2506 = vmatmul.msk.f32.gmra.mxu0 %vm85_vm1, %v53_v56  ;;  %v348_v56 = vadd.f32 %v2994_v37, %v3089_v9 }
  0xbe   :  { %v3048_v57 = vpop.f32.mrf.mxu0  ;;  %v3050_v58 = vpop.f32.mrf.mxu1 }
  0xc1   :  { %2507 = vmatmul.msk.f32.gmra.mxu0 %vm85_vm1, %v54_v59  ;;  %v79_v59 = vld [vmem:[%s4334_s0 + $0x180] sm:$0xff] }
  0xc2   :  { %2532 = vmatmul.msk.f32.gmra.mxu3 %vm85_vm1, %v79_v59 }
  0xc6   :  { %v3056_v60 = vpop.f32.mrf.mxu0  ;;  %v3058_v61 = vpop.f32.mrf.mxu1 }
  0xc9   :  { %2508 = vmatmul.msk.f32.gmra.mxu0 %vm85_vm1, %v55_v62  ;;  %v3153_v62 = vmax.f32 %v348_v56, 0.0 }
  0xcb   :  { %4364 = vst [vmem:[#allocation10_spill] sm:$0xff] %v3153_v62  ;;  %v481_v4 = vmul.f32 %v3153_v62, %v3153_v62 }
  0xce   :  { %v281_v0 = vpop.f32.mrf.mxu0  ;;  %v3066_v1 = vpop.f32.mrf.mxu1 }
  0xcf   :  { %v282_v20 = vadd.f32 %v281_v0, %v3089_v9 }
  0xd1   :  { %2509 = vmatmul.msk.f32.gmra.mxu0 %vm85_vm1, %v56_v2  ;;  %v3117_v27 = vmax.f32 %v282_v20, 0.0  ;;  %v279_v20 = vadd.f32 %v3056_v60, %v3089_v9 }
  0xd3   :  { %v459_v30 = vmul.f32 %v3117_v27, %v3117_v27 }
  0xd6   :  { %v3081_v6 = vpop.f32.mrf.mxu0  ;;  %v3083_v7 = vpop.f32.mrf.mxu1 }
  0xd7   :  { %v378_v26 = vadd.f32 %v3083_v7, %v3089_v9 }
  0xd9   :  { %2510 = vmatmul.msk.f32.gmra.mxu0 %vm85_vm1, %v57_v8 }
  0xde   :  { %v287_v13 = vpop.f32.mrf.mxu0  ;;  %v380_v14 = vpop.f32.mrf.mxu1 }
  0xdf   :  { %v288_v16 = vadd.f32 %v287_v13, %v3089_v9  ;;  %v381_v18 = vadd.f32 %v380_v14, %v3089_v9 }
  0xe1   :  { %v3101_v17 = vmax.f32 %v288_v16, 0.0  ;;  %2511 = vmatmul.msk.f32.gmra.mxu0 %vm85_vm1, %v58_v15  ;;  %v3110_v22 = vmax.f32 %v381_v18, 0.0 }
  0xe3   :  { %v461_v21 = vmul.f32 %v3101_v17, %v3101_v17  ;;  %v492_v28 = vmul.f32 %v3110_v22, %v3110_v22 }
  0xe5   :  { %v2612_v23 = vpack.i.bf16 %v461_v21, %v494_v19  ;;  %v2617_v32 = vpack.i.bf16 %v459_v30, %v492_v28 }
  0xe6   :  { %v3112_v24 = vpop.f32.mrf.mxu0 }
  0xe7   :  { %2613 = vrot.lane.b32.xlu0 %v2612_v23, %s2790_s15  ;;  %v3177_v23 = vmax.f32 %v279_v20, 0.0 }
  0xe9   :  { %2512 = vmatmul.msk.f32.gmra.mxu0 %vm85_vm1, %v59_v25  ;;  %v458_v29 = vmul.f32 %v3177_v23, %v3177_v23 }
  0xee   :  { %v293_v33 = vpop.f32.mrf.mxu0 }
  0xef   :  { %v294_v35 = vadd.f32 %v293_v33, %v3089_v9  ;;  %2618 = vrot.lane.b32.xlu0 %v2617_v32, %s2790_s15  ;;  %v3188_v32 = vmax.f32 %v378_v26, 0.0 }
  0xf1   :  { %v3133_v38 = vmax.f32 %v294_v35, 0.0  ;;  %2513 = vmatmul.msk.f32.gmra.mxu0 %vm85_vm1, %v60_v34  ;;  %v491_v35 = vmul.f32 %v3188_v32, %v3188_v32 }
  0xf3   :  { %4363 = vst [vmem:[#allocation9_spill] sm:$0xff] %v3133_v38  ;;  %v463_v44 = vmul.f32 %v3133_v38, %v3133_v38 }
  0xf5   :  { %v2622_v47 = vpack.i.bf16 %v463_v44, %v496_v41  ;;  %v285_v41 = vadd.f32 %v3081_v6, %v3089_v9 }
  0xf6   :  { %v3140_v50 = vpop.f32.mrf.mxu0 }
  0xf7   :  { %2623 = vrot.lane.b32.xlu1 %v2622_v47, %s2790_s15  ;;  %v3200_v56 = vmax.f32 %v285_v41, 0.0 }
  0xf9   :  { %2514 = vmatmul.msk.f32.gmra.mxu0 %vm85_vm1, %v61_v53 }
  0xfe   :  { %v299_v0 = vpop.f32.mrf.mxu0 }
  0xff   :  { %v300_v2 = vadd.f32 %v299_v0, %v3089_v9 }
 0x101   :  { %v3156_v3 = vmax.f32 %v300_v2, 0.0  ;;  %v460_v2 = vmul.f32 %v3200_v56, %v3200_v56 }
 0x103   :  { %4365 = vst [vmem:[#allocation11_spill] sm:$0xff] %v3156_v3  ;;  %v465_v37 = vmul.f32 %v3156_v3, %v3156_v3 }
 0x105   :  { %v2627_v8 = vpack.i.bf16 %v465_v37, %v481_v4  ;;  %v384_v4 = vadd.f32 %v3063_v63, %v3089_v9 }
 0x106   :  { %v3162_v10 = vpop.f32.mrf.mxu0 }
 0x107   :  { %2628 = vrot.lane.b32.xlu0 %v2627_v8, %s2790_s15  ;;  %v3212_v20 = vmax.f32 %v384_v4, 0.0 }
 0x109   :  { %v493_v26 = vmul.f32 %v3212_v20, %v3212_v20 }
 0x10e   :  { %v3165_v13 = vpop.f32.mrf.mxu0 }
 0x116   :  { %v3167_v14 = vpop.f32.mrf.mxu0 }
 0x11e   :  { %v3169_v15 = vpop.f32.mrf.mxu0 }
 0x126   :  { %v3171_v16 = vpop.f32.mrf.mxu0 }
 0x12e   :  { %v317_v18 = vpop.f32.mrf.mxu0 }
 0x136   :  { %v3173_v19 = vpop.f32.mrf.mxu0 }
 0x13e   :  { %v323_v21 = vpop.f32.mrf.mxu0 }
 0x13f   :  { %v324_v25 = vadd.f32 %v323_v21, %v3089_v9 }
 0x141   :  { %v3182_v28 = vmax.f32 %v324_v25, 0.0 }
 0x143   :  { %v473_v30 = vmul.f32 %v3182_v28, %v3182_v28 }
 0x145   :  { %v2632_v33 = vpack.i.bf16 %v473_v30, %v458_v29  ;;  %v291_v29 = vadd.f32 %v3112_v24, %v3089_v9 }
 0x146   :  { %v326_v60 = vpop.f32.mrf.mxu0 }
 0x147   :  { %v327_v34 = vadd.f32 %v326_v60, %v3089_v9  ;;  %2633 = vrot.lane.b32.xlu2 %v2632_v33, %s2790_s15  ;;  %v3224_v60 = vmax.f32 %v291_v29, 0.0 }
 0x149   :  { %v3194_v7 = vmax.f32 %v327_v34, 0.0  ;;  %4366 = vst [vmem:[#allocation12_spill] sm:$0xff] %v3224_v60  ;;  %v462_v41 = vmul.f32 %v3224_v60, %v3224_v60 }
 0x14b   :  { %v474_v44 = vmul.f32 %v3194_v7, %v3194_v7 }
 0x14d   :  { %v2637_v47 = vpack.i.bf16 %v491_v35, %v474_v44  ;;  %v390_v44 = vadd.f32 %v3093_v11, %v3089_v9  ;;  %v273_v11 = vadd.f32 %v3040_v54, %v3089_v9 }
 0x14e   :  { %v329_v53 = vpop.f32.mrf.mxu0 }
 0x14f   :  { %v330_v59 = vadd.f32 %v329_v53, %v3089_v9  ;;  %2638 = vrot.lane.b32.xlu1 %v2637_v47, %s2790_s15 }
 0x151   :  { %v3204_v0 = vmax.f32 %v330_v59, 0.0  ;;  %v3236_v59 = vmax.f32 %v390_v44, 0.0  ;;  %v321_v44 = vadd.f32 %v3173_v19, %v3089_v9  ;;  %v267_v19 = vadd.f32 %v3024_v48, %v3089_v9 }
 0x152   :  { %v366_v48 = vadd.f32 %v3042_v55, %v3089_v9  ;;  %v306_v55 = vadd.f32 %v3165_v13, %v3089_v9 }
 0x153   :  { %v475_v6 = vmul.f32 %v3204_v0, %v3204_v0  ;;  %v3293_v5 = vmax.f32 %v267_v19, 0.0 }
 0x155   :  { %v2642_v37 = vpack.i.bf16 %v475_v6, %v460_v2  ;;  %v318_v6 = vadd.f32 %v317_v18, %v3089_v9  ;;  %v3255_v18 = vmax.f32 %v273_v11, 0.0 }
 0x156   :  { %v332_v8 = vpop.f32.mrf.mxu0 }
 0x157   :  { %v333_v21 = vadd.f32 %v332_v8, %v3089_v9  ;;  %2643 = vrot.lane.b32.xlu2 %v2642_v37, %s2790_s15  ;;  %v495_v8 = vmul.f32 %v3236_v59, %v3236_v59  ;;  %v3253_v29 = vmax.f32 %v318_v6, 0.0  ;;  %v456_v11 = vmul.f32 %v3255_v18, %v3255_v18 }
 0x159   :  { %v3216_v25 = vmax.f32 %v333_v21, 0.0  ;;  %v3238_v2 = vpop.permute.xlu0 %2613  ;;  %v297_v21 = vadd.f32 %v3140_v50, %v3089_v9  ;;  %4367 = vst [vmem:[#allocation13_spill] sm:$0xff] %v3253_v29  ;;  %v471_v50 = vmul.f32 %v3253_v29, %v3253_v29 }
 0x15b   :  { %v476_v63 = vmul.f32 %v3216_v25, %v3216_v25 }
 0x15d   :  { %v2647_v30 = vpack.i.bf16 %v493_v26, %v476_v63 }
 0x15e   :  { %v335_v33 = vpop.f32.mrf.mxu0 }
 0x15f   :  { %v336_v34 = vadd.f32 %v335_v33, %v3089_v9  ;;  %2648 = vrot.lane.b32.xlu1 %v2647_v30, %s2790_s15  ;;  %v395_v33 = vpop.f32.mrf.mxu3 }
 0x161   :  { %v3228_v35 = vmax.f32 %v336_v34, 0.0  ;;  %v3257_v34 = vmax.f32 %v297_v21, 0.0  ;;  %v3284_v21 = vmax.f32 %v321_v44, 0.0  ;;  %v315_v44 = vadd.f32 %v3171_v16, %v3089_v9 }
 0x162   :  { %v261_v16 = vadd.f32 %v3008_v42, %v3089_v9 }
 0x163   :  { %v477_v24 = vmul.f32 %v3228_v35, %v3228_v35  ;;  %4368 = vst [vmem:[#allocation14_spill] sm:$0xff] %v3257_v34  ;;  %v464_v6 = vmul.f32 %v3257_v34, %v3257_v34  ;;  %v3329_v42 = vmax.f32 %v315_v44, 0.0 }
 0x164   :  { %4370 = vst [vmem:[#allocation16_spill] sm:$0xff] %v3284_v21 }
 0x165   :  { %v2652_v47 = vpack.i.bf16 %v477_v24, %v462_v41  ;;  %v372_v41 = vadd.f32 %v3058_v61, %v3089_v9  ;;  %v3267_v24 = vpop.permute.xlu0 %2618 }
 0x166   :  { %v338_v53 = vpop.f32.mrf.mxu0 }
 0x167   :  { %v339_v4 = vadd.f32 %v338_v53, %v3089_v9  ;;  %2653 = vrot.lane.b32.xlu2 %v2652_v47, %s2790_s15  ;;  %v396_v53 = vadd.f32 %v395_v33, %v3089_v9 }
 0x169   :  { %v3243_v37 = vmax.f32 %v339_v4, 0.0  ;;  %v312_v4 = vadd.f32 %v3169_v15, %v3089_v9  ;;  %v2682_v15 = vpack.i.bf16 %v471_v50, %v456_v11  ;;  %v375_v50 = vadd.f32 %v3066_v1, %v3089_v9 }
 0x16b   :  { %v478_v26 = vmul.f32 %v3243_v37, %v3243_v37 }
 0x16d   :  { %v2657_v63 = vpack.i.bf16 %v495_v8, %v478_v26  ;;  %v3282_v8 = vmax.f32 %v372_v41, 0.0  ;;  %v3286_v26 = vmax.f32 %v396_v53, 0.0  ;;  %v472_v53 = vmul.f32 %v3284_v21, %v3284_v21 }
 0x16e   :  { %v341_v30 = vpop.f32.mrf.mxu0 }
 0x16f   :  { %v342_v54 = vadd.f32 %v341_v30, %v3089_v9  ;;  %2658 = vrot.lane.b32.xlu2 %v2657_v63, %s2790_s15  ;;  %4369 = vst [vmem:[#allocation15_spill] sm:$0xff] %v3282_v8  ;;  %v3288_v30 = vmax.f32 %v312_v4, 0.0  ;;  %v489_v41 = vmul.f32 %v3282_v8, %v3282_v8  ;;  %v3331_v8 = vmax.f32 %v306_v55, 0.0 }
 0x171   :  { %v3269_v47 = vmax.f32 %v342_v54, 0.0  ;;  %4371 = vst [vmem:[#allocation17_spill] sm:$0xff] %v3288_v30  ;;  %v469_v11 = vmul.f32 %v3288_v30, %v3288_v30  ;;  %v3327_v30 = vmax.f32 %v375_v50, 0.0  ;;  %v360_v50 = vadd.f32 %v3026_v49, %v3089_v9 }
 0x172   :  { %v351_v49 = vadd.f32 %v3002_v40, %v3089_v9  ;;  %v467_v55 = vmul.f32 %v3331_v8, %v3331_v8 }
 0x173   :  { %v479_v61 = vmul.f32 %v3269_v47, %v3269_v47 }
 0x175   :  { %v2662_v63 = vpack.i.bf16 %v479_v61, %v464_v6  ;;  %v497_v6 = vmul.f32 %v3286_v26, %v3286_v26 }
 0x176   :  { %v344_v33 = vpop.f32.mrf.mxu0 }
 0x177   :  { %v345_v54 = vadd.f32 %v344_v33, %v3089_v9  ;;  %2663 = vrot.lane.b32.xlu1 %v2662_v63, %s2790_s15  ;;  %2683 = vrot.lane.b32.xlu2 %v2682_v15, %s2790_s15  ;;  %v276_v63 = vadd.f32 %v3048_v57, %v3089_v9  ;;  %v3319_v33 = vmax.f32 %v366_v48, 0.0  ;;  %v2677_v57 = vpack.i.bf16 %v489_v41, %v472_v53 }
 0x178   :  { %v369_v41 = vadd.f32 %v3050_v58, %v3089_v9  ;;  %v490_v53 = vmul.f32 %v3327_v30, %v3327_v30 }
 0x179   :  { %v3305_v4 = vmax.f32 %v345_v54, 0.0  ;;  %v2629_v61 = vpop.permute.xlu0 %2628  ;;  %v3333_v21 = vmax.f32 %v276_v63, 0.0  ;;  %v487_v44 = vmul.f32 %v3319_v33, %v3319_v33 }
 0x17a   :  { %v2631_v19 = vunpack.i.h.bf16 %v2629_v61  ;;  %v2630_v1 = vunpack.i.l.bf16 %v2629_v61  ;;  %v454_v61 = vmul.f32 %v3293_v5, %v3293_v5  ;;  %v3366_v63 = vmax.f32 %v369_v41, 0.0 }
 0x17b   :  { %v480_v15 = vmul.f32 %v3305_v4, %v3305_v4  ;;  %v457_v58 = vmul.f32 %v3333_v21, %v3333_v21  ;;  %v303_v41 = vadd.f32 %v3162_v10, %v3089_v9 }
 0x17c   :  { %v711_v13 = vsel %vm695_vm2, %v3156_v3, %v2631_v19  ;;  %v727_v54 = vsel %vm695_vm2, %v3153_v62, %v2630_v1  ;;  %v2697_v48 = vpack.i.bf16 %v469_v11, %v454_v61  ;;  %v3337_v19 = vmax.f32 %v261_v16, 0.0 }
 0x17d   :  { %749 = vmatpush.msrb.mxu1 %v711_v13  ;;  %769 = vmatpush.msra.mxu2 %v727_v54  ;;  %v2667_v29 = vpack.i.bf16 %v497_v6, %v480_v15  ;;  %v309_v6 = vadd.f32 %v3167_v14, %v3089_v9  ;;  %v270_v11 = vadd.f32 %v3032_v51, %v3089_v9  ;;  %v3362_v16 = vmax.f32 %v360_v50, 0.0 }
 0x17e   :  { %v255_v1 = vadd.f32 %v2992_v36, %v3089_v9  ;;  %v452_v14 = vmul.f32 %v3337_v19, %v3337_v19  ;;  %v2672_v13 = vpack.i.bf16 %v457_v58, %v490_v53  ;;  %v3370_v54 = vmax.f32 %v351_v49, 0.0 }
 0x17f   :  { %2678 = vrot.lane.b32.xlu1 %v2677_v57, %s2790_s15  ;;  %2668 = vrot.lane.b32.xlu0 %v2667_v29, %s2790_s15  ;;  %v470_v29 = vmul.f32 %v3329_v42, %v3329_v42  ;;  %v3368_v40 = vmax.f32 %v309_v6, 0.0  ;;  %v3372_v61 = vmax.f32 %v270_v11, 0.0  ;;  %v354_v57 = vadd.f32 %v3010_v43, %v3089_v9 }
 0x180   :  { %2698 = vrot.lane.b32.xlu2 %v2697_v48, %s2790_s15  ;;  %4372 = vst [vmem:[#allocation18_spill] sm:$0xff] %v3370_v54  ;;  %v2712_v51 = vpack.i.bf16 %v467_v55, %v452_v14  ;;  %v3376_v36 = vmax.f32 %v255_v1, 0.0  ;;  %v485_v48 = vmul.f32 %v3362_v16, %v3362_v16  ;;  %v363_v50 = vadd.f32 %v3034_v52, %v3089_v9 }
 0x181   :  { %v2692_v15 = vpack.i.bf16 %v487_v44, %v470_v29  ;;  %v488_v44 = vmul.f32 %v3366_v63, %v3366_v63  ;;  %v468_v53 = vmul.f32 %v3368_v40, %v3368_v40  ;;  %v482_v43 = vmul.f32 %v3370_v54, %v3370_v54 }
 0x182   :  { %v264_v6 = vadd.f32 %v3016_v45, %v3089_v9  ;;  %v455_v29 = vmul.f32 %v3372_v61, %v3372_v61  ;;  %v3397_v49 = vmax.f32 %v354_v57, 0.0  ;;  %v450_v52 = vmul.f32 %v3376_v36, %v3376_v36 }
 0x183   :  { %v3401_v55 = vmax.f32 %v363_v50, 0.0  ;;  %v3403_v10 = vmax.f32 %v303_v41, 0.0  ;;  %v2707_v11 = vpack.i.bf16 %v485_v48, %v468_v53  ;;  %v357_v45 = vadd.f32 %v3018_v46, %v3089_v9  ;;  %v398_v53 = vpop.f32.mrf.mxu3 }
 0x184   :  { %v2687_v58 = vpack.i.bf16 %v455_v29, %v488_v44  ;;  %v2727_v1 = vpack.i.bf16 %v482_v43, %v450_v52  ;;  %v3405_v14 = vmax.f32 %v264_v6, 0.0  ;;  %v258_v57 = vadd.f32 %v3000_v39, %v3089_v9 }
 0x185   :  { %v3422_v50 = vmax.f32 %v357_v45, 0.0  ;;  %v399_v6 = vadd.f32 %v398_v53, %v3089_v9 }
 0x186   :  { %v453_v48 = vmul.f32 %v3405_v14, %v3405_v14  ;;  %v3424_v46 = vmax.f32 %v258_v57, 0.0 }
 0x187   :  { %2693 = vrot.lane.b32.xlu1 %v2692_v15, %s2790_s15  ;;  %2673 = vrot.lane.b32.xlu0 %v2672_v13, %s2790_s15  ;;  %v486_v15 = vmul.f32 %v3401_v55, %v3401_v55  ;;  %v466_v13 = vmul.f32 %v3403_v10, %v3403_v10  ;;  %v484_v43 = vmul.f32 %v3422_v50, %v3422_v50  ;;  %v3434_v52 = vmax.f32 %v399_v6, 0.0 }
 0x188   :  { %2713 = vrot.lane.b32.xlu2 %v2712_v51, %s2790_s15  ;;  %v483_v51 = vmul.f32 %v3397_v49, %v3397_v49  ;;  %v451_v39 = vmul.f32 %v3424_v46, %v3424_v46 }
 0x189   :  { %v2702_v41 = vpack.i.bf16 %v453_v48, %v486_v15  ;;  %4373 = vst [vmem:[#allocation19_spill] sm:$0xff] %v3434_v52 }
 0x18a   :  { %v2722_v44 = vpack.i.bf16 %v483_v51, %v466_v13  ;;  %v2717_v29 = vpack.i.bf16 %v451_v39, %v484_v43  ;;  %v2616_v43 = vunpack.i.h.bf16 %v3238_v2 }
 0x18f   :  { %2708 = vrot.lane.b32.xlu1 %v2707_v11, %s2790_s15  ;;  %2688 = vrot.lane.b32.xlu0 %v2687_v58, %s2790_s15  ;;  %v498_v11 = vmul.f32 %v3434_v52, %v3434_v52 }
 0x190   :  { %2728 = vrot.lane.b32.xlu2 %v2727_v1, %s2790_s15  ;;  %v2624_v1 = vpop.permute.xlu1 %2623 }
 0x191   :  { %v2626_v48 = vunpack.i.h.bf16 %v2624_v1 }
 0x193   :  { %v709_v39 = vsel %vm695_vm2, %v3133_v38, %v2626_v48 }
 0x197   :  { %2723 = vrot.lane.b32.xlu1 %v2722_v44, %s2790_s15  ;;  %2703 = vrot.lane.b32.xlu0 %v2702_v41, %s2790_s15 }
 0x19f   :  { %2718 = vrot.lane.b32.xlu0 %v2717_v29, %s2790_s15 }
 0x1a1   :  { %v3439_v58 = vpop.permute.xlu2 %2633 }
 0x1a2   :  { %v2635_v38 = vunpack.i.l.bf16 %v3439_v58 }
 0x1a7   :  { %644 = vrot.lane.b32.xlu0 %v498_v11, %s2790_s15 }
 0x1b1   :  { %v3441_v45 = vpop.permute.xlu2 %2643 }
 0x1b2   :  { %v2645_v6 = vunpack.i.l.bf16 %v3441_v45 }
 0x1c1   :  { %v3443_v15 = vpop.permute.xlu1 %2638  ;;  %v2654_v13 = vpop.permute.xlu2 %2653 }
 0x1c2   :  { %v2655_v41 = vunpack.i.l.bf16 %v2654_v13 }
 0x1c4   :  { %v708_v11 = vsel %vm695_vm2, %v3224_v60, %v2655_v41  ;;  %v706_v41 = vsel %vm695_vm2, %v3200_v56, %v2645_v6 }
 0x1c9   :  { %v2659_v9 = vpop.permute.xlu2 %2658 }
 0x1ca   :  { %v2660_v54 = vunpack.i.l.bf16 %v2659_v9 }
 0x1d1   :  { %v3445_v51 = vpop.permute.xlu1 %2648  ;;  %v3453_v29 = vpop.permute.xlu2 %2683 }
 0x1e9   :  { %v2664_v57 = vpop.permute.xlu1 %2663 }
 0x1ea   :  { %v2665_v44 = vunpack.i.l.bf16 %v2664_v57 }
 0x1ec   :  { %v710_v53 = vsel %vm695_vm2, %v3257_v34, %v2665_v44  ;;  %v707_v44 = vsel %vm695_vm2, %v3101_v17, %v2616_v43  ;;  %v2666_v34 = vunpack.i.h.bf16 %v2664_v57  ;;  %v2661_v43 = vunpack.i.h.bf16 %v2659_v9 }
 0x1ed   :  { %750 = vmatpush.msrb.mxu1 %v710_v53  ;;  %v2621_v53 = vunpack.i.h.bf16 %v3267_v24  ;;  %v2656_v57 = vunpack.i.h.bf16 %v2654_v13  ;;  %v724_v13 = vsel %vm695_vm2, %v3243_v37, %v2660_v54  ;;  %v2651_v9 = vunpack.i.h.bf16 %v3445_v51 }
 0x1ee   :  { %v2620_v54 = vunpack.i.l.bf16 %v3267_v24 }
 0x1ef   :  { %751 = vmatpush.msrb.mxu1 %v709_v39  ;;  %v2625_v39 = vunpack.i.l.bf16 %v2624_v1  ;;  %v725_v1 = vsel %vm695_vm2, %v3269_v47, %v2666_v34  ;;  %v739_v24 = vsel %vm695_vm2, %v3212_v20, %v2651_v9 }
 0x1f1   :  { %v3457_v62 = vpop.permute.xlu1 %2678  ;;  %v2669_v3 = vpop.permute.xlu0 %2668  ;;  %752 = vmatpush.msrb.mxu1 %v708_v11  ;;  %v742_v6 = vsel %vm695_vm2, %v3126_v31, %v2625_v39  ;;  %v2685_v39 = vunpack.i.l.bf16 %v3453_v29 }
 0x1f2   :  { %v2671_v52 = vunpack.i.h.bf16 %v2669_v3  ;;  %v2670_v48 = vunpack.i.l.bf16 %v2669_v3  ;;  %v705_v3 = vsel %vm695_vm2, %v3117_v27, %v2621_v53 }
 0x1f3   :  { %753 = vmatpush.msrb.mxu1 %v707_v44  ;;  %v2615_v44 = vunpack.i.l.bf16 %v3238_v2  ;;  %v741_v2 = vsel %vm695_vm2, %v3236_v59, %v2661_v43 }
 0x1f4   :  { %v726_v60 = vsel %vm695_vm2, %v3305_v4, %v2670_v48  ;;  %v743_v11 = vsel %vm695_vm2, %v3286_v26, %v2671_v52  ;;  %v2650_v52 = vunpack.i.l.bf16 %v3445_v51  ;;  %v2646_v48 = vunpack.i.h.bf16 %v3441_v45  ;;  %v2699_v51 = vpop.permute.xlu2 %2698 }
 0x1f5   :  { %754 = vmatpush.msrb.mxu1 %v706_v41  ;;  %770 = vmatpush.msra.mxu2 %v726_v60  ;;  %v704_v60 = vsel %vm695_vm2, %v3177_v23, %v2635_v38  ;;  %v723_v38 = vsel %vm695_vm2, %v3228_v35, %v2656_v57  ;;  %v2636_v57 = vunpack.i.h.bf16 %v3439_v58  ;;  %v2681_v58 = vunpack.i.h.bf16 %v3457_v62 }
 0x1f6   :  { %789 = vmatpush.msrb.mxu3 %v743_v11  ;;  %v740_v11 = vsel %vm695_vm2, %v3095_v12, %v2615_v44  ;;  %v722_v43 = vsel %vm695_vm2, %v3216_v25, %v2650_v52  ;;  %v702_v44 = vsel %vm695_vm2, %v3255_v18, %v2685_v39  ;;  %v2680_v52 = vunpack.i.l.bf16 %v3457_v62 }
 0x1f7   :  { %755 = vmatpush.msrb.mxu1 %v705_v3  ;;  %771 = vmatpush.msra.mxu2 %v725_v1  ;;  %v2640_v3 = vunpack.i.l.bf16 %v3443_v15  ;;  %v2641_v1 = vunpack.i.h.bf16 %v3443_v15  ;;  %v738_v15 = vsel %vm695_vm2, %v3110_v22, %v2620_v54  ;;  %v2700_v39 = vunpack.i.l.bf16 %v2699_v51 }
 0x1f8   :  { %790 = vmatpush.msrb.mxu3 %v742_v6  ;;  %v721_v6 = vsel %vm695_vm2, %v3204_v0, %v2646_v48 }
 0x1f9   :  { %v3482_v53 = vpop.permute.xlu1 %2693  ;;  %756 = vmatpush.msrb.mxu1 %v704_v60  ;;  %772 = vmatpush.msra.mxu2 %v724_v13  ;;  %v2674_v34 = vpop.permute.xlu0 %2673  ;;  %v720_v13 = vsel %vm695_vm2, %v3194_v7, %v2640_v3 }
 0x1fa   :  { %791 = vmatpush.msrb.mxu3 %v741_v2  ;;  %v2676_v41 = vunpack.i.h.bf16 %v2674_v34  ;;  %v2675_v60 = vunpack.i.l.bf16 %v2674_v34  ;;  %v737_v2 = vsel %vm695_vm2, %v3188_v32, %v2641_v1  ;;  %v2686_v34 = vunpack.i.h.bf16 %v3453_v29 }
 0x1fb   :  { %773 = vmatpush.msra.mxu2 %v723_v38  ;;  %v719_v38 = vsel %vm695_vm2, %v3182_v28, %v2636_v57  ;;  %v2695_v62 = vunpack.i.l.bf16 %v3482_v53  ;;  %v4375_v57 = vld [vmem:[#allocation15_spill] sm:$0xff] }
 0x1fc   :  { %792 = vmatpush.msrb.mxu3 %v740_v11  ;;  %v703_v45 = vsel %vm695_vm2, %v3333_v21, %v2676_v41  ;;  %v736_v11 = vsel %vm695_vm2, %v3327_v30, %v2675_v60  ;;  %v2714_v1 = vpop.permute.xlu2 %2713  ;;  %v4376_v60 = vld [vmem:[#allocation13_spill] sm:$0xff] }
 0x1fd   :  { %757 = vmatpush.msrb.mxu1 %v703_v45  ;;  %774 = vmatpush.msra.mxu2 %v722_v43  ;;  %v4374_v45 = vld [vmem:[#allocation16_spill] sm:$0xff]  ;;  %v2701_v43 = vunpack.i.h.bf16 %v2699_v51 }
 0x1fe   :  { %793 = vmatpush.msrb.mxu3 %v739_v24  ;;  %v718_v29 = vsel %vm695_vm2, %v4374_v45, %v2680_v52  ;;  %v2696_v24 = vunpack.i.h.bf16 %v3482_v53  ;;  %v716_v53 = vsel %vm695_vm2, %v3329_v42, %v2695_v62 }
 0x1ff   :  { %758 = vmatpush.msrb.mxu1 %v702_v44  ;;  %775 = vmatpush.msra.mxu2 %v721_v6  ;;  %v735_v44 = vsel %vm695_vm2, %v4375_v57, %v2681_v58  ;;  %v700_v6 = vsel %vm695_vm2, %v3293_v5, %v2700_v39 }
 0x200   :  { %794 = vmatpush.msrb.mxu3 %v738_v15  ;;  %v717_v15 = vsel %vm695_vm2, %v4376_v60, %v2686_v34  ;;  %v733_v58 = vsel %vm695_vm2, %v3319_v33, %v2696_v24  ;;  %v2716_v34 = vunpack.i.h.bf16 %v2714_v1 }
 0x201   :  { %v2709_v9 = vpop.permute.xlu1 %2708  ;;  %776 = vmatpush.msra.mxu2 %v720_v13  ;;  %v2689_v48 = vpop.permute.xlu0 %2688 }
 0x202   :  { %795 = vmatpush.msrb.mxu3 %v737_v2  ;;  %v2691_v41 = vunpack.i.h.bf16 %v2689_v48  ;;  %v2690_v54 = vunpack.i.l.bf16 %v2689_v48  ;;  %v2710_v52 = vunpack.i.l.bf16 %v2709_v9  ;;  %v4377_v48 = vld [vmem:[#allocation17_spill] sm:$0xff] }
 0x203   :  { %777 = vmatpush.msra.mxu2 %v719_v38  ;;  %v715_v39 = vsel %vm695_vm2, %v4377_v48, %v2701_v43 }
 0x204   :  { %796 = vmatpush.msrb.mxu3 %v736_v11  ;;  %v701_v3 = vsel %vm695_vm2, %v3372_v61, %v2691_v41  ;;  %v734_v51 = vsel %vm695_vm2, %v3366_v63, %v2690_v54  ;;  %v2715_v41 = vunpack.i.l.bf16 %v2714_v1  ;;  %v2711_v54 = vunpack.i.h.bf16 %v2709_v9  ;;  %v2729_v1 = vpop.permute.xlu2 %2728 }
 0x205   :  { %759 = vmatpush.msrb.mxu1 %v701_v3  ;;  %778 = vmatpush.msra.mxu2 %v718_v29  ;;  %v714_v29 = vsel %vm695_vm2, %v3368_v40, %v2710_v52  ;;  %v713_v9 = vsel %vm695_vm2, %v3331_v8, %v2716_v34 }
 0x206   :  { %797 = vmatpush.msrb.mxu3 %v735_v44  ;;  %v698_v43 = vsel %vm695_vm2, %v3337_v19, %v2715_v41  ;;  %v731_v44 = vsel %vm695_vm2, %v3362_v16, %v2711_v54 }
 0x207   :  { %760 = vmatpush.msrb.mxu1 %v700_v6  ;;  %779 = vmatpush.msra.mxu2 %v717_v15 }
 0x208   :  { %798 = vmatpush.msrb.mxu3 %v734_v51  ;;  %v2730_v51 = vunpack.i.l.bf16 %v2729_v1 }
 0x209   :  { %v2724_v13 = vpop.permute.xlu1 %2723  ;;  %780 = vmatpush.msra.mxu2 %v716_v53  ;;  %v2704_v2 = vpop.permute.xlu0 %2703 }
 0x20a   :  { %799 = vmatpush.msrb.mxu3 %v733_v58  ;;  %v2706_v38 = vunpack.i.h.bf16 %v2704_v2  ;;  %v2705_v11 = vunpack.i.l.bf16 %v2704_v2  ;;  %v2725_v3 = vunpack.i.l.bf16 %v2724_v13  ;;  %v2726_v52 = vunpack.i.h.bf16 %v2724_v13  ;;  %v4378_v13 = vld [vmem:[#allocation18_spill] sm:$0xff] }
 0x20b   :  { %781 = vmatpush.msra.mxu2 %v715_v39  ;;  %v2791_v2 = vmov 0.0025510204   ;;  %v2731_v39 = vunpack.i.h.bf16 %v2729_v1 }
 0x20c   :  { %v699_v62 = vsel %vm695_vm2, %v3405_v14, %v2706_v38  ;;  %v732_v24 = vsel %vm695_vm2, %v3401_v55, %v2705_v11  ;;  %v712_v6 = vsel %vm695_vm2, %v3403_v10, %v2725_v3  ;;  %v696_v38 = vsel %vm695_vm2, %v3376_v36, %v2730_v51 }
 0x20d   :  { %761 = vmatpush.msrb.mxu1 %v699_v62  ;;  %782 = vmatpush.msra.mxu2 %v714_v29  ;;  %v729_v11 = vsel %vm695_vm2, %v3397_v49, %v2726_v52  ;;  %v728_v54 = vsel %vm695_vm2, %v4378_v13, %v2731_v39  ;;  %v4379_v62 = vld [vmem:[#allocation19_spill] sm:$0xff]  ;;  %v1336_v52 = vld [vmem:[%s4340_s6] sm:$0xff] }
 0x20e   :  { %800 = vmatpush.msrb.mxu3 %v732_v24 }
 0x20f   :  { %762 = vmatpush.msrb.mxu1 %v698_v43  ;;  %783 = vmatpush.msra.mxu2 %v713_v9 }
 0x210   :  { %801 = vmatpush.msrb.mxu3 %v731_v44 }
 0x211   :  { %784 = vmatpush.msra.mxu2 %v712_v6  ;;  %v2719_v15 = vpop.permute.xlu0 %2718 }
 0x212   :  { %v2721_v53 = vunpack.i.h.bf16 %v2719_v15  ;;  %v2720_v58 = vunpack.i.l.bf16 %v2719_v15  ;;  %785 = vmatmul.f32.vlgmr.msra.gmra.mxu2 %v2791_v2 }
 0x214   :  { %v697_v34 = vsel %vm695_vm2, %v3424_v46, %v2721_v53  ;;  %v730_v41 = vsel %vm695_vm2, %v3422_v50, %v2720_v58  ;;  %v1337_v53 = vld [vmem:[%s4340_s6 + $0x8] sm:$0xff]  ;;  %v2792_v58 = vmov 0  }
 0x215   :  { %763 = vmatpush.msrb.mxu1 %v697_v34  ;;  %802 = vmatpush.msrb.mxu3 %v730_v41  ;;  %v1341_v34 = vld [vmem:[%s4340_s6 + $0x28] sm:$0xff]  ;;  %v1339_v41 = vld [vmem:[%s4340_s6 + $0x18] sm:$0xff] }
 0x216   :  { %2733 = vset.pattern.permute.xlu1 %v2792_v58  ;;  %2732 = vset.pattern.permute.xlu0 %v2792_v58 }
 0x217   :  { %764 = vmatpush.msrb.mxu1 %v696_v38  ;;  %803 = vmatpush.msrb.mxu3 %v729_v11 }
 0x218   :  { %765 = vmatmul.f32.vlgmr.msrb.gmra.mxu1 %v2791_v2  ;;  %1350 = vperm.xlu0 %2732, %v1336_v52  }
 0x219   :  { %v645_v3 = vpop.permute.xlu0 %644  ;;  %804 = vmatpush.msrb.mxu3 %v728_v54  ;;  %2734 = vset.pattern.permute.xlu2 %v2792_v58  ;;  %v1344_v54 = vld [vmem:[%s4340_s6 + $0x40] sm:$0xff] }
 0x21a   :  { %v744_v29 = vsel %vm695_vm2, %v4379_v62, %v645_v3  ;;  %805 = vmatmul.f32.vlgmr.msrb.gmra.mxu3 %v2791_v2  ;;  %v1342_v3 = vld [vmem:[%s4340_s6 + $0x30] sm:$0xff]  ;;  %v1348_v58 = vld [vmem:[%s4340_s6 + $0x60] sm:$0x3] }
 0x21b   :  { %824 = vmatpush.msra.mxu1 %v744_v29 }
 0x220   :  { %2533 = vmatmul.msk.f32.vlgmr.msra.gmra.mxu1 %vm745_vm3, %v2791_v2  ;;  %1365 = vperm.xlu0 %2732, %v1341_v34   ;;  %v1343_v34 = vld [vmem:[%s4340_s6 + $0x38] sm:$0xff] }
 0x228   :  { %1374 = vperm.xlu0 %2732, %v1344_v54  }
 0x295   :  { %v766_v24 = vpop.f32.mrf.mxu1  ;;  %v786_v43 = vpop.f32.mrf.mxu2 }
 0x296   :  { %v787_v9 = vadd.f32 %v786_v43, %v766_v24 }
 0x29d   :  { %v806_v1 = vpop.f32.mrf.mxu3  ;;  %v826_v44 = vpop.f32.mrf.mxu1 }
 0x29e   :  { %v807_v6 = vadd.f32 %v806_v1, %v787_v9  ;;  %v1347_v1 = vld [vmem:[%s4340_s6 + $0x58] sm:$0xff] }
 0x29f   :  { %1383 = vperm.xlu0 %2732, %v1347_v1  }
 0x2a0   :  { %v827_v15 = vadd.f32 %v826_v44, %v807_v6  ;;  %v1345_v44 = vld [vmem:[%s4340_s6 + $0x48] sm:$0xff] }
 0x2a2   :  { %v829_v51 = vmul.f32 %v827_v15, %v827_v15 }
 0x2a4   :  { %831 = vrot.lane.b32.xlu1 %v829_v51, %s2790_s15 }
 0x2ac   :  { %1353 = vperm.xlu1 %2733, %v1337_v53  }
 0x2b4   :  { %1359 = vperm.xlu1 %2733, %v1339_v41   ;;  %v1346_v41 = vld [vmem:[%s4340_s6 + $0x50] sm:$0xff] }
 0x2bc   :  { %1368 = vperm.xlu1 %2733, %v1342_v3  }
 0x2c4   :  { %1377 = vperm.xlu1 %2733, %v1345_v44  }
 0x2cc   :  { %1386 = vperm.xlu1 %2733, %v1348_v58  }
 0x316   :  { %v832_v2 = vpop.permute.xlu1 %831 }
 0x317   :  { %v834_v39 = vsub.f32 %v827_v15, %v832_v2  ;;  %v1338_v2 = vld [vmem:[%s4340_s6 + $0x10] sm:$0xff] }
 0x319   :  { %v835_v38 = vmax.f32 %v834_v39, 0.0  ;;  %v1340_v39 = vld [vmem:[%s4340_s6 + $0x20] sm:$0xff]  ;;  %s2796_s6 = smov 12  }
 0x31b   :  { %v836_v11 = vadd.f32 1e-05, %v835_v38 }
 0x31d   :  { %2755 = vrsqrt.f32 %v836_v11  ;;  %vm843_vm5 = vweird.f32 %v836_v11 }
 0x323   :  { %v2756_v29 = vpop.eup %2755 }
 0x324   :  { %v838_v24 = vmul.f32 %v2756_v29, %v836_v11  ;;  %vm844_vm4 = vweird.f32 %v2756_v29  ;;  %v4380_v11 = vld [vmem:[#allocation8_spill] sm:$0xff] }
 0x325   :  { %vm845_vm6 = vmor %vm843_vm5, %vm844_vm4 }
 0x326   :  { %v839_v43 = vmul.f32 %v2756_v29, %v838_v24 }
 0x328   :  { %v840_v9 = vmul.f32 0.5, %v839_v43 }
 0x32a   :  { %v841_v6 = vsub.f32 1.5, %v840_v9 }
 0x32c   :  { %v842_v51 = vmul.f32 %v2756_v29, %v841_v6 }
 0x32e   :  { %v846_v52 = vsel %vm845_vm6, %v2756_v29, %v842_v51 }
 0x32f   :  { %v848_v53 = vrot.slane %v846_v52, 7 }
 0x331   :  { %849 = vrot.lane.b32.xlu2 %v848_v53, %s2793_s1 }
 0x339   :  { %1356 = vperm.xlu2 %2734, %v1338_v2  }
 0x341   :  { %1362 = vperm.xlu2 %2734, %v1340_v39  }
 0x349   :  { %1371 = vperm.xlu2 %2734, %v1343_v34  }
 0x351   :  { %1380 = vperm.xlu2 %2734, %v1346_v41  }
 0x38b   :  { %v850_v38 = vpop.permute.xlu2 %849 }
 0x38c   :  { %v852_v54 = vmul.f32 %v850_v38, %v4380_v11 }
 0x38e   :  { %v904_v3 = vrot.slane %v852_v54, 1  ;;  %v3607_v9 = vperm.slane %v852_v54, 1  ;;  %v4381_v54 = vld [vmem:[#allocation12_spill] sm:$0xff] }
 0x390   :  { %v906_v29 = vmul.f32 %v904_v3, %v827_v15  ;;  %v854_v44 = vmul.f32 %v3607_v9, %v3376_v36  ;;  %v855_v6 = vmul.f32 %v3607_v9, %v3424_v46  ;;  %v856_v51 = vmul.f32 %v3607_v9, %v3337_v19 }
 0x391   :  { %v857_v52 = vmul.f32 %v3607_v9, %v3405_v14  ;;  %v858_v15 = vmul.f32 %v3607_v9, %v3293_v5  ;;  %v859_v36 = vmul.f32 %v3607_v9, %v3372_v61  ;;  %v860_v19 = vmul.f32 %v3607_v9, %v3255_v18 }
 0x392   :  { %v908_v24 = vrot.slane %v906_v29, 6  ;;  %v861_v5 = vmul.f32 %v3607_v9, %v3333_v21  ;;  %v862_v34 = vmul.f32 %v3607_v9, %v3177_v23  ;;  %v863_v18 = vmul.f32 %v3607_v9, %v3117_v27  ;;  %v4382_v29 = vld [vmem:[#allocation9_spill] sm:$0xff] }
 0x393   :  { %v864_v21 = vmul.f32 %v3607_v9, %v3200_v56  ;;  %v865_v23 = vmul.f32 %v3607_v9, %v3101_v17  ;;  %v866_v27 = vmul.f32 %v3607_v9, %v4381_v54  ;;  %v867_v56 = vmul.f32 %v3607_v9, %v4382_v29 }
 0x394   :  { %v910_v43 = vsub.f32 %v4380_v11, %v908_v24 }
 0x396   :  { %v3609_v1 = vperm.slane %v910_v43, 2  ;;  %v4383_v43 = vld [vmem:[#allocation14_spill] sm:$0xff] }
 0x397   :  { %v868_v17 = vmul.f32 %v3607_v9, %v4383_v43 }
 0x398   :  { %v912_v53 = vadd.f32 %v3609_v1, %v854_v44  ;;  %v913_v58 = vadd.f32 %v3609_v1, %v855_v6  ;;  %v914_v2 = vadd.f32 %v3609_v1, %v856_v51  ;;  %v915_v46 = vadd.f32 %v3609_v1, %v857_v52  ;;  %v4384_v6 = vld [vmem:[#allocation11_spill] sm:$0xff] }
 0x399   :  { %v916_v39 = vadd.f32 %v3609_v1, %v858_v15  ;;  %v917_v14 = vadd.f32 %v3609_v1, %v859_v36  ;;  %v918_v61 = vadd.f32 %v3609_v1, %v860_v19  ;;  %v919_v41 = vadd.f32 %v3609_v1, %v861_v5 }
 0x39a   :  { %961 = vst.msk [vmem:[#allocation2] sm:$0xff] %vm695_vm2, %v912_v53  ;;  %v920_v38 = vadd.f32 %v3609_v1, %v862_v34  ;;  %v921_v11 = vadd.f32 %v3609_v1, %v863_v18  ;;  %v922_v3 = vadd.f32 %v3609_v1, %v864_v21  ;;  %v923_v24 = vadd.f32 %v3609_v1, %v865_v23 }
 0x39b   :  { %962 = vst.msk [vmem:[#allocation2 + $0x8] sm:$0xff] %vm695_vm2, %v913_v58  ;;  %v924_v44 = vadd.f32 %v3609_v1, %v866_v27  ;;  %v869_v51 = vmul.f32 %v3607_v9, %v4384_v6  ;;  %v925_v52 = vadd.f32 %v3609_v1, %v867_v56  ;;  %v870_v15 = vmul.f32 %v3607_v9, %v3403_v10 }
 0x39c   :  { %963 = vst.msk [vmem:[#allocation2 + $0x10] sm:$0xff] %vm695_vm2, %v914_v2  ;;  %v926_v53 = vadd.f32 %v3609_v1, %v868_v17  ;;  %v871_v58 = vmul.f32 %v3607_v9, %v3331_v8  ;;  %v872_v36 = vmul.f32 %v3607_v9, %v3368_v40  ;;  %v873_v10 = vmul.f32 %v3607_v9, %v4377_v48  ;;  %v4385_v17 = vld [vmem:[#allocation10_spill] sm:$0xff] }
 0x39d   :  { %964 = vst.msk [vmem:[#allocation2 + $0x18] sm:$0xff] %vm695_vm2, %v915_v46  ;;  %v927_v2 = vadd.f32 %v3609_v1, %v869_v51  ;;  %v928_v46 = vadd.f32 %v3609_v1, %v870_v15  ;;  %v874_v8 = vmul.f32 %v3607_v9, %v3329_v42  ;;  %v875_v40 = vmul.f32 %v3607_v9, %v4376_v60 }
 0x39e   :  { %965 = vst.msk [vmem:[#allocation2 + $0x20] sm:$0xff] %vm695_vm2, %v916_v39  ;;  %v929_v19 = vadd.f32 %v3609_v1, %v871_v58  ;;  %v930_v39 = vadd.f32 %v3609_v1, %v872_v36  ;;  %v931_v5 = vadd.f32 %v3609_v1, %v873_v10  ;;  %v876_v48 = vmul.f32 %v3607_v9, %v4374_v45 }
 0x39f   :  { %966 = vst.msk [vmem:[#allocation2 + $0x28] sm:$0xff] %vm695_vm2, %v917_v14  ;;  %v932_v14 = vadd.f32 %v3609_v1, %v874_v8  ;;  %v877_v42 = vmul.f32 %v3607_v9, %v3182_v28  ;;  %v933_v34 = vadd.f32 %v3609_v1, %v875_v40  ;;  %v878_v60 = vmul.f32 %v3607_v9, %v3194_v7 }
 0x3a0   :  { %967 = vst.msk [vmem:[#allocation2 + $0x30] sm:$0xff] %vm695_vm2, %v918_v61  ;;  %v934_v61 = vadd.f32 %v3609_v1, %v876_v48  ;;  %v879_v45 = vmul.f32 %v3607_v9, %v3204_v0  ;;  %v880_v28 = vmul.f32 %v3607_v9, %v3216_v25  ;;  %v881_v7 = vmul.f32 %v3607_v9, %v3228_v35 }
 0x3a1   :  { %968 = vst.msk [vmem:[#allocation2 + $0x38] sm:$0xff] %vm695_vm2, %v919_v41  ;;  %v935_v18 = vadd.f32 %v3609_v1, %v877_v42  ;;  %v936_v41 = vadd.f32 %v3609_v1, %v878_v60  ;;  %v882_v0 = vmul.f32 %v3607_v9, %v3243_v37  ;;  %v883_v25 = vmul.f32 %v3607_v9, %v3269_v47 }
 0x3a2   :  { %969 = vst.msk [vmem:[#allocation2 + $0x40] sm:$0xff] %vm695_vm2, %v920_v38  ;;  %v937_v21 = vadd.f32 %v3609_v1, %v879_v45  ;;  %v938_v38 = vadd.f32 %v3609_v1, %v880_v28  ;;  %v885_v47 = vmul.f32 %v3607_v9, %v4385_v17  ;;  %v886_v51 = vmul.f32 %v3607_v9, %v4378_v13 }
 0x3a3   :  { %970 = vst.msk [vmem:[#allocation2 + $0x48] sm:$0xff] %vm695_vm2, %v921_v11  ;;  %v939_v11 = vadd.f32 %v3609_v1, %v881_v7  ;;  %v940_v37 = vadd.f32 %v3609_v1, %v882_v0  ;;  %v887_v58 = vmul.f32 %v3607_v9, %v3397_v49  ;;  %v888_v13 = vmul.f32 %v3607_v9, %v3422_v50 }
 0x3a4   :  { %971 = vst.msk [vmem:[#allocation2 + $0x50] sm:$0xff] %vm695_vm2, %v922_v3  ;;  %v884_v3 = vmul.f32 %v3607_v9, %v3305_v4  ;;  %v889_v8 = vmul.f32 %v3607_v9, %v3362_v16  ;;  %v890_v16 = vmul.f32 %v3607_v9, %v3401_v55  ;;  %v891_v45 = vmul.f32 %v3607_v9, %v3319_v33 }
 0x3a5   :  { %972 = vst.msk [vmem:[#allocation2 + $0x58] sm:$0xff] %vm695_vm2, %v923_v24  ;;  %v892_v33 = vmul.f32 %v3607_v9, %v3366_v63  ;;  %v894_v63 = vmul.f32 %v3607_v9, %v3327_v30  ;;  %v896_v30 = vmul.f32 %v3607_v9, %v3110_v22 }
 0x3a6   :  { %973 = vst.msk [vmem:[#allocation2 + $0x60] sm:$0xff] %vm695_vm2, %v924_v44  ;;  %v941_v44 = vadd.f32 %v3609_v1, %v883_v25  ;;  %v942_v4 = vadd.f32 %v3609_v1, %v884_v3  ;;  %v947_v28 = vadd.f32 %v3609_v1, %v889_v8 }
 0x3a7   :  { %974 = vst.msk [vmem:[#allocation2 + $0x68] sm:$0xff] %vm695_vm2, %v925_v52  ;;  %v954_v8 = vadd.f32 %v3609_v1, %v896_v30 }
 0x3a8   :  { %975 = vst.msk [vmem:[#allocation2 + $0x70] sm:$0xff] %vm695_vm2, %v926_v53 }
 0x3a9   :  { %976 = vst.msk [vmem:[#allocation2 + $0x78] sm:$0xff] %vm695_vm2, %v927_v2  ;;  %v943_v2 = vadd.f32 %v3609_v1, %v885_v47  ;;  %v1018_v3 = vld [vmem:[#allocation2 + $0x40] sm:$0xff] }
 0x3aa   :  { %977 = vst.msk [vmem:[#allocation2 + $0x80] sm:$0xff] %vm695_vm2, %v928_v46 }
 0x3ab   :  { %978 = vst.msk [vmem:[#allocation2 + $0x88] sm:$0xff] %vm695_vm2, %v929_v19  ;;  %v1065_v55 = vld [vmem:[#allocation2 + $0x4a] sm:$0xff] }
 0x3ac   :  { %979 = vst.msk [vmem:[#allocation2 + $0x90] sm:$0xff] %vm695_vm2, %v930_v39  ;;  %v944_v39 = vadd.f32 %v3609_v1, %v886_v51  ;;  %v1066_v50 = vld [vmem:[#allocation2 + $0x52] sm:$0xff] }
 0x3ad   :  { %980 = vst.msk [vmem:[#allocation2 + $0x98] sm:$0xff] %vm695_vm2, %v931_v5  ;;  %v1022_v53 = vld [vmem:[#allocation2 + $0x60] sm:$0xff]  ;;  %v1021_v5 = vld [vmem:[#allocation2 + $0x58] sm:$0xff] }
 0x3ae   :  { %981 = vst.msk [vmem:[#allocation2 + $0xa0] sm:$0xff] %vm695_vm2, %v932_v14  ;;  %v1023_v24 = vld [vmem:[#allocation2 + $0x68] sm:$0xff]  ;;  %v1067_v48 = vld [vmem:[#allocation2 + $0x5a] sm:$0xff]  ;;  %v945_v14 = vadd.f32 %v3609_v1, %v887_v58 }
 0x3af   :  { %982 = vst.msk [vmem:[#allocation2 + $0xa8] sm:$0xff] %vm695_vm2, %v933_v34  ;;  %v1024_v54 = vld [vmem:[#allocation2 + $0x70] sm:$0xff]  ;;  %v1068_v19 = vld [vmem:[#allocation2 + $0x62] sm:$0xff]  ;;  %v1113_v60 = vmax.f32 %v1021_v5, %v1067_v48 }
 0x3b0   :  { %983 = vst.msk [vmem:[#allocation2 + $0xb0] sm:$0xff] %vm695_vm2, %v934_v61  ;;  %v1025_v23 = vld [vmem:[#allocation2 + $0x78] sm:$0xff]  ;;  %v1069_v43 = vld [vmem:[#allocation2 + $0x6a] sm:$0xff]  ;;  %v1114_v49 = vmax.f32 %v1022_v53, %v1068_v19 }
 0x3b1   :  { %984 = vst.msk [vmem:[#allocation2 + $0xb8] sm:$0xff] %vm695_vm2, %v935_v18  ;;  %v1071_v35 = vld [vmem:[#allocation2 + $0x7a] sm:$0xff]  ;;  %v1070_v27 = vld [vmem:[#allocation2 + $0x72] sm:$0xff]  ;;  %v1115_v6 = vmax.f32 %v1023_v24, %v1069_v43  ;;  %v946_v18 = vadd.f32 %v3609_v1, %v888_v13  ;;  %v950_v43 = vadd.f32 %v3609_v1, %v892_v33  ;;  %v1157_v58 = vld [vmem:[#allocation2 + $0x64] sm:$0xff]  ;;  %v899_v13 = vmul.f32 %v3607_v9, %v3236_v59 }
 0x3b2   :  { %985 = vst.msk [vmem:[#allocation2 + $0xc0] sm:$0xff] %vm695_vm2, %v936_v41  ;;  %v1117_v29 = vmax.f32 %v1025_v23, %v1071_v35  ;;  %v1116_v56 = vmax.f32 %v1024_v54, %v1070_v27  ;;  %v1161_v10 = vld [vmem:[#allocation2 + $0x84] sm:$0xff]  ;;  %v1020_v61 = vld [vmem:[#allocation2 + $0x50] sm:$0xff]  ;;  %v1160_v7 = vld [vmem:[#allocation2 + $0x7c] sm:$0xff]  ;;  %v948_v35 = vadd.f32 %v3609_v1, %v890_v16  ;;  %v949_v54 = vadd.f32 %v3609_v1, %v891_v45 }
 0x3b3   :  { %986 = vst.msk [vmem:[#allocation2 + $0xc8] sm:$0xff] %vm695_vm2, %v937_v21  ;;  %v1162_v15 = vld [vmem:[#allocation2 + $0x8c] sm:$0xff]  ;;  %v1207_v34 = vmax.f32 %v1115_v6, %v1161_v10  ;;  %v1206_v23 = vmax.f32 %v1114_v49, %v1160_v7  ;;  %v1112_v25 = vmax.f32 %v1020_v61, %v1066_v50  ;;  %v1159_v27 = vld [vmem:[#allocation2 + $0x74] sm:$0xff]  ;;  %v1252_v47 = vld [vmem:[#allocation2 + $0x7e] sm:$0xff]  ;;  %v900_v59 = vmul.f32 %v3607_v9, %v3126_v31 }
 0x3b4   :  { %987 = vst.msk [vmem:[#allocation2 + $0xd0] sm:$0xff] %vm695_vm2, %v938_v38  ;;  %v1163_v52 = vld [vmem:[#allocation2 + $0x94] sm:$0xff]  ;;  %v1208_v46 = vmax.f32 %v1116_v56, %v1162_v15  ;;  %v1019_v21 = vld [vmem:[#allocation2 + $0x48] sm:$0xff]  ;;  %v1205_v56 = vmax.f32 %v1113_v60, %v1159_v27  ;;  %v1156_v22 = vld [vmem:[#allocation2 + $0x5c] sm:$0xff]  ;;  %v901_v61 = vmul.f32 %v3607_v9, %v3286_v26  ;;  %v902_v31 = vmul.f32 %v3607_v9, %v4379_v62 }
 0x3b5   :  { %988 = vst.msk [vmem:[#allocation2 + $0xd8] sm:$0xff] %vm695_vm2, %v939_v11  ;;  %v1209_v36 = vmax.f32 %v1117_v29, %v1163_v52  ;;  %v1255_v40 = vld [vmem:[#allocation2 + $0x96] sm:$0xff]  ;;  %v1254_v41 = vld [vmem:[#allocation2 + $0x8e] sm:$0xff]  ;;  %v1253_v38 = vld [vmem:[#allocation2 + $0x86] sm:$0xff]  ;;  %v893_v11 = vmul.f32 %v3607_v9, %v4375_v57  ;;  %v1111_v24 = vmax.f32 %v1019_v21, %v1065_v55  ;;  %v895_v57 = vmul.f32 %v3607_v9, %v3188_v32 }
 0x3b6   :  { %989 = vst.msk [vmem:[#allocation2 + $0xe0] sm:$0xff] %vm695_vm2, %v940_v37  ;;  %v1300_v0 = vmax.f32 %v1208_v46, %v1254_v41  ;;  %v1064_v37 = vld [vmem:[#allocation2 + $0x42] sm:$0xff]  ;;  %v1299_v29 = vmax.f32 %v1207_v34, %v1253_v38  ;;  %v1298_v6 = vmax.f32 %v1206_v23, %v1252_v47  ;;  %v897_v32 = vmul.f32 %v3607_v9, %v3212_v20  ;;  %v1251_v15 = vld [vmem:[#allocation2 + $0x76] sm:$0xff]  ;;  %v1250_v53 = vld [vmem:[#allocation2 + $0x6e] sm:$0xff] }
 0x3b7   :  { %990 = vst.msk [vmem:[#allocation2 + $0xe8] sm:$0xff] %vm695_vm2, %v941_v44  ;;  %v1301_v42 = vmax.f32 %v1209_v36, %v1255_v40  ;;  %v951_v17 = vadd.f32 %v3609_v1, %v893_v11  ;;  %v1158_v44 = vld [vmem:[#allocation2 + $0x6c] sm:$0xff]  ;;  %v952_v52 = vadd.f32 %v3609_v1, %v894_v63  ;;  %v1297_v10 = vmax.f32 %v1205_v56, %v1251_v15  ;;  %v1248_v55 = vld [vmem:[#allocation2 + $0x5e] sm:$0xff] }
 0x3b8   :  { %991 = vst.msk [vmem:[#allocation2 + $0xf0] sm:$0xff] %vm695_vm2, %v942_v4  ;;  %v1204_v51 = vmax.f32 %v1112_v25, %v1158_v44  ;;  %v1110_v4 = vmax.f32 %v1018_v3, %v1064_v37  ;;  %v1203_v19 = vmax.f32 %v1111_v24, %v1157_v58  ;;  %v898_v20 = vmul.f32 %v3607_v9, %v3095_v12  ;;  %v1249_v45 = vld [vmem:[#allocation2 + $0x66] sm:$0xff]  ;;  %v1063_v56 = vld [vmem:[#allocation2 + $0x3a] sm:$0xff] }
 0x3b9   :  { %992 = vst.msk [vmem:[#allocation2 + $0xf8] sm:$0xff] %vm695_vm2, %v943_v2  ;;  %1510 = vmatpush.msrb.mxu2 %v1301_v42  ;;  %v953_v2 = vadd.f32 %v3609_v1, %v895_v57  ;;  %v958_v26 = vadd.f32 %v3609_v1, %v900_v59  ;;  %v960_v62 = vadd.f32 %v3609_v1, %v902_v31 }
 0x3ba   :  { %993 = vst.msk [vmem:[#allocation2 + $0x100] sm:$0xff] %vm695_vm2, %v944_v39  ;;  %v955_v39 = vadd.f32 %v3609_v1, %v897_v32  ;;  %v1296_v12 = vmax.f32 %v1204_v51, %v1250_v53  ;;  %v1202_v60 = vmax.f32 %v1110_v4, %v1156_v22  ;;  %v956_v50 = vadd.f32 %v3609_v1, %v898_v20  ;;  %v1035_v57 = vld [vmem:[#allocation2 + $0xc8] sm:$0xff]  ;;  %v1034_v32 = vld [vmem:[#allocation2 + $0xc0] sm:$0xff] }
 0x3bb   :  { %994 = vst.msk [vmem:[#allocation2 + $0x108] sm:$0xff] %vm695_vm2, %v945_v14  ;;  %1511 = vmatpush.msrb.mxu2 %v1300_v0  ;;  %v1295_v21 = vmax.f32 %v1203_v19, %v1249_v45  ;;  %v959_v0 = vadd.f32 %v3609_v1, %v901_v61  ;;  %v1080_v58 = vld [vmem:[#allocation2 + $0xc2] sm:$0xff] }
 0x3bc   :  { %995 = vst.msk [vmem:[#allocation2 + $0x110] sm:$0xff] %vm695_vm2, %v946_v18  ;;  %v957_v18 = vadd.f32 %v3609_v1, %v899_v13  ;;  %v1037_v41 = vld [vmem:[#allocation2 + $0xd8] sm:$0xff]  ;;  %v1294_v3 = vmax.f32 %v1202_v60, %v1248_v55 }
 0x3bd   :  { %996 = vst.msk [vmem:[#allocation2 + $0x118] sm:$0xff] %vm695_vm2, %v947_v28  ;;  %1512 = vmatpush.msrb.mxu2 %v1299_v29  ;;  %v1038_v42 = vld [vmem:[#allocation2 + $0xe0] sm:$0xff]  ;;  %v1082_v27 = vld [vmem:[#allocation2 + $0xd2] sm:$0xff] }
 0x3be   :  { %997 = vst.msk [vmem:[#allocation2 + $0x120] sm:$0xff] %vm695_vm2, %v948_v35  ;;  %v1039_v46 = vld [vmem:[#allocation2 + $0xe8] sm:$0xff]  ;;  %v1083_v7 = vld [vmem:[#allocation2 + $0xda] sm:$0xff] }
 0x3bf   :  { %998 = vst.msk [vmem:[#allocation2 + $0x128] sm:$0xff] %vm695_vm2, %v949_v54  ;;  %v1040_v36 = vld [vmem:[#allocation2 + $0xf0] sm:$0xff]  ;;  %1513 = vmatpush.msrb.mxu2 %v1298_v6  ;;  %v1084_v34 = vld [vmem:[#allocation2 + $0xe2] sm:$0xff]  ;;  %v1129_v37 = vmax.f32 %v1037_v41, %v1083_v7  ;;  %v1017_v29 = vld [vmem:[#allocation2 + $0x38] sm:$0xff] }
 0x3c0   :  { %999 = vst.msk [vmem:[#allocation2 + $0x130] sm:$0xff] %vm695_vm2, %v950_v43  ;;  %v1041_v40 = vld [vmem:[#allocation2 + $0xf8] sm:$0xff]  ;;  %v1085_v5 = vld [vmem:[#allocation2 + $0xea] sm:$0xff]  ;;  %v1130_v25 = vmax.f32 %v1038_v42, %v1084_v34  ;;  %v1126_v42 = vmax.f32 %v1034_v32, %v1080_v58 }
 0x3c1   :  { %v1086_v49 = vld [vmem:[#allocation2 + $0xf2] sm:$0xff]  ;;  %1000 = vst.msk [vmem:[#allocation2 + $0x138] sm:$0xff] %vm695_vm2, %v951_v17  ;;  %v1087_v48 = vld [vmem:[#allocation2 + $0xfa] sm:$0xff]  ;;  %1514 = vmatpush.msrb.mxu2 %v1297_v10  ;;  %v1131_v28 = vmax.f32 %v1039_v46, %v1085_v5  ;;  %v1081_v43 = vld [vmem:[#allocation2 + $0xca] sm:$0xff]  ;;  %v1109_v17 = vmax.f32 %v1017_v29, %v1063_v56 }
 0x3c2   :  { %v1132_v14 = vmax.f32 %v1040_v36, %v1086_v49  ;;  %1001 = vst.msk [vmem:[#allocation2 + $0x140] sm:$0xff] %vm695_vm2, %v952_v52  ;;  %v1133_v16 = vmax.f32 %v1041_v40, %v1087_v48  ;;  %v1177_v35 = vld [vmem:[#allocation2 + $0x104] sm:$0xff]  ;;  %v1036_v54 = vld [vmem:[#allocation2 + $0xd0] sm:$0xff]  ;;  %v1176_v44 = vld [vmem:[#allocation2 + $0xfc] sm:$0xff]  ;;  %v1127_v53 = vmax.f32 %v1035_v57, %v1081_v43 }
 0x3c3   :  { %1002 = vst.msk [vmem:[#allocation2 + $0x148] sm:$0xff] %vm695_vm2, %v953_v2  ;;  %1515 = vmatpush.msrb.mxu2 %v1296_v12  ;;  %v1178_v23 = vld [vmem:[#allocation2 + $0x10c] sm:$0xff]  ;;  %v1223_v63 = vmax.f32 %v1131_v28, %v1177_v35  ;;  %v1128_v6 = vmax.f32 %v1036_v54, %v1082_v27  ;;  %v1155_v1 = vld [vmem:[#allocation2 + $0x54] sm:$0xff]  ;;  %v1222_v4 = vmax.f32 %v1130_v25, %v1176_v44  ;;  %v1268_v46 = vld [vmem:[#allocation2 + $0xfe] sm:$0xff] }
 0x3c4   :  { %1003 = vst.msk [vmem:[#allocation2 + $0x150] sm:$0xff] %vm695_vm2, %v954_v8  ;;  %v1179_v38 = vld [vmem:[#allocation2 + $0x114] sm:$0xff]  ;;  %v1224_v11 = vmax.f32 %v1132_v14, %v1178_v23  ;;  %v1201_v52 = vmax.f32 %v1109_v17, %v1155_v1  ;;  %v1269_v15 = vld [vmem:[#allocation2 + $0x106] sm:$0xff] }
 0x3c5   :  { %1004 = vst.msk [vmem:[#allocation2 + $0x158] sm:$0xff] %vm695_vm2, %v955_v39  ;;  %v1225_v33 = vmax.f32 %v1133_v16, %v1179_v38  ;;  %1516 = vmatpush.msrb.mxu2 %v1295_v21  ;;  %v1271_v9 = vld [vmem:[#allocation2 + $0x116] sm:$0xff]  ;;  %v1270_v47 = vld [vmem:[#allocation2 + $0x10e] sm:$0xff]  ;;  %v1315_v36 = vmax.f32 %v1223_v63, %v1269_v15  ;;  %v1173_v22 = vld [vmem:[#allocation2 + $0xe4] sm:$0xff]  ;;  %v1314_v48 = vmax.f32 %v1222_v4, %v1268_v46 }
 0x3c6   :  { %1005 = vst.msk [vmem:[#allocation2 + $0x160] sm:$0xff] %vm695_vm2, %v956_v50  ;;  %v1316_v51 = vmax.f32 %v1224_v11, %v1270_v47  ;;  %v1175_v30 = vld [vmem:[#allocation2 + $0xf4] sm:$0xff]  ;;  %v1174_v19 = vld [vmem:[#allocation2 + $0xec] sm:$0xff]  ;;  %v1219_v59 = vmax.f32 %v1127_v53, %v1173_v22 }
 0x3c7   :  { %1006 = vst.msk [vmem:[#allocation2 + $0x168] sm:$0xff] %vm695_vm2, %v957_v18  ;;  %v1317_v24 = vmax.f32 %v1225_v33, %v1271_v9  ;;  %1517 = vmatpush.msrb.mxu2 %v1294_v3  ;;  %v1247_v2 = vld [vmem:[#allocation2 + $0x56] sm:$0xff]  ;;  %v1221_v10 = vmax.f32 %v1129_v37, %v1175_v30  ;;  %v1220_v14 = vmax.f32 %v1128_v6, %v1174_v19  ;;  %v1266_v28 = vld [vmem:[#allocation2 + $0xee] sm:$0xff]  ;;  %v1265_v31 = vld [vmem:[#allocation2 + $0xe6] sm:$0xff] }
 0x3c8   :  { %1007 = vst.msk [vmem:[#allocation2 + $0x170] sm:$0xff] %vm695_vm2, %v958_v26  ;;  %v1293_v20 = vmax.f32 %v1201_v52, %v1247_v2  ;;  %v1267_v13 = vld [vmem:[#allocation2 + $0xf6] sm:$0xff]  ;;  %v1264_v3 = vld [vmem:[#allocation2 + $0xde] sm:$0xff]  ;;  %v1311_v56 = vmax.f32 %v1219_v59, %v1265_v31 }
 0x3c9   :  { %1008 = vst.msk [vmem:[#allocation2 + $0x178] sm:$0xff] %vm695_vm2, %v959_v0  ;;  %1566 = vmatpush.msra.mxu3 %v1317_v24  ;;  %v1033_v8 = vld [vmem:[#allocation2 + $0xb8] sm:$0xff]  ;;  %v1313_v18 = vmax.f32 %v1221_v10, %v1267_v13  ;;  %v1312_v25 = vmax.f32 %v1220_v14, %v1266_v28  ;;  %v1050_v54 = vld [vmem:[#allocation2 + $0x140] sm:$0xff]  ;;  %v3809_v47 = vld [vmem:[#allocation2 + $0x130] sm:$0xff] }
 0x3ca   :  { %1009 = vst.msk [vmem:[#allocation2 + $0x180] sm:$0xff] %vm695_vm2, %v960_v62  ;;  %v1079_v39 = vld [vmem:[#allocation2 + $0xba] sm:$0xff]  ;;  %1518 = vmatpush.msrb.mxu2 %v1293_v20  ;;  %v1051_v21 = vld [vmem:[#allocation2 + $0x148] sm:$0xff]  ;;  %v3811_v44 = vld [vmem:[#allocation2 + $0x132] sm:$0xff] }
 0x3cb   :  { %1567 = vmatpush.msra.mxu3 %v1316_v51  ;;  %v1052_v16 = vld [vmem:[#allocation2 + $0x150] sm:$0xff]  ;;  %v1125_v41 = vmax.f32 %v1033_v8, %v1079_v39  ;;  %v1172_v26 = vld [vmem:[#allocation2 + $0xdc] sm:$0xff]  ;;  %v3815_v8 = vld [vmem:[#allocation2 + $0x128] sm:$0xff]  ;;  %v1140_v59 = vmax.f32 %v3809_v47, %v3811_v44 }
 0x3cc   :  { %v1053_v49 = vld [vmem:[#allocation2 + $0x158] sm:$0xff]  ;;  %v1097_v23 = vld [vmem:[#allocation2 + $0x14a] sm:$0xff]  ;;  %v1218_v55 = vmax.f32 %v1126_v42, %v1172_v26  ;;  %v1096_v29 = vld [vmem:[#allocation2 + $0x142] sm:$0xff] }
 0x3cd   :  { %v1054_v40 = vld [vmem:[#allocation2 + $0x160] sm:$0xff]  ;;  %1568 = vmatpush.msra.mxu3 %v1315_v36  ;;  %v1098_v45 = vld [vmem:[#allocation2 + $0x152] sm:$0xff]  ;;  %v1143_v43 = vmax.f32 %v1051_v21, %v1097_v23  ;;  %v1142_v58 = vmax.f32 %v1050_v54, %v1096_v29  ;;  %v1093_v14 = vld [vmem:[#allocation2 + $0x12a] sm:$0xff]  ;;  %v1332_v29 = vlaneseq }
 0x3ce   :  { %v1099_v5 = vld [vmem:[#allocation2 + $0x15a] sm:$0xff]  ;;  %v1055_v34 = vld [vmem:[#allocation2 + $0x168] sm:$0x3]  ;;  %v1101_v12 = vld [vmem:[#allocation2 + $0x16a] sm:$0x3]  ;;  %v1144_v35 = vmax.f32 %v1052_v16, %v1098_v45  ;;  %v1310_v30 = vmax.f32 %v1218_v55, %v1264_v3 }
 0x3cf   :  { %v1100_v60 = vld [vmem:[#allocation2 + $0x162] sm:$0xff]  ;;  %v1147_v61 = vmax.f32 %v1055_v34, %v1101_v12  ;;  %1569 = vmatpush.msra.mxu3 %v1314_v48  ;;  %v1145_v7 = vmax.f32 %v1053_v49, %v1099_v5  ;;  %v3807_v27 = vld [vmem:[#allocation2 + $0x138] sm:$0xff]  ;;  %v1016_v1 = vld [vmem:[#allocation2 + $0x30] sm:$0xff] }
 0x3d0   :  { %v1146_v50 = vmax.f32 %v1054_v40, %v1100_v60  ;;  %v1171_v62 = vld [vmem:[#allocation2 + $0xd4] sm:$0xff]  ;;  %v1190_v4 = vld [vmem:[#allocation2 + $0x16c] sm:$0xff]  ;;  %v1189_v53 = vld [vmem:[#allocation2 + $0x164] sm:$0xff] }
 0x3d1   :  { %v1193_v0 = vld [vmem:[#allocation2 + $0x184] sm:$0x3]  ;;  %v1192_v38 = vld [vmem:[#allocation2 + $0x17c] sm:$0xff]  ;;  %1570 = vmatpush.msra.mxu3 %v1313_v18  ;;  %v1285_v9 = vld [vmem:[#allocation2 + $0x186] sm:$0x3]  ;;  %v1217_v24 = vmax.f32 %v1125_v41, %v1171_v62  ;;  %v1236_v15 = vmax.f32 %v1144_v35, %v1190_v4  ;;  %v1235_v5 = vmax.f32 %v1143_v43, %v1189_v53 }
 0x3d2   :  { %v1239_v33 = vmax.f32 %v1147_v61, %v1193_v0  ;;  %v1238_v11 = vmax.f32 %v1146_v50, %v1192_v38  ;;  %v1191_v37 = vld [vmem:[#allocation2 + $0x174] sm:$0xff]  ;;  %v1284_v51 = vld [vmem:[#allocation2 + $0x17e] sm:$0xff]  ;;  %v1154_v39 = vld [vmem:[#allocation2 + $0x4c] sm:$0xff] }
 0x3d3   :  { %1571 = vmatpush.msra.mxu3 %v1312_v25  ;;  %v1237_v57 = vmax.f32 %v1145_v7, %v1191_v37  ;;  %v1095_v17 = vld [vmem:[#allocation2 + $0x13a] sm:$0xff]  ;;  %v1062_v32 = vld [vmem:[#allocation2 + $0x32] sm:$0xff]  ;;  %v1015_v12 = vld [vmem:[#allocation2 + $0x28] sm:$0xff] }
 0x3d4   :  { %v1331_v63 = vmax.f32 %v1239_v33, %v1285_v9  ;;  %v1263_v6 = vld [vmem:[#allocation2 + $0xd6] sm:$0xff]  ;;  %v1330_v52 = vmax.f32 %v1238_v11, %v1284_v51  ;;  %v1108_v2 = vmax.f32 %v1016_v1, %v1062_v32  ;;  %v1282_v19 = vld [vmem:[#allocation2 + $0x16e] sm:$0xff]  ;;  %v1141_v20 = vmax.f32 %v3807_v27, %v1095_v17  ;;  %v1281_v60 = vld [vmem:[#allocation2 + $0x166] sm:$0xff] }
 0x3d5   :  { %1572 = vmatpush.msra.mxu3 %v1311_v56  ;;  %v1032_v36 = vld [vmem:[#allocation2 + $0xb0] sm:$0xff]  ;;  %v1188_v22 = vld [vmem:[#allocation2 + $0x15c] sm:$0xff]  ;;  %v1309_v13 = vmax.f32 %v1217_v24, %v1263_v6  ;;  %v1328_v18 = vmax.f32 %v1236_v15, %v1282_v19  ;;  %v1031_v26 = vld [vmem:[#allocation2 + $0xa8] sm:$0xff]  ;;  %v1327_v54 = vmax.f32 %v1235_v5, %v1281_v60  ;;  %v1139_v27 = vmax.f32 %v3815_v8, %v1093_v14 }
 0x3d6   :  { %2560 = vmatpush.msk.msrb.mxu1 %vm1506_vm7, %v1331_v63  ;;  %v1078_v46 = vld [vmem:[#allocation2 + $0xb2] sm:$0xff]  ;;  %v1200_v42 = vmax.f32 %v1108_v2, %v1154_v39  ;;  %v1061_v45 = vld [vmem:[#allocation2 + $0x2a] sm:$0xff]  ;;  %v1234_v28 = vmax.f32 %v1142_v58, %v1188_v22  ;;  %v1046_v21 = vld [vmem:[#allocation2 + $0x120] sm:$0xff]  ;;  %v3820_v8 = vand.u32 127, %v1332_v29 }
 0x3d7   :  { %v1283_v10 = vld [vmem:[#allocation2 + $0x176] sm:$0xff]  ;;  %1573 = vmatpush.msra.mxu3 %v1310_v30  ;;  %v1124_v40 = vmax.f32 %v1032_v36, %v1078_v46  ;;  %v1170_v34 = vld [vmem:[#allocation2 + $0xcc] sm:$0xff]  ;;  %v1107_v31 = vmax.f32 %v1015_v12, %v1061_v45  ;;  %v1280_v38 = vld [vmem:[#allocation2 + $0x15e] sm:$0xff] }
 0x3d8   :  { %1625 = vmatpush.msrb.mxu1 %v1330_v52  ;;  %v1329_v49 = vmax.f32 %v1237_v57, %v1283_v10  ;;  %v1187_v48 = vld [vmem:[#allocation2 + $0x154] sm:$0xff]  ;;  %v1186_v41 = vld [vmem:[#allocation2 + $0x14c] sm:$0xff]  ;;  %v1092_v55 = vld [vmem:[#allocation2 + $0x122] sm:$0xff]  ;;  %v1326_v47 = vmax.f32 %v1234_v28, %v1280_v38 }
 0x3d9   :  { %1574 = vmatpush.msra.mxu3 %v1309_v13  ;;  %v1246_v61 = vld [vmem:[#allocation2 + $0x4e] sm:$0xff]  ;;  %v1216_v50 = vmax.f32 %v1124_v40, %v1170_v34  ;;  %v1233_v23 = vmax.f32 %v1141_v20, %v1187_v48  ;;  %v1153_v33 = vld [vmem:[#allocation2 + $0x44] sm:$0xff]  ;;  %v1045_v62 = vld [vmem:[#allocation2 + $0x118] sm:$0xff]  ;;  %v1232_v24 = vmax.f32 %v1140_v59, %v1186_v41  ;;  %v1138_v6 = vmax.f32 %v1046_v21, %v1092_v55 }
 0x3da   :  { %v1262_v16 = vld [vmem:[#allocation2 + $0xce] sm:$0xff]  ;;  %1626 = vmatpush.msrb.mxu1 %v1329_v49  ;;  %v1292_v7 = vmax.f32 %v1200_v42, %v1246_v61  ;;  %v1169_v35 = vld [vmem:[#allocation2 + $0xc4] sm:$0xff]  ;;  %v1199_v3 = vmax.f32 %v1107_v31, %v1153_v33  ;;  %v1091_v9 = vld [vmem:[#allocation2 + $0x11a] sm:$0xff]  ;;  %v3823_v33 = vadd.s32 256, %v3820_v8 }
 0x3db   :  { %v1077_v0 = vld [vmem:[#allocation2 + $0xaa] sm:$0xff]  ;;  %v1308_v25 = vmax.f32 %v1216_v50, %v1262_v16  ;;  %v1014_v37 = vld [vmem:[#allocation2 + $0x20] sm:$0xff]  ;;  %v1279_v56 = vld [vmem:[#allocation2 + $0x156] sm:$0xff]  ;;  %v1137_v15 = vmax.f32 %v1045_v62, %v1091_v9 }
 0x3dc   :  { %v1123_v11 = vmax.f32 %v1031_v26, %v1077_v0  ;;  %1627 = vmatpush.msrb.mxu1 %v1328_v18  ;;  %1519 = vmatpush.msrb.mxu2 %v1292_v7  ;;  %v1185_v63 = vld [vmem:[#allocation2 + $0x144] sm:$0xff]  ;;  %v1278_v44 = vld [vmem:[#allocation2 + $0x14e] sm:$0xff]  ;;  %v1152_v53 = vld [vmem:[#allocation2 + $0x3c] sm:$0xff]  ;;  %v1325_v46 = vmax.f32 %v1233_v23, %v1279_v56 }
 0x3dd   :  { %1575 = vmatpush.msra.mxu3 %v1308_v25  ;;  %v1245_v57 = vld [vmem:[#allocation2 + $0x46] sm:$0xff]  ;;  %v1044_v2 = vld [vmem:[#allocation2 + $0x110] sm:$0xff]  ;;  %v1231_v10 = vmax.f32 %v1139_v27, %v1185_v63  ;;  %v1184_v19 = vld [vmem:[#allocation2 + $0x13c] sm:$0xff]  ;;  %v1324_v39 = vmax.f32 %v1232_v24, %v1278_v44 }
 0x3de   :  { %v1215_v43 = vmax.f32 %v1123_v11, %v1169_v35  ;;  %v1060_v17 = vld [vmem:[#allocation2 + $0x22] sm:$0xff]  ;;  %1628 = vmatpush.msrb.mxu1 %v1327_v54  ;;  %v1291_v1 = vmax.f32 %v1199_v3, %v1245_v57  ;;  %v1090_v36 = vld [vmem:[#allocation2 + $0x112] sm:$0xff]  ;;  %v1059_v14 = vld [vmem:[#allocation2 + $0x1a] sm:$0xff]  ;;  %v1230_v42 = vmax.f32 %v1138_v6, %v1184_v19  ;;  %v3825_v6 = vpop.permute.xlu0 %1350 }
 0x3df   :  { %v1261_v51 = vld [vmem:[#allocation2 + $0xc6] sm:$0xff]  ;;  %v1106_v4 = vmax.f32 %v1014_v37, %v1060_v17  ;;  %v1168_v20 = vld [vmem:[#allocation2 + $0xbc] sm:$0xff]  ;;  %v1183_v49 = vld [vmem:[#allocation2 + $0x134] sm:$0xff]  ;;  %v1136_v60 = vmax.f32 %v1044_v2, %v1090_v36  ;;  %vm1390_vm8 = vcmp.eq.s32.totalorder %v3823_v33, %v3825_v6  ;;  %vm1388_vm10 = vcmp.eq.s32.totalorder %v3820_v8, %v3825_v6 }
 0x3e0   :  { %v1030_v30 = vld [vmem:[#allocation2 + $0xa0] sm:$0xff]  ;;  %v1307_v52 = vmax.f32 %v1215_v43, %v1261_v51  ;;  %1629 = vmatpush.msrb.mxu1 %v1326_v47  ;;  %1520 = vmatpush.msrb.mxu2 %v1291_v1  ;;  %v1013_v13 = vld [vmem:[#allocation2 + $0x18] sm:$0xff]  ;;  %v1229_v45 = vmax.f32 %v1137_v15, %v1183_v49  ;;  %v1043_v7 = vld [vmem:[#allocation2 + $0x108] sm:$0xff] }
 0x3e1   :  { %v1076_v32 = vld [vmem:[#allocation2 + $0xa2] sm:$0xff]  ;;  %v1198_v22 = vmax.f32 %v1106_v4, %v1152_v53  ;;  %v1105_v59 = vmax.f32 %v1013_v13, %v1059_v14  ;;  %v1029_v61 = vld [vmem:[#allocation2 + $0x98] sm:$0xff]  ;;  %v1089_v21 = vld [vmem:[#allocation2 + $0x10a] sm:$0xff] }
 0x3e2   :  { %v1122_v58 = vmax.f32 %v1030_v30, %v1076_v32  ;;  %v1277_v40 = vld [vmem:[#allocation2 + $0x146] sm:$0xff]  ;;  %1576 = vmatpush.msra.mxu3 %v1307_v52  ;;  %v1244_v5 = vld [vmem:[#allocation2 + $0x3e] sm:$0xff]  ;;  %1630 = vmatpush.msrb.mxu1 %v1325_v46  ;;  %v1151_v28 = vld [vmem:[#allocation2 + $0x34] sm:$0xff]  ;;  %v1135_v25 = vmax.f32 %v1043_v7, %v1089_v21 }
 0x3e3   :  { %v1290_v34 = vmax.f32 %v1198_v22, %v1244_v5  ;;  %v1260_v12 = vld [vmem:[#allocation2 + $0xbe] sm:$0xff]  ;;  %v1323_v31 = vmax.f32 %v1231_v10, %v1277_v40  ;;  %v1275_v26 = vld [vmem:[#allocation2 + $0x136] sm:$0xff]  ;;  %v1182_v0 = vld [vmem:[#allocation2 + $0x12c] sm:$0xff]  ;;  %v1197_v38 = vmax.f32 %v1105_v59, %v1151_v28 }
 0x3e4   :  { %v1214_v48 = vmax.f32 %v1122_v58, %v1168_v20  ;;  %v1075_v50 = vld [vmem:[#allocation2 + $0x9a] sm:$0xff]  ;;  %1631 = vmatpush.msrb.mxu1 %v1324_v39  ;;  %v1012_v55 = vld [vmem:[#allocation2 + $0x10] sm:$0xff]  ;;  %v1228_v62 = vmax.f32 %v1136_v60, %v1182_v0  ;;  %v1181_v37 = vld [vmem:[#allocation2 + $0x124] sm:$0xff]  ;;  %v1321_v63 = vmax.f32 %v1229_v45, %v1275_v26 }
 0x3e5   :  { %v1276_v16 = vld [vmem:[#allocation2 + $0x13e] sm:$0xff]  ;;  %v1121_v41 = vmax.f32 %v1029_v61, %v1075_v50  ;;  %1521 = vmatpush.msrb.mxu2 %v1290_v34  ;;  %v1167_v23 = vld [vmem:[#allocation2 + $0xb4] sm:$0xff]  ;;  %v1150_v43 = vld [vmem:[#allocation2 + $0x2c] sm:$0xff]  ;;  %v1227_v51 = vmax.f32 %v1135_v25, %v1181_v37  ;;  %v3830_v50 = vadd.s32 128, %v3820_v8  ;;  %v1357_v37 = vpop.permute.xlu2 %1356 }
 0x3e6   :  { %v1306_v18 = vmax.f32 %v1214_v48, %v1260_v12  ;;  %v1243_v11 = vld [vmem:[#allocation2 + $0x36] sm:$0xff]  ;;  %1632 = vmatpush.msrb.mxu1 %v1323_v31  ;;  %v1322_v3 = vmax.f32 %v1230_v42, %v1276_v16  ;;  %v1042_v47 = vld [vmem:[#allocation2 + $0x100] sm:$0xff]  ;;  %v1274_v1 = vld [vmem:[#allocation2 + $0x12e] sm:$0xff]  ;;  %v2794_v16 = vmov 0.0   ;;  %vm1396_vm15 = vcmp.eq.s32.totalorder %v3823_v33, %v1357_v37 }
 0x3e7   :  { %v1213_v35 = vmax.f32 %v1121_v41, %v1167_v23  ;;  %v1259_v54 = vld [vmem:[#allocation2 + $0xb6] sm:$0xff]  ;;  %v1289_v9 = vmax.f32 %v1197_v38, %v1243_v11  ;;  %v1088_v44 = vld [vmem:[#allocation2 + $0x102] sm:$0xff]  ;;  %v1166_v30 = vld [vmem:[#allocation2 + $0xac] sm:$0xff]  ;;  %v1320_v46 = vmax.f32 %v1228_v62, %v1274_v1  ;;  %v1429_v45 = vsel %vm1390_vm8, 1.0, %v2794_v16 }
 0x3e8   :  { %1577 = vmatpush.msra.mxu3 %v1306_v18  ;;  %v1058_v27 = vld [vmem:[#allocation2 + $0x12] sm:$0xff]  ;;  %1633 = vmatpush.msrb.mxu1 %v1322_v3  ;;  %v1134_v32 = vmax.f32 %v1042_v47, %v1088_v44  ;;  %v1011_v52 = vld [vmem:[#allocation2 + $0x8] sm:$0xff]  ;;  %v1180_v2 = vld [vmem:[#allocation2 + $0x11c] sm:$0xff]  ;;  %vm1389_vm11 = vcmp.eq.s32.totalorder %v3830_v50, %v3825_v6  ;;  %v2795_v62 = vmov 1.0   ;;  %vm1394_vm0 = vcmp.eq.s32.totalorder %v3820_v8, %v1357_v37 }
 0x3e9   :  { %v1104_v29 = vmax.f32 %v1012_v55, %v1058_v27  ;;  %v1028_v56 = vld [vmem:[#allocation2 + $0x90] sm:$0xff]  ;;  %v1305_v57 = vmax.f32 %v1213_v35, %v1259_v54  ;;  %1522 = vmatpush.msrb.mxu2 %v1289_v9  ;;  %v1273_v15 = vld [vmem:[#allocation2 + $0x126] sm:$0xff]  ;;  %v1272_v34 = vld [vmem:[#allocation2 + $0x11e] sm:$0xff]  ;;  %v1354_v27 = vpop.permute.xlu1 %1353  ;;  %vm1395_vm1 = vcmp.eq.s32.totalorder %v3830_v50, %v1357_v37 }
 0x3ea   :  { %v1074_v24 = vld [vmem:[#allocation2 + $0x92] sm:$0xff]  ;;  %v1057_v36 = vld [vmem:[#allocation2 + $0xa] sm:$0xff]  ;;  %1634 = vmatpush.msrb.mxu1 %v1321_v63  ;;  %v1226_v22 = vmax.f32 %v1134_v32, %v1180_v2  ;;  %v1010_v48 = vld [vmem:[#allocation2] sm:$0xff]  ;;  %v1319_v42 = vmax.f32 %v1227_v51, %v1273_v15  ;;  %vm1393_vm12 = vcmp.eq.s32.totalorder %v3823_v33, %v1354_v27  ;;  %vm1391_vm13 = vcmp.eq.s32.totalorder %v3820_v8, %v1354_v27 }
 0x3eb   :  { %v1120_v17 = vmax.f32 %v1028_v56, %v1074_v24  ;;  %v1196_v4 = vmax.f32 %v1104_v29, %v1150_v43  ;;  %1578 = vmatpush.msra.mxu3 %v1305_v57  ;;  %v1242_v53 = vld [vmem:[#allocation2 + $0x2e] sm:$0xff]  ;;  %v1103_v20 = vmax.f32 %v1011_v52, %v1057_v36  ;;  %v1149_v49 = vld [vmem:[#allocation2 + $0x24] sm:$0xff]  ;;  %v1148_v41 = vld [vmem:[#allocation2 + $0x1c] sm:$0xff]  ;;  %v1432_v9 = vsel %vm1393_vm12, 1.0, %v2794_v16  ;;  %v1366_v43 = vpop.permute.xlu0 %1365 }
 0x3ec   :  { %v1258_v19 = vld [vmem:[#allocation2 + $0xae] sm:$0xff]  ;;  %v1056_v14 = vld [vmem:[#allocation2 + $0x2] sm:$0xff]  ;;  %1635 = vmatpush.msrb.mxu1 %v1320_v46  ;;  %v1318_v21 = vmax.f32 %v1226_v22, %v1272_v34  ;;  %vm1392_vm14 = vcmp.eq.s32.totalorder %v3830_v50, %v1354_v27  ;;  %v1435_v29 = vsel %vm1396_vm15, 1.0, %v2794_v16  ;;  %vm1403_vm12 = vcmp.eq.s32.totalorder %v3820_v8, %v1366_v43 }
 0x3ed   :  { %v1212_v58 = vmax.f32 %v1120_v17, %v1166_v30  ;;  %v1288_v10 = vmax.f32 %v1196_v4, %v1242_v53  ;;  %v1027_v13 = vld [vmem:[#allocation2 + $0x88] sm:$0xff]  ;;  %v1195_v12 = vmax.f32 %v1103_v20, %v1149_v49  ;;  %v1102_v59 = vmax.f32 %v1010_v48, %v1056_v14  ;;  %v1026_v61 = vld [vmem:[#allocation2 + $0x80] sm:$0xff]  ;;  %v1363_v63 = vpop.permute.xlu2 %1362 }
 0x3ee   :  { %v1073_v39 = vld [vmem:[#allocation2 + $0x8a] sm:$0xff]  ;;  %v1072_v7 = vld [vmem:[#allocation2 + $0x82] sm:$0xff]  ;;  %1636 = vmatpush.msrb.mxu1 %v1319_v42  ;;  %vm1402_vm6 = vcmp.eq.s32.totalorder %v3823_v33, %v1363_v63  ;;  %vm1400_vm8 = vcmp.eq.s32.totalorder %v3820_v8, %v1363_v63 }
 0x3ef   :  { %v1304_v40 = vmax.f32 %v1212_v58, %v1258_v19  ;;  %v1119_v5 = vmax.f32 %v1027_v13, %v1073_v39  ;;  %1523 = vmatpush.msrb.mxu2 %v1288_v10  ;;  %v1165_v60 = vld [vmem:[#allocation2 + $0xa4] sm:$0xff]  ;;  %v1194_v0 = vmax.f32 %v1102_v59, %v1148_v41  ;;  %v1118_v38 = vmax.f32 %v1026_v61, %v1072_v7  ;;  %v1164_v55 = vld [vmem:[#allocation2 + $0x9c] sm:$0xff] }
 0x3f0   :  { %v1241_v18 = vld [vmem:[#allocation2 + $0x26] sm:$0xff]  ;;  %v1240_v25 = vld [vmem:[#allocation2 + $0x1e] sm:$0xff]  ;;  %1637 = vmatpush.msrb.mxu1 %v1318_v21  ;;  %v1441_v57 = vsel %vm1402_vm6, 1.0, %v2794_v16 }
 0x3f1   :  { %1579 = vmatpush.msra.mxu3 %v1304_v40  ;;  %v1211_v28 = vmax.f32 %v1119_v5, %v1165_v60  ;;  %v1287_v31 = vmax.f32 %v1195_v12, %v1241_v18  ;;  %v1257_v26 = vld [vmem:[#allocation2 + $0xa6] sm:$0xff]  ;;  %v1286_v11 = vmax.f32 %v1194_v0, %v1240_v25  ;;  %v1210_v35 = vmax.f32 %v1118_v38, %v1164_v55  ;;  %v1256_v54 = vld [vmem:[#allocation2 + $0x9e] sm:$0xff]  ;;  %v1360_v56 = vpop.permute.xlu1 %1359 }
 0x3f2   :  { %2561 = vmatmul.msk.f32.vlgmr.msrb.gmra.mxu1 %vm1466_vm9, %v1429_v45  ;;  %vm1399_vm3 = vcmp.eq.s32.totalorder %v3823_v33, %v1360_v56  ;;  %vm1397_vm4 = vcmp.eq.s32.totalorder %v3820_v8, %v1360_v56  ;;  %vm1398_vm5 = vcmp.eq.s32.totalorder %v3830_v50, %v1360_v56 }
 0x3f3   :  { %v1303_v23 = vmax.f32 %v1211_v28, %v1257_v26  ;;  %1524 = vmatpush.msrb.mxu2 %v1287_v31  ;;  %v1302_v3 = vmax.f32 %v1210_v35, %v1256_v54  ;;  %v1438_v24 = vsel %vm1399_vm3, 1.0, %v2794_v16  ;;  %v1375_v51 = vpop.permute.xlu0 %1374 }
 0x3f4   :  { %vm1412_vm6 = vcmp.eq.s32.totalorder %v3820_v8, %v1375_v51 }
 0x3f5   :  { %1580 = vmatpush.msra.mxu3 %v1303_v23  ;;  %1525 = vmatpush.msrb.mxu2 %v1286_v11  ;;  %v1372_v6 = vpop.permute.xlu2 %1371 }
 0x3f6   :  { %2534 = vmatmul.msk.f32.vlgmr.msrb.gmra.mxu2 %vm1388_vm10, %v2795_v62  ;;  %vm1401_vm10 = vcmp.eq.s32.totalorder %v3830_v50, %v1363_v63  ;;  %vm1409_vm3 = vcmp.eq.s32.totalorder %v3820_v8, %v1372_v6 }
 0x3f7   :  { %1581 = vmatpush.msra.mxu3 %v1302_v3 }
 0x3f8   :  { %2547 = vmatmul.msk.f32.vlgmr.msra.gmra.mxu3 %vm1389_vm11, %v2795_v62  ;;  %vm1405_vm11 = vcmp.eq.s32.totalorder %v3823_v33, %v1366_v43 }
 0x3f9   :  { %v1444_v17 = vsel %vm1405_vm11, 1.0, %v2794_v16  ;;  %v1369_v47 = vpop.permute.xlu1 %1368 }
 0x3fa   :  { %2562 = vmatmul.msk.f32.gmra.mxu1 %vm1466_vm9, %v1432_v9  ;;  %vm1406_vm15 = vcmp.eq.s32.totalorder %v3820_v8, %v1369_v47 }
 0x3fb   :  { %v1384_v53 = vpop.permute.xlu0 %1383 }
 0x3fd   :  { %v1381_v52 = vpop.permute.xlu2 %1380 }
 0x3fe   :  { %2535 = vmatmul.msk.f32.gmra.mxu2 %vm1391_vm13, %v2795_v62  ;;  %vm1404_vm13 = vcmp.eq.s32.totalorder %v3830_v50, %v1366_v43 }
 0x400   :  { %2548 = vmatmul.msk.f32.gmra.mxu3 %vm1392_vm14, %v2795_v62  ;;  %vm1408_vm14 = vcmp.eq.s32.totalorder %v3823_v33, %v1369_v47 }
 0x401   :  { %v1447_v44 = vsel %vm1408_vm14, 1.0, %v2794_v16  ;;  %v1378_v30 = vpop.permute.xlu1 %1377  ;;  %vm1418_vm14 = vcmp.eq.s32.totalorder %v3820_v8, %v1381_v52 }
 0x402   :  { %2563 = vmatmul.msk.f32.gmra.mxu1 %vm1466_vm9, %v1435_v29  ;;  %vm1415_vm11 = vcmp.eq.s32.totalorder %v3820_v8, %v1378_v30 }
 0x406   :  { %2536 = vmatmul.msk.f32.gmra.mxu2 %vm1394_vm0, %v2795_v62  ;;  %vm1407_vm0 = vcmp.eq.s32.totalorder %v3830_v50, %v1369_v47 }
 0x408   :  { %2549 = vmatmul.msk.f32.gmra.mxu3 %vm1395_vm1, %v2795_v62  ;;  %vm1411_vm1 = vcmp.eq.s32.totalorder %v3823_v33, %v1372_v6 }
 0x409   :  { %v1450_v1 = vsel %vm1411_vm1, 1.0, %v2794_v16  ;;  %v1387_v2 = vpop.permute.xlu1 %1386  ;;  %vm1421_vm1 = vcmp.eq.s32.totalorder %v3820_v8, %v1384_v53 }
 0x40a   :  { %2564 = vmatmul.msk.f32.gmra.mxu1 %vm1466_vm9, %v1438_v24 }
 0x40e   :  { %2537 = vmatmul.msk.f32.gmra.mxu2 %vm1397_vm4, %v2795_v62  ;;  %vm1410_vm4 = vcmp.eq.s32.totalorder %v3830_v50, %v1372_v6 }
 0x410   :  { %2550 = vmatmul.msk.f32.gmra.mxu3 %vm1398_vm5, %v2795_v62  ;;  %vm1414_vm5 = vcmp.eq.s32.totalorder %v3823_v33, %v1375_v51 }
 0x411   :  { %v1453_v4 = vsel %vm1414_vm5, 1.0, %v2794_v16  ;;  %vm1424_vm5 = vcmp.eq.s32.totalorder %v3820_v8, %v1387_v2 }
 0x412   :  { %2565 = vmatmul.msk.f32.gmra.mxu1 %vm1466_vm9, %v1441_v57 }
 0x416   :  { %2538 = vmatmul.msk.f32.gmra.mxu2 %vm1400_vm8, %v2795_v62  ;;  %vm1413_vm8 = vcmp.eq.s32.totalorder %v3830_v50, %v1375_v51 }
 0x418   :  { %2551 = vmatmul.msk.f32.gmra.mxu3 %vm1401_vm10, %v2795_v62  ;;  %vm1417_vm10 = vcmp.eq.s32.totalorder %v3823_v33, %v1378_v30 }
 0x419   :  { %v1456_v32 = vsel %vm1417_vm10, 1.0, %v2794_v16  ;;  %vm2018_vm10 = vcmask 97280  }
 0x41a   :  { %2566 = vmatmul.msk.f32.gmra.mxu1 %vm1466_vm9, %v1444_v17 }
 0x41e   :  { %2539 = vmatmul.msk.f32.gmra.mxu2 %vm1403_vm12, %v2795_v62  ;;  %vm1416_vm12 = vcmp.eq.s32.totalorder %v3830_v50, %v1378_v30 }
 0x420   :  { %2552 = vmatmul.msk.f32.gmra.mxu3 %vm1404_vm13, %v2795_v62  ;;  %vm1420_vm13 = vcmp.eq.s32.totalorder %v3823_v33, %v1381_v52 }
 0x421   :  { %v1459_v15 = vsel %vm1420_vm13, 1.0, %v2794_v16  ;;  %vm2048_vm13 = vcmask 244736  }
 0x422   :  { %2567 = vmatmul.msk.f32.gmra.mxu1 %vm1466_vm9, %v1447_v44 }
 0x426   :  { %2540 = vmatmul.msk.f32.gmra.mxu2 %vm1406_vm15, %v2795_v62  ;;  %vm1419_vm15 = vcmp.eq.s32.totalorder %v3830_v50, %v1381_v52 }
 0x428   :  { %2553 = vmatmul.msk.f32.gmra.mxu3 %vm1407_vm0, %v2795_v62  ;;  %vm1423_vm0 = vcmp.eq.s32.totalorder %v3823_v33, %v1384_v53 }
 0x429   :  { %v1462_v58 = vsel %vm1423_vm0, 1.0, %v2794_v16  ;;  %vm2078_vm0 = vcmask 392192  }
 0x42a   :  { %2568 = vmatmul.msk.f32.gmra.mxu1 %vm1466_vm9, %v1450_v1 }
 0x42e   :  { %2541 = vmatmul.msk.f32.gmra.mxu2 %vm1409_vm3, %v2795_v62  ;;  %vm1422_vm3 = vcmp.eq.s32.totalorder %v3830_v50, %v1384_v53 }
 0x430   :  { %2554 = vmatmul.msk.f32.gmra.mxu3 %vm1410_vm4, %v2795_v62  ;;  %vm1426_vm4 = vcmp.eq.s32.totalorder %v3823_v33, %v1387_v2 }
 0x431   :  { %v1465_v36 = vsel %vm1426_vm4, 1.0, %v2794_v16 }
 0x432   :  { %2569 = vmatmul.msk.f32.gmra.mxu1 %vm1466_vm9, %v1453_v4 }
 0x436   :  { %2542 = vmatmul.msk.f32.gmra.mxu2 %vm1412_vm6, %v2795_v62  ;;  %vm1425_vm6 = vcmp.eq.s32.totalorder %v3830_v50, %v1387_v2 }
 0x438   :  { %2555 = vmatmul.msk.f32.gmra.mxu3 %vm1413_vm8, %v2795_v62  ;;  %vm2124_vm8 = vcmask 1045504  }
 0x43a   :  { %2570 = vmatmul.msk.f32.gmra.mxu1 %vm1466_vm9, %v1456_v32 }
 0x43e   :  { %2543 = vmatmul.msk.f32.gmra.mxu2 %vm1415_vm11, %v2795_v62  ;;  %vm2028_vm11 = vcmask 146432  }
 0x440   :  { %2556 = vmatmul.msk.f32.gmra.mxu3 %vm1416_vm12, %v2795_v62  ;;  %vm2038_vm12 = vcmask 195584  }
 0x442   :  { %2571 = vmatmul.msk.f32.gmra.mxu1 %vm1466_vm9, %v1459_v15 }
 0x446   :  { %2544 = vmatmul.msk.f32.gmra.mxu2 %vm1418_vm14, %v2795_v62  ;;  %vm2058_vm14 = vcmask 293888  }
 0x448   :  { %2557 = vmatmul.msk.f32.gmra.mxu3 %vm1419_vm15, %v2795_v62  ;;  %vm2068_vm15 = vcmask 343040  }
 0x44a   :  { %2572 = vmatmul.msk.f32.gmra.mxu1 %vm1466_vm9, %v1462_v58 }
 0x44e   :  { %2545 = vmatmul.msk.f32.gmra.mxu2 %vm1421_vm1, %v2795_v62  ;;  %vm2096_vm1 = vcmask 441344  }
 0x450   :  { %2558 = vmatmul.msk.f32.gmra.mxu3 %vm1422_vm3, %v2795_v62 }
 0x452   :  { %2573 = vmatmul.msk.f32.gmra.mxu1 %vm1466_vm9, %v1465_v36  ;;  %vm1690_vm9 = vcmask 41984  }
 0x456   :  { %2546 = vmatmul.msk.f32.gmra.mxu2 %vm1424_vm5, %v2795_v62 }
 0x458   :  { %2559 = vmatmul.msk.f32.gmra.mxu3 %vm1425_vm6, %v2795_v62  ;;  %vm2367_vm6 = vcmask 261120  }
 0x46f   :  { %v1639_v46 = vpop.f32.mrf.mxu1 }
 0x477   :  { %v1642_v10 = vpop.f32.mrf.mxu1 }
 0x479   :  { %v1527_v19 = vpop.f32.mrf.mxu2 }
 0x47b   :  { %v1583_v22 = vpop.f32.mrf.mxu3 }
 0x47c   :  { %v1584_v20 = vadd.f32 %v1583_v22, %v1527_v19 }
 0x47e   :  { %v1640_v33 = vadd.f32 %v1639_v46, %v1584_v20 }
 0x47f   :  { %v1645_v13 = vpop.f32.mrf.mxu1 }
 0x480   :  { %1678 = vst.msk [vmem:[#allocation3] sm:$0xff] %vm695_vm2, %v1640_v33 }
 0x481   :  { %v1530_v39 = vpop.f32.mrf.mxu2 }
 0x483   :  { %v1586_v40 = vpop.f32.mrf.mxu3 }
 0x484   :  { %v1587_v49 = vadd.f32 %v1586_v40, %v1530_v39 }
 0x486   :  { %v1643_v5 = vadd.f32 %v1642_v10, %v1587_v49 }
 0x487   :  { %v1648_v8 = vpop.f32.mrf.mxu1 }
 0x488   :  { %1679 = vst.msk [vmem:[#allocation3 + $0x8] sm:$0xff] %vm695_vm2, %v1643_v5 }
 0x489   :  { %v1533_v48 = vpop.f32.mrf.mxu2 }
 0x48b   :  { %v1589_v14 = vpop.f32.mrf.mxu3 }
 0x48c   :  { %v1590_v42 = vadd.f32 %v1589_v14, %v1533_v48 }
 0x48e   :  { %v1646_v34 = vadd.f32 %v1645_v13, %v1590_v42 }
 0x48f   :  { %v1710_v12 = vld [vmem:[#allocation3 + $0x4] sm:$0xff]  ;;  %v1651_v59 = vpop.f32.mrf.mxu1 }
 0x490   :  { %v1701_v60 = vld [vmem:[#allocation3 + $0x2] sm:$0xff]  ;;  %1680 = vst.msk [vmem:[#allocation3 + $0x10] sm:$0xff] %vm695_vm2, %v1646_v34  ;;  %1789 = vrot.lane.b32.xlu0 %v1710_v12, %s2796_s6 }
 0x491   :  { %1753 = vrot.lane.b32.xlu2 %v1701_v60, %s2790_s15  ;;  %v1536_v61 = vpop.f32.mrf.mxu2 }
 0x493   :  { %v1592_v50 = vpop.f32.mrf.mxu3 }
 0x494   :  { %v1593_v16 = vadd.f32 %v1592_v50, %v1536_v61 }
 0x496   :  { %v1649_v45 = vadd.f32 %v1648_v8, %v1593_v16 }
 0x497   :  { %v1719_v18 = vld [vmem:[#allocation3 + $0xe] sm:$0xff]  ;;  %v1654_v41 = vpop.f32.mrf.mxu1 }
 0x498   :  { %v3932_v28 = vld [vmem:[#allocation3 + $0x10] sm:$0xff]  ;;  %1681 = vst.msk [vmem:[#allocation3 + $0x18] sm:$0xff] %vm695_vm2, %v1649_v45  ;;  %1825 = vrot.lane.b32.xlu1 %v1719_v18, %s2797_s24 }
 0x499   :  { %1861 = vrot.lane.b32.xlu2 %v3932_v28, %s2798_s25  ;;  %v1539_v7 = vpop.f32.mrf.mxu2  ;;  %v1702_v0 = vld [vmem:[#allocation3 + $0xa] sm:$0xff] }
 0x49a   :  { %v1711_v38 = vld [vmem:[#allocation3 + $0xc] sm:$0xff] }
 0x49b   :  { %v1595_v21 = vpop.f32.mrf.mxu3 }
 0x49c   :  { %v1596_v31 = vadd.f32 %v1595_v21, %v1539_v7 }
 0x49e   :  { %v1652_v26 = vadd.f32 %v1651_v59, %v1596_v31 }
 0x49f   :  { %v1703_v23 = vld [vmem:[#allocation3 + $0x12] sm:$0xff]  ;;  %v1657_v25 = vpop.f32.mrf.mxu1 }
 0x4a0   :  { %1682 = vst.msk [vmem:[#allocation3 + $0x20] sm:$0xff] %vm695_vm2, %v1652_v26  ;;  %1755 = vrot.lane.b32.xlu1 %v1702_v0, %s2790_s15  ;;  %1891 = vrot.lane.b32.xlu0 %v1703_v23, %s2799_s26  ;;  %v3942_v27 = vld [vmem:[#allocation3 + $0x18] sm:$0xff] }
 0x4a1   :  { %1791 = vrot.lane.b32.xlu2 %v1711_v38, %s2796_s6  ;;  %v1542_v55 = vpop.f32.mrf.mxu2  ;;  %v1720_v62 = vld [vmem:[#allocation3 + $0x16] sm:$0xff] }
 0x4a2   :  { %v1712_v63 = vld [vmem:[#allocation3 + $0x14] sm:$0xff] }
 0x4a3   :  { %v1598_v11 = vpop.f32.mrf.mxu3 }
 0x4a4   :  { %v1599_v35 = vadd.f32 %v1598_v11, %v1542_v55  ;;  %v2093_v55 = vld [vmem:[%s4336_s2 + $0x28] sm:$0xff]  ;;  %v2092_v11 = vld [vmem:[%s4336_s2 + $0x20] sm:$0xff] }
 0x4a6   :  { %v1655_v54 = vadd.f32 %v1654_v41, %v1599_v35 }
 0x4a7   :  { %v1721_v3 = vld [vmem:[#allocation3 + $0x1e] sm:$0xff]  ;;  %v1660_v37 = vpop.f32.mrf.mxu1 }
 0x4a8   :  { %1683 = vst.msk [vmem:[#allocation3 + $0x28] sm:$0xff] %vm695_vm2, %v1655_v54  ;;  %1863 = vrot.lane.b32.xlu1 %v3942_v27, %s2798_s25  ;;  %1827 = vrot.lane.b32.xlu0 %v1720_v62, %s2797_s24  ;;  %v1704_v57 = vld [vmem:[#allocation3 + $0x1a] sm:$0xff] }
 0x4a9   :  { %1952 = vrot.lane.b32.xlu2 %v1721_v3, %s2800_s27  ;;  %v1545_v9 = vpop.f32.mrf.mxu2  ;;  %v1713_v1 = vld [vmem:[#allocation3 + $0x1c] sm:$0xff] }
 0x4aa   :  { %v3956_v51 = vld [vmem:[#allocation3 + $0x20] sm:$0xff] }
 0x4ab   :  { %v1601_v29 = vpop.f32.mrf.mxu3 }
 0x4ac   :  { %v1602_v56 = vadd.f32 %v1601_v29, %v1545_v9 }
 0x4ae   :  { %v1658_v24 = vadd.f32 %v1657_v25, %v1602_v56  ;;  %v2089_v56 = vld [vmem:[%s4336_s2 + $0x8] sm:$0xff] }
 0x4af   :  { %v1663_v44 = vpop.f32.mrf.mxu1  ;;  %v1722_v53 = vld [vmem:[#allocation3 + $0x26] sm:$0xff] }
 0x4b0   :  { %1684 = vst.msk [vmem:[#allocation3 + $0x30] sm:$0xff] %vm695_vm2, %v1658_v24  ;;  %1793 = vrot.lane.b32.xlu1 %v1712_v63, %s2796_s6  ;;  %1757 = vrot.lane.b32.xlu0 %v1703_v23, %s2790_s15  ;;  %v1705_v10 = vld [vmem:[#allocation3 + $0x22] sm:$0xff]  ;;  %v2088_v24 = vld [vmem:[%s4336_s2] sm:$0xff] }
 0x4b1   :  { %1893 = vrot.lane.b32.xlu2 %v1704_v57, %s2799_s26  ;;  %v1548_v43 = vpop.f32.mrf.mxu2  ;;  %v3965_v19 = vld [vmem:[#allocation3 + $0x28] sm:$0xff] }
 0x4b2   :  { %v1714_v40 = vld [vmem:[#allocation3 + $0x24] sm:$0xff] }
 0x4b3   :  { %v1604_v17 = vpop.f32.mrf.mxu3  ;;  %v2094_v23 = vld [vmem:[%s4336_s2 + $0x30] sm:$0x3f] }
 0x4b4   :  { %v1605_v47 = vadd.f32 %v1604_v17, %v1548_v43  ;;  %2574 = vmatpush.msk.msra.mxu2 %vm2124_vm8, %v2094_v23  ;;  %vm2441_vm8 = vcmask 74752  }
 0x4b6   :  { %v1661_v6 = vadd.f32 %v1660_v37, %v1605_v47  ;;  %2138 = vmatpush.msra.mxu2 %v2093_v55  ;;  %v2090_v37 = vld [vmem:[%s4336_s2 + $0x10] sm:$0xff] }
 0x4b7   :  { %v1666_v15 = vpop.f32.mrf.mxu1  ;;  %v1723_v42 = vld [vmem:[#allocation3 + $0x2e] sm:$0xff] }
 0x4b8   :  { %1685 = vst.msk [vmem:[#allocation3 + $0x38] sm:$0xff] %vm695_vm2, %v1661_v6  ;;  %1922 = vrot.lane.b32.xlu1 %v1713_v1, %s2801_s28  ;;  %1982 = vrot.lane.b32.xlu0 %v3956_v51, %s2802_s29  ;;  %v1715_v50 = vld [vmem:[#allocation3 + $0x2c] sm:$0xff] }
 0x4b9   :  { %1829 = vrot.lane.b32.xlu2 %v1721_v3, %s2797_s24  ;;  %v1551_v4 = vpop.f32.mrf.mxu2  ;;  %v3981_v16 = vld [vmem:[#allocation3 + $0x30] sm:$0xff]  ;;  %2139 = vmatpush.msra.mxu2 %v2092_v11 }
 0x4ba   :  { %v1706_v45 = vld [vmem:[#allocation3 + $0x2a] sm:$0xff] }
 0x4bb   :  { %v1607_v30 = vpop.f32.mrf.mxu3  ;;  %v2091_v3 = vld [vmem:[%s4336_s2 + $0x18] sm:$0xff] }
 0x4bc   :  { %v1608_v32 = vadd.f32 %v1607_v30, %v1551_v4  ;;  %2140 = vmatpush.msra.mxu2 %v2091_v3 }
 0x4be   :  { %v1664_v52 = vadd.f32 %v1663_v44, %v1608_v32  ;;  %2141 = vmatpush.msra.mxu2 %v2090_v37 }
 0x4bf   :  { %v1669_v22 = vpop.f32.mrf.mxu1  ;;  %v1724_v18 = vld [vmem:[#allocation3 + $0x36] sm:$0xff] }
 0x4c0   :  { %1686 = vst.msk [vmem:[#allocation3 + $0x40] sm:$0xff] %vm695_vm2, %v1664_v52  ;;  %1954 = vrot.lane.b32.xlu1 %v1722_v53, %s2800_s27  ;;  %1865 = vrot.lane.b32.xlu0 %v3956_v51, %s2798_s25  ;;  %v1707_v7 = vld [vmem:[#allocation3 + $0x32] sm:$0xff] }
 0x4c1   :  { %1759 = vrot.lane.b32.xlu2 %v1704_v57, %s2790_s15  ;;  %v1554_v58 = vpop.f32.mrf.mxu2  ;;  %v1716_v31 = vld [vmem:[#allocation3 + $0x34] sm:$0xff]  ;;  %2142 = vmatpush.msra.mxu2 %v2089_v56 }
 0x4c2   :  { %v4000_v26 = vld [vmem:[#allocation3 + $0x38] sm:$0xff] }
 0x4c3   :  { %v1610_v2 = vpop.f32.mrf.mxu3  ;;  %2143 = vmatpush.msra.mxu2 %v2088_v24 }
 0x4c4   :  { %v1611_v36 = vadd.f32 %v1610_v2, %v1554_v58 }
 0x4c6   :  { %v1667_v46 = vadd.f32 %v1666_v15, %v1611_v36 }
 0x4c7   :  { %v1672_v5 = vpop.f32.mrf.mxu1  ;;  %v1725_v38 = vld [vmem:[#allocation3 + $0x3e] sm:$0xff] }
 0x4c8   :  { %1687 = vst.msk [vmem:[#allocation3 + $0x48] sm:$0xff] %vm695_vm2, %v1667_v46  ;;  %1895 = vrot.lane.b32.xlu1 %v1705_v10, %s2799_s26  ;;  %1795 = vrot.lane.b32.xlu0 %v1713_v1, %s2796_s6  ;;  %v1728_v35 = vld [vmem:[#allocation3 + $0x40] sm:$0xff] }
 0x4c9   :  { %1984 = vrot.lane.b32.xlu2 %v3965_v19, %s2802_s29  ;;  %v1557_v20 = vpop.f32.mrf.mxu2  ;;  %v1708_v54 = vld [vmem:[#allocation3 + $0x3a] sm:$0xff]  ;;  %v1709_v47 = vld [vmem:[#allocation3 + $0x42] sm:$0x3]  ;;  %v1718_v4 = vld [vmem:[#allocation3 + $0x44] sm:$0x3] }
 0x4ca   :  { %v1717_v63 = vld [vmem:[#allocation3 + $0x3c] sm:$0xff] }
 0x4cb   :  { %v1613_v33 = vpop.f32.mrf.mxu3 }
 0x4cc   :  { %v1614_v13 = vadd.f32 %v1613_v33, %v1557_v20 }
 0x4ce   :  { %v1670_v39 = vadd.f32 %v1669_v22, %v1614_v13 }
 0x4cf   :  { %v1675_v59 = vpop.f32.mrf.mxu1  ;;  %v1734_v30 = vld [vmem:[#allocation3 + $0x44] sm:$0xff]  ;;  %v1727_v22 = vld [vmem:[#allocation3 + $0x4e] sm:$0x3] }
 0x4d0   :  { %1688 = vst.msk [vmem:[#allocation3 + $0x50] sm:$0xff] %vm695_vm2, %v1670_v39  ;;  %1831 = vrot.lane.b32.xlu1 %v1722_v53, %s2797_s24  ;;  %1924 = vrot.lane.b32.xlu0 %v1714_v40, %s2801_s28  ;;  %v1726_v32 = vld [vmem:[#allocation3 + $0x46] sm:$0xff] }
 0x4d1   :  { %1867 = vrot.lane.b32.xlu2 %v3965_v19, %s2798_s25  ;;  %v1560_v49 = vpop.f32.mrf.mxu2  ;;  %v1692_v53 = vld [vmem:[#allocation3] sm:$0xff] }
 0x4d2   :  { %v1731_v20 = vld [vmem:[#allocation3 + $0x42] sm:$0xff] }
 0x4d3   :  { %v1616_v8 = vpop.f32.mrf.mxu3 }
 0x4d4   :  { %v1617_v48 = vadd.f32 %v1616_v8, %v1560_v49 }
 0x4d6   :  { %v1673_v14 = vadd.f32 %v1672_v5, %v1617_v48 }
 0x4d7   :  { %v1733_v56 = vld [vmem:[#allocation3 + $0x52] sm:$0x3] }
 0x4d8   :  { %1689 = vst.msk [vmem:[#allocation3 + $0x58] sm:$0xff] %vm695_vm2, %v1673_v14  ;;  %1761 = vrot.lane.b32.xlu1 %v1705_v10, %s2790_s15  ;;  %1956 = vrot.lane.b32.xlu0 %v1723_v42, %s2800_s27  ;;  %v1729_v10 = vld [vmem:[#allocation3 + $0x48] sm:$0xff] }
 0x4d9   :  { %1797 = vrot.lane.b32.xlu2 %v1714_v40, %s2796_s6  ;;  %v1563_v34 = vpop.f32.mrf.mxu2  ;;  %v1738_v14 = vld [vmem:[#allocation3 + $0x4e] sm:$0xff] }
 0x4db   :  { %v1619_v12 = vpop.f32.mrf.mxu3 }
 0x4dc   :  { %v1620_v60 = vadd.f32 %v1619_v12, %v1563_v34 }
 0x4de   :  { %v1676_v61 = vadd.f32 %v1675_v59, %v1620_v60  ;;  %v1735_v60 = vld [vmem:[#allocation3 + $0x4c] sm:$0xff] }
 0x4df   :  { %v1732_v59 = vld [vmem:[#allocation3 + $0x4a] sm:$0xff]  ;;  %v1739_v23 = vld [vmem:[#allocation3 + $0x56] sm:$0xff] }
 0x4e0   :  { %1691 = vst.msk [vmem:[#allocation3 + $0x60] sm:$0x3] %vm1690_vm9, %v1676_v61  ;;  %1986 = vrot.lane.b32.xlu1 %v3981_v16, %s2802_s29  ;;  %1897 = vrot.lane.b32.xlu0 %v1706_v45, %s2799_s26  ;;  %v1693_v61 = vld [vmem:[#allocation3 + $0x8] sm:$0xff]  ;;  %v1736_v55 = vld [vmem:[#allocation3 + $0x54] sm:$0xff]  ;;  %v1737_v24 = vld [vmem:[#allocation3 + $0x5c] sm:$0x3] }
 0x4e1   :  { %1926 = vrot.lane.b32.xlu2 %v1715_v50, %s2801_s28  ;;  %vm2379_vm9 = vcmask 523264  }
 0x4e8   :  { %1869 = vrot.lane.b32.xlu1 %v3981_v16, %s2798_s25  ;;  %1833 = vrot.lane.b32.xlu0 %v1723_v42, %s2797_s24 }
 0x4e9   :  { %1958 = vrot.lane.b32.xlu2 %v1724_v18, %s2800_s27 }
 0x4eb   :  { %v3991_v41 = vpop.permute.xlu2 %1753 }
 0x4ec   :  { %v2009_v2 = vsel %vm695_vm2, %v1692_v53, %v3991_v41 }
 0x4f0   :  { %1799 = vrot.lane.b32.xlu1 %v1715_v50, %s2796_s6  ;;  %1763 = vrot.lane.b32.xlu0 %v1706_v45, %s2790_s15  ;;  %v1741_v50 = vld [vmem:[#allocation3 + $0x50] sm:$0xff] }
 0x4f1   :  { %1899 = vrot.lane.b32.xlu2 %v1707_v7, %s2799_s26 }
 0x4f3   :  { %v3996_v21 = vpop.permute.xlu2 %1861 }
 0x4f8   :  { %1928 = vrot.lane.b32.xlu1 %v1716_v31, %s2801_s28  ;;  %1988 = vrot.lane.b32.xlu0 %v4000_v26, %s2802_s29 }
 0x4f9   :  { %1835 = vrot.lane.b32.xlu2 %v1724_v18, %s2797_s24 }
 0x4fb   :  { %v4004_v0 = vpop.permute.xlu2 %1791 }
 0x500   :  { %1960 = vrot.lane.b32.xlu1 %v1725_v38, %s2800_s27  ;;  %1871 = vrot.lane.b32.xlu0 %v4000_v26, %s2798_s25 }
 0x501   :  { %1765 = vrot.lane.b32.xlu2 %v1707_v7, %s2790_s15 }
 0x502   :  { %v1790_v29 = vpop.permute.xlu0 %1789 }
 0x503   :  { %v4013_v25 = vpop.permute.xlu2 %1952  ;;  %v2019_v36 = vsel %vm2018_vm10, %v2009_v2, %v1790_v29 }
 0x508   :  { %1901 = vrot.lane.b32.xlu1 %v1708_v54, %s2799_s26  ;;  %1801 = vrot.lane.b32.xlu0 %v1716_v31, %s2796_s6 }
 0x509   :  { %1990 = vrot.lane.b32.xlu2 %v1728_v35, %s2802_s29 }
 0x50a   :  { %v1826_v9 = vpop.permute.xlu1 %1825 }
 0x50b   :  { %v4027_v62 = vpop.permute.xlu2 %1893  ;;  %v2029_v46 = vsel %vm2028_vm11, %v2019_v36, %v1826_v9 }
 0x50c   :  { %v2039_v33 = vsel %vm2038_vm12, %v2029_v46, %v3996_v21 }
 0x510   :  { %1837 = vrot.lane.b32.xlu1 %v1725_v38, %s2797_s24  ;;  %1930 = vrot.lane.b32.xlu0 %v1717_v63, %s2801_s28  ;;  %v1742_v38 = vld [vmem:[#allocation3 + $0x58] sm:$0xff] }
 0x511   :  { %1873 = vrot.lane.b32.xlu2 %v1728_v35, %s2798_s25 }
 0x512   :  { %v1756_v43 = vpop.permute.xlu1 %1755  ;;  %v1892_v17 = vpop.permute.xlu0 %1891 }
 0x513   :  { %v4041_v57 = vpop.permute.xlu2 %1829  ;;  %v2049_v13 = vsel %vm2048_vm13, %v2039_v33, %v1892_v17  ;;  %v2010_v45 = vsel %vm695_vm2, %v1693_v61, %v1756_v43 }
 0x514   :  { %v2020_v7 = vsel %vm2018_vm10, %v2010_v45, %v4004_v0 }
 0x518   :  { %1767 = vrot.lane.b32.xlu1 %v1708_v54, %s2790_s15  ;;  %1769 = vrot.lane.b32.xlu0 %v1709_v47, %s2790_s15  ;;  %s2474_s15 = sshll.u32 %s4342_s8, 4  ;;  %s2475_s15 = int_to_ptr.hbm [resolvable:$true] %s2474_s15 }
 0x519   :  { %1803 = vrot.lane.b32.xlu2 %v1717_v63, %s2796_s6 }
 0x51a   :  { %v1864_v6 = vpop.permute.xlu1 %1863  ;;  %v1828_v1 = vpop.permute.xlu0 %1827 }
 0x51b   :  { %v4046_v44 = vpop.permute.xlu2 %1759  ;;  %v2030_v21 = vsel %vm2028_vm11, %v2020_v7, %v1828_v1  ;;  %v1743_v1 = vld [vmem:[#allocation3 + $0x60] sm:$0x3] }
 0x520   :  { %1805 = vrot.lane.b32.xlu1 %v1718_v4, %s2796_s6  ;;  %1962 = vrot.lane.b32.xlu0 %v1726_v32, %s2800_s27  ;;  %v1740_v4 = vld [vmem:[#allocation3 + $0x5e] sm:$0x3] }
 0x521   :  { %1932 = vrot.lane.b32.xlu2 %v1734_v30, %s2801_s28 }
 0x522   :  { %v4053_v15 = vpop.permute.xlu1 %1793  ;;  %v1758_v58 = vpop.permute.xlu0 %1757 }
 0x523   :  { %v4051_v52 = vpop.permute.xlu2 %1984  ;;  %v2011_v9 = vsel %vm695_vm2, %v3932_v28, %v1758_v58 }
 0x524   :  { %v2021_v63 = vsel %vm2018_vm10, %v2011_v9, %v4053_v15 }
 0x525   :  { %v2031_v17 = vsel %vm2028_vm11, %v2021_v63, %v4041_v57 }
 0x528   :  { %1992 = vrot.lane.b32.xlu1 %v1729_v10, %s2802_s29  ;;  %1903 = vrot.lane.b32.xlu0 %v1731_v20, %s2799_s26 }
 0x529   :  { %1841 = vrot.lane.b32.xlu2 %v1727_v22, %s2797_s24  ;;  %v2012_v22 = vsel %vm695_vm2, %v3942_v27, %v4046_v44 }
 0x52a   :  { %v1923_v40 = vpop.permute.xlu1 %1922  ;;  %v1983_v49 = vpop.permute.xlu0 %1982 }
 0x52b   :  { %v4065_v39 = vpop.permute.xlu2 %1867  ;;  %v2059_v5 = vsel %vm2058_vm14, %v2049_v13, %v1923_v40 }
 0x52c   :  { %v2069_v8 = vsel %vm2068_vm15, %v2059_v5, %v4013_v25  ;;  %v2040_v25 = vsel %vm2038_vm12, %v2030_v21, %v1864_v6 }
 0x52d   :  { %v2079_v48 = vsel %vm2078_vm0, %v2069_v8, %v1983_v49  ;;  %v2050_v54 = vsel %vm2048_vm13, %v2040_v25, %v4027_v62  ;;  %v1730_v62 = vld [vmem:[#allocation3 + $0x50] sm:$0x3] }
 0x52e   :  { %2575 = vmatmul.msk.f32.vlgmr.msra.gmra.mxu2 %vm2096_vm1, %v2079_v48 }
 0x530   :  { %1875 = vrot.lane.b32.xlu1 %v1729_v10, %s2798_s25  ;;  %1839 = vrot.lane.b32.xlu0 %v1726_v32, %s2797_s24 }
 0x531   :  { %1964 = vrot.lane.b32.xlu2 %v1738_v14, %s2800_s27 }
 0x532   :  { %v1955_v42 = vpop.permute.xlu1 %1954  ;;  %v1866_v34 = vpop.permute.xlu0 %1865 }
 0x533   :  { %v4075_v12 = vpop.permute.xlu2 %1797  ;;  %v2041_v47 = vsel %vm2038_vm12, %v2031_v17, %v1866_v34 }
 0x538   :  { %1934 = vrot.lane.b32.xlu1 %v1735_v60, %s2801_s28  ;;  %1994 = vrot.lane.b32.xlu0 %v1741_v50, %s2802_s29 }
 0x539   :  { %1905 = vrot.lane.b32.xlu2 %v1732_v59, %s2799_s26 }
 0x53a   :  { %v1896_v18 = vpop.permute.xlu1 %1895  ;;  %v1796_v41 = vpop.permute.xlu0 %1795 }
 0x53b   :  { %v1927_v31 = vpop.permute.xlu2 %1926  ;;  %v2051_v6 = vsel %vm2048_vm13, %v2041_v47, %v1896_v18  ;;  %v2022_v20 = vsel %vm2018_vm10, %v2012_v22, %v1796_v41 }
 0x53c   :  { %v2061_v30 = vsel %vm2058_vm14, %v2051_v6, %v1927_v31 }
 0x540   :  { %1966 = vrot.lane.b32.xlu1 %v1739_v23, %s2800_s27  ;;  %1936 = vrot.lane.b32.xlu0 %v1736_v55, %s2801_s28 }
 0x541   :  { %1996 = vrot.lane.b32.xlu2 %v1742_v38, %s2802_s29 }
 0x542   :  { %v1832_v11 = vpop.permute.xlu1 %1831  ;;  %v1925_v35 = vpop.permute.xlu0 %1924 }
 0x543   :  { %v2060_v0 = vsel %vm2058_vm14, %v2050_v54, %v1925_v35  ;;  %v1959_v29 = vpop.permute.xlu2 %1958  ;;  %v2032_v13 = vsel %vm2028_vm11, %v2022_v20, %v1832_v11 }
 0x544   :  { %v2070_v3 = vsel %vm2068_vm15, %v2060_v0, %v1955_v42  ;;  %v2042_v40 = vsel %vm2038_vm12, %v2032_v13, %v4065_v39 }
 0x545   :  { %v2080_v37 = vsel %vm2078_vm0, %v2070_v3, %v4051_v52 }
 0x546   :  { %2576 = vmatmul.msk.f32.gmra.mxu2 %vm2096_vm1, %v2080_v37 }
 0x548   :  { %1907 = vrot.lane.b32.xlu1 %v1733_v56, %s2799_s26  ;;  %1877 = vrot.lane.b32.xlu0 %v1730_v62, %s2798_s25 }
 0x549   :  { %1938 = vrot.lane.b32.xlu2 %v1737_v24, %s2801_s28 }
 0x54a   :  { %v1762_v43 = vpop.permute.xlu1 %1761  ;;  %v1957_v28 = vpop.permute.xlu0 %1956 }
 0x54b   :  { %v1900_v32 = vpop.permute.xlu2 %1899  ;;  %v2071_v52 = vsel %vm2068_vm15, %v2061_v30, %v1957_v28  ;;  %v2013_v60 = vsel %vm695_vm2, %v3956_v51, %v1762_v43 }
 0x54c   :  { %v2023_v50 = vsel %vm2018_vm10, %v2013_v60, %v4075_v12 }
 0x550   :  { %1998 = vrot.lane.b32.xlu1 %v1743_v1, %s2802_s29  ;;  %1968 = vrot.lane.b32.xlu0 %v1740_v4, %s2800_s27 }
 0x552   :  { %v1987_v15 = vpop.permute.xlu1 %1986  ;;  %v1898_v53 = vpop.permute.xlu0 %1897 }
 0x553   :  { %v2081_v58 = vsel %vm2078_vm0, %v2071_v52, %v1987_v15  ;;  %v1836_v2 = vpop.permute.xlu2 %1835  ;;  %v2052_v49 = vsel %vm2048_vm13, %v2042_v40, %v1898_v53 }
 0x554   :  { %2577 = vmatmul.msk.f32.gmra.mxu2 %vm2096_vm1, %v2081_v58 }
 0x55a   :  { %v1870_v57 = vpop.permute.xlu1 %1869  ;;  %v1834_v36 = vpop.permute.xlu0 %1833 }
 0x55b   :  { %v1766_v33 = vpop.permute.xlu2 %1765  ;;  %v2033_v45 = vsel %vm2028_vm11, %v2023_v50, %v1834_v36 }
 0x55c   :  { %v2043_v18 = vsel %vm2038_vm12, %v2033_v45, %v1870_v57  ;;  %v2015_v47 = vsel %vm695_vm2, %v3981_v16, %v1766_v33 }
 0x55d   :  { %v2053_v31 = vsel %vm2048_vm13, %v2043_v18, %v1900_v32 }
 0x562   :  { %v1800_v46 = vpop.permute.xlu1 %1799  ;;  %v1764_v10 = vpop.permute.xlu0 %1763 }
 0x563   :  { %v1991_v27 = vpop.permute.xlu2 %1990  ;;  %v2014_v11 = vsel %vm695_vm2, %v3965_v19, %v1764_v10 }
 0x564   :  { %v2024_v35 = vsel %vm2018_vm10, %v2014_v11, %v1800_v46 }
 0x565   :  { %v2034_v3 = vsel %vm2028_vm11, %v2024_v35, %v1836_v2 }
 0x56a   :  { %v1929_v5 = vpop.permute.xlu1 %1928  ;;  %v1989_v8 = vpop.permute.xlu0 %1988 }
 0x56b   :  { %v2062_v48 = vsel %vm2058_vm14, %v2052_v49, %v1929_v5  ;;  %v1874_v59 = vpop.permute.xlu2 %1873  ;;  %v1700_v49 = vld [vmem:[#allocation3 + $0x40] sm:$0x3] }
 0x56c   :  { %v2072_v14 = vsel %vm2068_vm15, %v2062_v48, %v1959_v29 }
 0x56d   :  { %v2082_v42 = vsel %vm2078_vm0, %v2072_v14, %v1989_v8 }
 0x56e   :  { %2578 = vmatmul.msk.f32.gmra.mxu2 %vm2096_vm1, %v2082_v42 }
 0x572   :  { %v1961_v44 = vpop.permute.xlu1 %1960  ;;  %v1872_v34 = vpop.permute.xlu0 %1871 }
 0x573   :  { %v1804_v7 = vpop.permute.xlu2 %1803  ;;  %v2044_v9 = vsel %vm2038_vm12, %v2034_v3, %v1872_v34 }
 0x57a   :  { %v1902_v39 = vpop.permute.xlu1 %1901  ;;  %v1802_v61 = vpop.permute.xlu0 %1801 }
 0x57b   :  { %v1933_v12 = vpop.permute.xlu2 %1932  ;;  %v2054_v37 = vsel %vm2048_vm13, %v2044_v9, %v1902_v39  ;;  %v2025_v6 = vsel %vm2018_vm10, %v2015_v47, %v1802_v61 }
 0x57c   :  { %v2064_v56 = vsel %vm2058_vm14, %v2054_v37, %v1933_v12 }
 0x582   :  { %v1838_v41 = vpop.permute.xlu1 %1837  ;;  %v1931_v21 = vpop.permute.xlu0 %1930 }
 0x583   :  { %v2063_v38 = vsel %vm2058_vm14, %v2053_v31, %v1931_v21  ;;  %v1842_v29 = vpop.permute.xlu2 %1841  ;;  %v2035_v1 = vsel %vm2028_vm11, %v2025_v6, %v1838_v41  ;;  %v4177_v31 = vld [vmem:[%s4339_s5] sm:$0xff] }
 0x584   :  { %v2073_v23 = vsel %vm2068_vm15, %v2063_v38, %v1961_v44  ;;  %v2045_v30 = vsel %vm2038_vm12, %v2035_v1, %v1874_v59  ;;  %v2095_v38 = vperm.slane %v4177_v31, 3 }
 0x585   :  { %v2083_v51 = vsel %vm2078_vm0, %v2073_v23, %v1991_v27 }
 0x586   :  { %2579 = vmatmul.msk.f32.gmra.mxu2 %vm2096_vm1, %v2083_v51 }
 0x58a   :  { %v1768_v25 = vpop.permute.xlu1 %1767  ;;  %v1770_v55 = vpop.permute.xlu0 %1769 }
 0x58b   :  { %v1965_v19 = vpop.permute.xlu2 %1964  ;;  %v2016_v4 = vsel %vm695_vm2, %v4000_v26, %v1768_v25  ;;  %v2017_v5 = vsel %vm695_vm2, %v1700_v49, %v1770_v55  ;;  %vm2227_vm2 = vcmask 130048  }
 0x58c   :  { %v2026_v57 = vsel %vm2018_vm10, %v2016_v4, %v1804_v7 }
 0x592   :  { %v1806_v54 = vpop.permute.xlu1 %1805  ;;  %v1963_v0 = vpop.permute.xlu0 %1962 }
 0x593   :  { %v2074_v24 = vsel %vm2068_vm15, %v2064_v56, %v1963_v0  ;;  %v1906_v15 = vpop.permute.xlu2 %1905  ;;  %v2027_v8 = vsel %vm2018_vm10, %v2017_v5, %v1806_v54 }
 0x594   :  { %v2037_v42 = vsel %vm2028_vm11, %v2027_v8, %v1842_v29 }
 0x59a   :  { %v1993_v62 = vpop.permute.xlu1 %1992  ;;  %v1904_v63 = vpop.permute.xlu0 %1903 }
 0x59b   :  { %v2084_v43 = vsel %vm2078_vm0, %v2074_v24, %v1993_v62  ;;  %v2055_v32 = vsel %vm2048_vm13, %v2045_v30, %v1904_v63  ;;  %v1997_v33 = vpop.permute.xlu2 %1996 }
 0x59c   :  { %2580 = vmatmul.msk.f32.gmra.mxu2 %vm2096_vm1, %v2084_v43 }
 0x5a2   :  { %v1876_v28 = vpop.permute.xlu1 %1875  ;;  %v1840_v17 = vpop.permute.xlu0 %1839 }
 0x5a3   :  { %v2036_v2 = vsel %vm2028_vm11, %v2026_v57, %v1840_v17  ;;  %v1939_v34 = vpop.permute.xlu2 %1938 }
 0x5a4   :  { %v2046_v26 = vsel %vm2038_vm12, %v2036_v2, %v1876_v28 }
 0x5a5   :  { %v2056_v22 = vsel %vm2048_vm13, %v2046_v26, %v1906_v15 }
 0x5aa   :  { %v1935_v52 = vpop.permute.xlu1 %1934  ;;  %v1995_v53 = vpop.permute.xlu0 %1994 }
 0x5ab   :  { %v2065_v58 = vsel %vm2058_vm14, %v2055_v32, %v1935_v52 }
 0x5ac   :  { %v2075_v16 = vsel %vm2068_vm15, %v2065_v58, %v1965_v19 }
 0x5ad   :  { %v2085_v36 = vsel %vm2078_vm0, %v2075_v16, %v1995_v53 }
 0x5ae   :  { %2581 = vmatmul.msk.f32.gmra.mxu2 %vm2096_vm1, %v2085_v36 }
 0x5b1   :  { %v2145_v45 = vpop.f32.mrf.mxu2 }
 0x5b2   :  { %v1967_v46 = vpop.permute.xlu1 %1966  ;;  %v1937_v10 = vpop.permute.xlu0 %1936  ;;  %v2146_v62 = vadd.f32 %v2145_v45, %v2095_v38 }
 0x5b3   :  { %v2066_v20 = vsel %vm2058_vm14, %v2056_v22, %v1937_v10 }
 0x5b4   :  { %v2076_v13 = vsel %vm2068_vm15, %v2066_v20, %v1967_v46  ;;  %v4195_v17 = vmax.f32 %v2146_v62, 0.0 }
 0x5b5   :  { %v2086_v40 = vsel %vm2078_vm0, %v2076_v13, %v1997_v33 }
 0x5b6   :  { %2582 = vmatmul.msk.f32.gmra.mxu2 %vm2096_vm1, %v2086_v40  ;;  %v2182_v6 = vmul.f32 %v4195_v17, %v4195_v17 }
 0x5ba   :  { %v1908_v48 = vpop.permute.xlu1 %1907  ;;  %v1878_v14 = vpop.permute.xlu0 %1877 }
 0x5bb   :  { %v2047_v27 = vsel %vm2038_vm12, %v2037_v42, %v1878_v14 }
 0x5bc   :  { %v2057_v44 = vsel %vm2048_vm13, %v2047_v27, %v1908_v48 }
 0x5bd   :  { %v2067_v39 = vsel %vm2058_vm14, %v2057_v44, %v1939_v34 }
 0x5c2   :  { %v1999_v60 = vpop.permute.xlu1 %1998  ;;  %v1969_v59 = vpop.permute.xlu0 %1968 }
 0x5c3   :  { %v2077_v61 = vsel %vm2068_vm15, %v2067_v39, %v1969_v59 }
 0x5c4   :  { %v2087_v50 = vsel %vm2078_vm0, %v2077_v61, %v1999_v60 }
 0x5c5   :  { %2583 = vmatmul.msk.f32.gmra.mxu2 %vm2096_vm1, %v2087_v50  ;;  %v2181_v50 = vld [vmem:[%s4341_s7] sm:$0x1]  ;;  %s2804_s7 = smov 112  }
 0x5c9   :  { %v2148_v18 = vpop.f32.mrf.mxu2 }
 0x5ca   :  { %v2149_v56 = vadd.f32 %v2148_v18, %v2095_v38 }
 0x5cc   :  { %v4193_v19 = vmax.f32 %v2149_v56, 0.0 }
 0x5ce   :  { %v2183_v47 = vmul.f32 %v4193_v19, %v4193_v19 }
 0x5d0   :  { %v2750_v4 = vpack.i.bf16 %v2182_v6, %v2183_v47 }
 0x5d7   :  { %v2151_v41 = vpop.f32.mrf.mxu2 }
 0x5d8   :  { %v2152_v52 = vadd.f32 %v2151_v41, %v2095_v38 }
 0x5da   :  { %v4205_v57 = vmax.f32 %v2152_v52, 0.0 }
 0x5dc   :  { %v2184_v2 = vmul.f32 %v4205_v57, %v4205_v57 }
 0x5f1   :  { %v2154_v7 = vpop.f32.mrf.mxu2 }
 0x5f2   :  { %v2155_v30 = vadd.f32 %v2154_v7, %v2095_v38 }
 0x5f4   :  { %v4203_v53 = vmax.f32 %v2155_v30, 0.0 }
 0x5f6   :  { %v2185_v16 = vmul.f32 %v4203_v53, %v4203_v53 }
 0x5f8   :  { %v2745_v36 = vpack.i.bf16 %v2184_v2, %v2185_v16 }
 0x609   :  { %v2157_v21 = vpop.f32.mrf.mxu2 }
 0x60a   :  { %v2158_v23 = vadd.f32 %v2157_v21, %v2095_v38 }
 0x60c   :  { %v4180_v25 = vmax.f32 %v2158_v23, 0.0 }
 0x60e   :  { %v2186_v11 = vmul.f32 %v4180_v25, %v4180_v25 }
 0x61f   :  { %v2160_v51 = vpop.f32.mrf.mxu2 }
 0x620   :  { %v2161_v55 = vadd.f32 %v2160_v51, %v2095_v38 }
 0x622   :  { %v4182_v12 = vmax.f32 %v2161_v55, 0.0 }
 0x624   :  { %v2187_v35 = vmul.f32 %v4182_v12, %v4182_v12 }
 0x626   :  { %v2740_v54 = vpack.i.bf16 %v2186_v11, %v2187_v35 }
 0x628   :  { %2741 = vrot.lane.b32.xlu1 %v2740_v54, %s2803_s21 }
 0x631   :  { %v2163_v0 = vpop.f32.mrf.mxu2 }
 0x632   :  { %v2164_v3 = vadd.f32 %v2163_v0, %v2095_v38 }
 0x634   :  { %v4189_v37 = vmax.f32 %v2164_v3, 0.0 }
 0x636   :  { %v2188_v63 = vmul.f32 %v4189_v37, %v4189_v37 }
 0x639   :  { %v2166_v9 = vpop.f32.mrf.mxu2 }
 0x63a   :  { %v2167_v29 = vadd.f32 %v2166_v9, %v2095_v38 }
 0x63c   :  { %v2179_v24 = vmax.f32 %v2167_v29, 0.0 }
 0x63e   :  { %v2189_v43 = vmul.f32 %v2179_v24, %v2179_v24 }
 0x640   :  { %v2735_v28 = vpack.i.bf16 %v2188_v63, %v2189_v43 }
 0x642   :  { %2736 = vrot.lane.b32.xlu0 %v2735_v28, %s2803_s21 }
 0x648   :  { %v2169_v1 = vpop.f32.mrf.mxu2 }
 0x649   :  { %v2170_v32 = vadd.f32 %v2169_v1, %v2095_v38 }
 0x64a   :  { %2751 = vrot.lane.b32.xlu0 %v2750_v4, %s2803_s21 }
 0x64b   :  { %v2180_v15 = vmax.f32 %v2170_v32, 0.0 }
 0x64d   :  { %v2190_v58 = vmul.f32 %v2180_v15, %v2180_v15 }
 0x64f   :  { %2216 = vrot.lane.b32.xlu2 %v2190_v58, %s2803_s21 }
 0x657   :  { %2746 = vrot.lane.b32.xlu2 %v2745_v36, %s2803_s21 }
 0x69a   :  { %v2742_v10 = vpop.permute.xlu1 %2741 }
 0x69b   :  { %v2743_v13 = vunpack.i.l.bf16 %v2742_v10  ;;  %v2744_v5 = vunpack.i.h.bf16 %v2742_v10 }
 0x69d   :  { %v2233_v14 = vsel %vm2227_vm2, %v4182_v12, %v2743_v13  ;;  %v2232_v44 = vsel %vm2227_vm2, %v4180_v25, %v2744_v5 }
 0x6a9   :  { %v2217_v26 = vpop.permute.xlu2 %2216 }
 0x6aa   :  { %v2236_v46 = vsel %vm2227_vm2, %v2180_v15, %v2217_v26 }
 0x6ab   :  { %2584 = vmatpush.msk.msrb.mxu3 %vm1506_vm7, %v2236_v46  ;;  %vm2237_vm7 = vcmask 539648  }
 0x6b1   :  { %v2747_v49 = vpop.permute.xlu2 %2746 }
 0x6b2   :  { %v2748_v48 = vunpack.i.l.bf16 %v2747_v49  ;;  %v2749_v27 = vunpack.i.h.bf16 %v2747_v49 }
 0x6b4   :  { %v2737_v22 = vpop.permute.xlu0 %2736  ;;  %v2231_v60 = vsel %vm2227_vm2, %v4203_v53, %v2748_v48  ;;  %v2230_v39 = vsel %vm2227_vm2, %v4205_v57, %v2749_v27 }
 0x6b5   :  { %v2739_v20 = vunpack.i.h.bf16 %v2737_v22  ;;  %v2738_v33 = vunpack.i.l.bf16 %v2737_v22 }
 0x6b7   :  { %v2235_v40 = vsel %vm2227_vm2, %v2179_v24, %v2738_v33  ;;  %v2234_v8 = vsel %vm2227_vm2, %v4189_v37, %v2739_v20 }
 0x6b8   :  { %2252 = vmatpush.msrb.mxu3 %v2235_v40 }
 0x6ba   :  { %2253 = vmatpush.msrb.mxu3 %v2234_v8 }
 0x6bc   :  { %v2752_v42 = vpop.permute.xlu0 %2751  ;;  %2254 = vmatpush.msrb.mxu3 %v2233_v14 }
 0x6bd   :  { %v2753_v34 = vunpack.i.l.bf16 %v2752_v42  ;;  %v2754_v59 = vunpack.i.h.bf16 %v2752_v42 }
 0x6be   :  { %2255 = vmatpush.msrb.mxu3 %v2232_v44 }
 0x6bf   :  { %v2229_v61 = vsel %vm2227_vm2, %v4193_v19, %v2753_v34  ;;  %v2228_v45 = vsel %vm2227_vm2, %v4195_v17, %v2754_v59  ;;  %v2376_v59 = vld [vmem:[%s4337_s3 + $0x30] sm:$0xff] }
 0x6c0   :  { %2256 = vmatpush.msrb.mxu3 %v2231_v60  ;;  %v2377_v60 = vld [vmem:[%s4337_s3 + $0x38] sm:$0xff] }
 0x6c1   :  { %2391 = vmatpush.msra.mxu1 %v2377_v60 }
 0x6c2   :  { %2257 = vmatpush.msrb.mxu3 %v2230_v39  ;;  %v2375_v39 = vld [vmem:[%s4337_s3 + $0x28] sm:$0xff] }
 0x6c3   :  { %2392 = vmatpush.msra.mxu1 %v2376_v59 }
 0x6c4   :  { %2258 = vmatpush.msrb.mxu3 %v2229_v61  ;;  %v2374_v61 = vld [vmem:[%s4337_s3 + $0x20] sm:$0xff] }
 0x6c5   :  { %2393 = vmatpush.msra.mxu1 %v2375_v39 }
 0x6c6   :  { %2259 = vmatpush.msrb.mxu3 %v2228_v45  ;;  %v2372_v45 = vld [vmem:[%s4337_s3 + $0x10] sm:$0xff] }
 0x6c7   :  { %2585 = vmatmul.msk.f32.vlgmr.msrb.gmra.mxu3 %vm2237_vm7, %v2181_v50  ;;  %v2373_v50 = vld [vmem:[%s4337_s3 + $0x18] sm:$0xff]  ;;  %2394 = vmatpush.msra.mxu1 %v2374_v61 }
 0x6c9   :  { %2395 = vmatpush.msra.mxu1 %v2373_v50 }
 0x6cb   :  { %2396 = vmatpush.msra.mxu1 %v2372_v45 }
 0x74a   :  { %v2261_v18 = vpop.f32.mrf.mxu3 }
 0x74b   :  { %v2264_v41 = vmul.f32 %v2261_v18, %v2261_v18 }
 0x74d   :  { %2266 = vrot.lane.b32.xlu1 %v2264_v41, %s2803_s21  ;;  %v2370_v41 = vld [vmem:[%s4337_s3] sm:$0xff] }
 0x7bf   :  { %v2267_v7 = vpop.permute.xlu1 %2266 }
 0x7c0   :  { %v2269_v21 = vsub.f32 %v2261_v18, %v2267_v7  ;;  %v2419_v7 = vld [vmem:[%s4338_s4 + $0x78] sm:$0xff] }
 0x7c1   :  { %2421 = vmatpush.msra.mxu3 %v2419_v7 }
 0x7c2   :  { %v2270_v38 = vmax.f32 %v2269_v21, 0.0  ;;  %v2418_v21 = vld [vmem:[%s4338_s4 + $0x70] sm:$0xff] }
 0x7c3   :  { %2422 = vmatpush.msra.mxu3 %v2418_v21 }
 0x7c4   :  { %v2271_v23 = vadd.f32 1e-05, %v2270_v38  ;;  %v2417_v38 = vld [vmem:[%s4338_s4 + $0x68] sm:$0xff] }
 0x7c5   :  { %2423 = vmatpush.msra.mxu3 %v2417_v38 }
 0x7c6   :  { %2757 = vrsqrt.f32 %v2271_v23  ;;  %vm2278_vm4 = vweird.f32 %v2271_v23 }
 0x7cc   :  { %v2758_v51 = vpop.eup %2757 }
 0x7cd   :  { %v2273_v55 = vmul.f32 %v2758_v51, %v2271_v23  ;;  %vm2279_vm3 = vweird.f32 %v2758_v51  ;;  %v2416_v23 = vld [vmem:[%s4338_s4 + $0x60] sm:$0xff] }
 0x7ce   :  { %vm2280_vm5 = vmor %vm2278_vm4, %vm2279_vm3  ;;  %2424 = vmatpush.msra.mxu3 %v2416_v23 }
 0x7cf   :  { %v2274_v11 = vmul.f32 %v2758_v51, %v2273_v55  ;;  %v2414_v55 = vld [vmem:[%s4338_s4 + $0x50] sm:$0xff] }
 0x7d1   :  { %v2275_v35 = vmul.f32 0.5, %v2274_v11  ;;  %v2413_v11 = vld [vmem:[%s4338_s4 + $0x48] sm:$0xff] }
 0x7d3   :  { %v2276_v54 = vsub.f32 1.5, %v2275_v35  ;;  %v2412_v35 = vld [vmem:[%s4338_s4 + $0x40] sm:$0xff] }
 0x7d5   :  { %v2277_v0 = vmul.f32 %v2758_v51, %v2276_v54  ;;  %v2411_v54 = vld [vmem:[%s4338_s4 + $0x38] sm:$0xff] }
 0x7d7   :  { %v2281_v3 = vsel %vm2280_vm5, %v2758_v51, %v2277_v0  ;;  %v2415_v51 = vld [vmem:[%s4338_s4 + $0x58] sm:$0xff] }
 0x7d8   :  { %v2283_v9 = vrot.slane %v2281_v3, 4  ;;  %2425 = vmatpush.msra.mxu3 %v2415_v51 }
 0x7da   :  { %2284 = vrot.lane.b32.xlu2 %v2283_v9, %s2804_s7  ;;  %2426 = vmatpush.msra.mxu3 %v2414_v55  ;;  %v2410_v9 = vld [vmem:[%s4338_s4 + $0x30] sm:$0xff] }
 0x7dc   :  { %2427 = vmatpush.msra.mxu3 %v2413_v11 }
 0x7de   :  { %2428 = vmatpush.msra.mxu3 %v2412_v35 }
 0x7e0   :  { %2429 = vmatpush.msra.mxu3 %v2411_v54 }
 0x7e2   :  { %2430 = vmatpush.msra.mxu3 %v2410_v9 }
 0x834   :  { %v2285_v29 = vpop.permute.xlu2 %2284 }
 0x835   :  { %v2287_v56 = vmul.f32 %v4177_v31, %v2285_v29  ;;  %v2409_v29 = vld [vmem:[%s4338_s4 + $0x28] sm:$0xff] }
 0x836   :  { %2431 = vmatpush.msra.mxu3 %v2409_v29 }
 0x837   :  { %v2299_v24 = vrot.slane %v2287_v56, 4  ;;  %v2288_v63 = vperm.slane %v2287_v56, 4 }
 0x839   :  { %v2301_v62 = vmul.f32 %v2299_v24, %v2261_v18  ;;  %v2293_v47 = vmul.f32 %v2288_v63, %v4180_v25  ;;  %v2294_v1 = vmul.f32 %v2288_v63, %v4182_v12  ;;  %v2295_v4 = vmul.f32 %v2288_v63, %v4189_v37  ;;  %v2371_v18 = vld [vmem:[%s4337_s3 + $0x8] sm:$0xff]  ;;  %v2408_v24 = vld [vmem:[%s4338_s4 + $0x20] sm:$0xff] }
 0x83a   :  { %v2292_v32 = vmul.f32 %v2288_v63, %v4203_v53  ;;  %v2289_v15 = vmul.f32 %v2288_v63, %v4195_v17  ;;  %v2291_v2 = vmul.f32 %v2288_v63, %v4205_v57  ;;  %v2290_v36 = vmul.f32 %v2288_v63, %v4193_v19  ;;  %2397 = vmatpush.msra.mxu1 %v2371_v18  ;;  %v2407_v63 = vld [vmem:[%s4338_s4 + $0x18] sm:$0xff] }
 0x83b   :  { %v2303_v43 = vrot.slane %v2301_v62, 3  ;;  %2432 = vmatpush.msra.mxu3 %v2408_v24 }
 0x83c   :  { %2398 = vmatpush.msra.mxu1 %v2370_v41 }
 0x83d   :  { %v2305_v28 = vsub.f32 %v4177_v31, %v2303_v43  ;;  %2433 = vmatpush.msra.mxu3 %v2407_v63 }
 0x83f   :  { %v2306_v6 = vperm.slane %v2305_v28, 5 }
 0x841   :  { %v2311_v30 = vadd.f32 %v2306_v6, %v2293_v47  ;;  %v2312_v52 = vadd.f32 %v2306_v6, %v2294_v1  ;;  %v2313_v58 = vadd.f32 %v2306_v6, %v2295_v4  ;;  %v2310_v16 = vadd.f32 %v2306_v6, %v2292_v32 }
 0x842   :  { %v2307_v25 = vadd.f32 %v2306_v6, %v2289_v15  ;;  %v2309_v12 = vadd.f32 %v2306_v6, %v2291_v2  ;;  %v2308_v37 = vadd.f32 %v2306_v6, %v2290_v36  ;;  %v2406_v15 = vld [vmem:[%s4338_s4 + $0x10] sm:$0xff]  ;;  %v2378_v2 = vperm.slane %v4177_v31, 6 }
 0x843   :  { %2320 = vst.msk [vmem:[#allocation4 + $0x20] sm:$0xff] %vm2227_vm2, %v2311_v30  ;;  %2434 = vmatpush.msra.mxu3 %v2406_v15 }
 0x844   :  { %2321 = vst.msk [vmem:[#allocation4 + $0x28] sm:$0xff] %vm2227_vm2, %v2312_v52 }
 0x845   :  { %2322 = vst.msk [vmem:[#allocation4 + $0x30] sm:$0xff] %vm2227_vm2, %v2313_v58  ;;  %v2405_v58 = vld [vmem:[%s4338_s4 + $0x8] sm:$0xff] }
 0x846   :  { %2319 = vst.msk [vmem:[#allocation4 + $0x18] sm:$0xff] %vm2227_vm2, %v2310_v16  ;;  %v2404_v16 = vld [vmem:[%s4338_s4] sm:$0xff]  ;;  %2435 = vmatpush.msra.mxu3 %v2405_v58  ;;  %s2806_s4 = smov [#allocation5]  }
 0x847   :  { %2316 = vst.msk [vmem:[#allocation4] sm:$0xff] %vm2227_vm2, %v2307_v25  ;;  %s2472_s20 = sshll.u32 %s2806_s4, 4  ;;  %s2473_s20 = int_to_ptr.vmem [resolvable:$true] %s2472_s20 }
 0x848   :  { %2318 = vst.msk [vmem:[#allocation4 + $0x10] sm:$0xff] %vm2227_vm2, %v2309_v12  ;;  %2436 = vmatpush.msra.mxu3 %v2404_v16 }
 0x849   :  { %2317 = vst.msk [vmem:[#allocation4 + $0x8] sm:$0xff] %vm2227_vm2, %v2308_v37  ;;  %v2420_v37 = vperm.slane %v4177_v31, 7 }
 0x84a   :  { %v2347_v17 = vld [vmem:[#allocation4 + $0x20] sm:$0x3]  ;;  %v2348_v53 = vld [vmem:[#allocation4 + $0x22] sm:$0x3] }
 0x84b   :  { %v2349_v19 = vmax.f32 %v2347_v17, %v2348_v53  ;;  %v2350_v57 = vld [vmem:[#allocation4 + $0x2e] sm:$0x3]  ;;  %v2343_v49 = vld [vmem:[#allocation4 + $0x2a] sm:$0x3]  ;;  %v2345_v14 = vld [vmem:[#allocation4 + $0x2c] sm:$0x3] }
 0x84c   :  { %v2352_v22 = vld [vmem:[#allocation4 + $0x30] sm:$0x3] }
 0x84d   :  { %v2351_v26 = vmax.f32 %v2349_v19, %v2350_v57  ;;  %v2340_v46 = vld [vmem:[#allocation4 + $0x1c] sm:$0x3]  ;;  %v2341_v10 = vld [vmem:[#allocation4 + $0x1e] sm:$0x3] }
 0x84e   :  { %v2342_v20 = vmax.f32 %v2340_v46, %v2341_v10  ;;  %v2333_v33 = vld [vmem:[#allocation4 + $0x4] sm:$0x3]  ;;  %v2334_v13 = vld [vmem:[#allocation4 + $0x6] sm:$0x3]  ;;  %v2326_v0 = vld [vmem:[#allocation4] sm:$0x3] }
 0x84f   :  { %v2353_v40 = vmax.f32 %v2351_v26, %v2352_v22  ;;  %v2335_v5 = vmax.f32 %v2333_v33, %v2334_v13  ;;  %v2336_v48 = vld [vmem:[#allocation4 + $0x12] sm:$0x3]  ;;  %v2338_v44 = vld [vmem:[#allocation4 + $0x14] sm:$0x3]  ;;  %v2327_v3 = vld [vmem:[#allocation4 + $0x2] sm:$0x3] }
 0x850   :  { %v2344_v8 = vmax.f32 %v2342_v20, %v2343_v49  ;;  %v2328_v56 = vmax.f32 %v2326_v0, %v2327_v3  ;;  %v2329_v62 = vld [vmem:[#allocation4 + $0xe] sm:$0x3]  ;;  %v2331_v28 = vld [vmem:[#allocation4 + $0x10] sm:$0x3] }
 0x851   :  { %2363 = vrot.lane.b32.xlu2 %v2353_v40, %s2802_s29  ;;  %v2337_v42 = vmax.f32 %v2335_v5, %v2336_v48 }
 0x852   :  { %v2346_v27 = vmax.f32 %v2344_v8, %v2345_v14  ;;  %v2330_v43 = vmax.f32 %v2328_v56, %v2329_v62 }
 0x853   :  { %v2339_v34 = vmax.f32 %v2337_v42, %v2338_v44 }
 0x854   :  { %2359 = vrot.lane.b32.xlu1 %v2346_v27, %s2805_s23  ;;  %v2332_v6 = vmax.f32 %v2330_v43, %v2331_v28 }
 0x855   :  { %2355 = vrot.lane.b32.xlu0 %v2339_v34, %s2803_s21 }
 0x8ab   :  { %v2364_v30 = vpop.permute.xlu2 %2363 }
 0x8c6   :  { %v2360_v47 = vpop.permute.xlu1 %2359 }
 0x8c7   :  { %v2356_v1 = vpop.permute.xlu0 %2355 }
 0x8c8   :  { %v2366_v4 = vsel %vm2227_vm2, %v2332_v6, %v2356_v1 }
 0x8c9   :  { %v2368_v32 = vsel %vm2367_vm6, %v2366_v4, %v2360_v47 }
 0x8ca   :  { %v2369_v52 = vsel %vm2078_vm0, %v2368_v32, %v2364_v30 }
 0x8cb   :  { %2586 = vmatmul.msk.f32.vlgmr.msra.gmra.mxu1 %vm2379_vm9, %v2369_v52 }
 0x948   :  { %v2400_v36 = vpop.f32.mrf.mxu1 }
 0x949   :  { %v2401_v25 = vadd.f32 %v2400_v36, %v2378_v2 }
 0x94b   :  { %v2403_v12 = vmax.f32 %v2401_v25, 0.0 }
 0x94d   :  { %2437 = vmatmul.f32.vlgmr.msra.gmra.mxu3 %v2403_v12 }
 0x9d0   :  { %v2438_v17 = vpop.f32.mrf.mxu3 }
 0x9d1   :  { %v2439_v53 = vadd.f32 %v2438_v17, %v2420_v37 }
 0x9d3   :  { %v2442_v19 = vsel %vm2441_vm8, %v2439_v53, -inf }
 0x9d4   :  { %2443 = vmax.xlane.f32.xlu0 %v2442_v19 }
 0xa47   :  { %v2444_v57 = vpop.xlane.xlu0 %2443 }
 0xa48   :  { %v2445_v26 = vsub.f32 %v2439_v53, %v2444_v57 }
 0xa4a   :  { %v2446_v46 = vmul.f32 1.442695, %v2445_v26 }
 0xa4c   :  { %2759 = vpow2.f32 %v2446_v46 }
 0xa52   :  { %v2760_v10 = vpop.eup %2759 }
 0xa53   :  { %v2448_v22 = vsel %vm2441_vm8, %v2760_v10, 0.0 }
 0xa54   :  { %2449 = vadd.xlane.f32.xlu1 %v2448_v22 }
 0xac7   :  { %v2450_v20 = vpop.xlane.xlu1 %2449 }
 0xac8   :  { %2761 = vrcp.f32 %v2450_v20  ;;  %v2462_v31 = vand.u32 2147483648, %v2450_v20  ;;  %v2460_v5 = vand.u32 2147483647, %v2450_v20  ;;  %vm2456_vm11 = vweird.f32 %v2450_v20 }
 0xaca   :  { %v2463_v48 = vor.u32 1.1754944e-38, %v2462_v31  ;;  %vm2461_vm13 = vcmp.eq.f32.partialorder %v2460_v5, 8.507059e+37 }
 0xace   :  { %v2762_v33 = vpop.eup %2761 }
 0xacf   :  { %v2452_v13 = vmul.f32 %v2762_v33, %v2450_v20  ;;  %vm2457_vm10 = vweird.f32 %v2762_v33 }
 0xad0   :  { %vm2458_vm12 = vmor %vm2456_vm11, %vm2457_vm10 }
 0xad1   :  { %v2453_v40 = vsub.f32 1.0, %v2452_v13 }
 0xad3   :  { %v2454_v49 = vmul.f32 %v2762_v33, %v2453_v40 }
 0xad5   :  { %v2455_v8 = vadd.f32 %v2762_v33, %v2454_v49 }
 0xad7   :  { %v2459_v14 = vsel %vm2458_vm12, %v2762_v33, %v2455_v8 }
 0xad8   :  { %v2464_v42 = vsel %vm2461_vm13, %v2463_v48, %v2459_v14 }
 0xad9   :  { %v2465_v27 = vmul.f32 %v2760_v10, %v2464_v42 }
 0xadb   :  { %2466 = vst.msk [vmem:[#allocation5] sm:$0x3] %vm2441_vm8, %v2465_v27 }
 0xadc   :  { %2477 = dma.vmem_to_hbm [thread:$0]  %s2473_s20, 32, %s2475_s15, [#allocation6]  }
 0xadd   :  { %2788 = dma.done.wait [#allocation6], 32  }
 0xade   :  { %2789 = vsyncadd [#allocation6], 4294967264 }
 0xadf   :  { %2482 = vsyncpa [#allocation6], 1 }

</bundles_post_ra>
